<compile_context>
chip_gen: v7x
topology: tpu7x:2x2x1
jax: 0.10.0
libtpu: 0.0.40
codegen_flags: <defaults>
</compile_context>

<pallas_src>
import functools

import jax
import jax.numpy as jnp
from jax.experimental import pallas as pl
from jax.experimental.pallas import tpu as pltpu

F32 = jnp.float32
BF16 = jnp.bfloat16
VMEM_SPEC = pl.BlockSpec(memory_space=pltpu.MemorySpace.VMEM)
BN_EPS = 1e-5


# ----------------------------- Pallas kernels -----------------------------

def _fused_mm_kernel(*refs, has_res, has_bias, has_pool, emit_raw, emit_act,
                     pool_groups, eps):
    """y = A @ W (+bias) (+residual); optional outputs:
       raw y (f32) and relu(batchnorm(y)) with training-mode batch statistics,
       optionally pooling the per-channel stats across `pool_groups`
       interleaved column groups (parity-fused transposed convolutions)."""
    it = iter(refs)
    a_ref = next(it)
    w_ref = next(it)
    r_ref = next(it) if has_res else None
    bias_ref = next(it) if has_bias else None
    pool_ref = next(it) if has_pool else None
    g_ref = next(it) if emit_act else None
    b_ref = next(it) if emit_act else None
    raw_ref = next(it) if emit_raw else None
    act_ref = next(it) if emit_act else None

    # MXU matmul: bf16 operands, f32 accumulate.
    y = jnp.dot(a_ref[...], w_ref[...], preferred_element_type=jnp.float32)
    if has_bias:
        y = y + bias_ref[...]
    if has_res:
        y = y + r_ref[...]
    if emit_raw:
        raw_ref[...] = y

    if emit_act:
        m = y.shape[0]
        # Batch statistics via a ones-row MXU dot (avoids cross-sublane reduce).
        ones = jnp.ones((1, m), jnp.float32)
        s1 = jnp.dot(ones, y, preferred_element_type=jnp.float32)      # [1, N]
        s2 = jnp.dot(ones, y * y, preferred_element_type=jnp.float32)  # [1, N]
        if has_pool:
            # Pool stats across the 4 parity column groups (and re-tile).
            s1 = jnp.dot(s1, pool_ref[...], preferred_element_type=jnp.float32)
            s2 = jnp.dot(s2, pool_ref[...], preferred_element_type=jnp.float32)
        cnt = jnp.float32(m * pool_groups)
        mean = s1 / cnt
        var = s2 / cnt - mean * mean          # biased var, like torch BN training
        scale = g_ref[...] * jax.lax.rsqrt(var + eps)
        shift = b_ref[...] - mean * scale
        act_ref[...] = jnp.maximum(y * scale + shift, 0.0).astype(act_ref.dtype)


def fused_matmul(a, w, *, residual=None, bias=None, bn=None, pool=None,
                 emit_raw=True, act_dtype=BF16, eps=BN_EPS):
    """Single-block fused MXU matmul; returns a tuple (raw?, act?)."""
    M = a.shape[0]
    N = w.shape[1]
    emit_act = bn is not None
    inputs = [a.astype(BF16), w.astype(BF16)]
    if residual is not None:
        inputs.append(residual.astype(F32))
    if bias is not None:
        inputs.append(bias.reshape(1, N).astype(F32))
    if pool is not None:
        inputs.append(pool.astype(F32))
    if emit_act:
        g, b = bn
        inputs.append(g.reshape(1, N).astype(F32))
        inputs.append(b.reshape(1, N).astype(F32))

    out_shapes = []
    if emit_raw:
        out_shapes.append(jax.ShapeDtypeStruct((M, N), F32))
    if emit_act:
        out_shapes.append(jax.ShapeDtypeStruct((M, N), act_dtype))

    kernel = functools.partial(
        _fused_mm_kernel,
        has_res=residual is not None,
        has_bias=bias is not None,
        has_pool=pool is not None,
        emit_raw=emit_raw,
        emit_act=emit_act,
        pool_groups=4 if pool is not None else 1,
        eps=eps)

    return pl.pallas_call(
        kernel,
        out_shape=tuple(out_shapes),
        in_specs=[VMEM_SPEC] * len(inputs),
        out_specs=tuple([VMEM_SPEC] * len(out_shapes)),
    )(*inputs)


def _vq_kernel(x_ref, e_ref, e2_ref, g_ref, b_ref,
               q_ref, act_ref, loss_ref, ppl_ref, *, beta, eps):
    x = x_ref[...]                                        # [M, D] f32
    e = e_ref[...]                                        # [K, D] f32
    M, D = x.shape
    K = e.shape[0]

    x2 = jnp.sum(x * x, axis=1, keepdims=True)            # [M, 1]
    xe = jax.lax.dot_general(x, e, (((1,), (1,)), ((), ())),
                             preferred_element_type=jnp.float32)   # [M, K]
    d = x2 + e2_ref[...] - 2.0 * xe                        # squared distances

    dmin = jnp.min(d, axis=1, keepdims=True)
    cols = jax.lax.broadcasted_iota(jnp.int32, d.shape, 1)
    # first index achieving the minimum (matches torch.argmin tie-breaking)
    idx = jnp.min(jnp.where(d == dmin, cols, jnp.int32(K)), axis=1, keepdims=True)
    enc = (cols == idx).astype(jnp.float32)                # one-hot [M, K]

    q = jnp.dot(enc, e, preferred_element_type=jnp.float32)   # codebook lookup
    q_ref[...] = q

    # Fused BN+ReLU of the straight-through output (feeds the decoder's first
    # ResBlock; quantized == q numerically in the forward pass).
    ones = jnp.ones((1, M), jnp.float32)
    s1 = jnp.dot(ones, q, preferred_element_type=jnp.float32)
    s2 = jnp.dot(ones, q * q, preferred_element_type=jnp.float32)
    mean = s1 / jnp.float32(M)
    var = s2 / jnp.float32(M) - mean * mean
    scale = g_ref[...] * jax.lax.rsqrt(var + eps)
    shift = b_ref[...] - mean * scale
    act_ref[...] = jnp.maximum(q * scale + shift, 0.0).astype(act_ref.dtype)

    # commitment loss: beta * mse(stop_grad(q), x)  (EMA codebook variant)
    diff2 = (q - x) ** 2
    e_lat = jnp.sum(jnp.sum(diff2, axis=1, keepdims=True), axis=0, keepdims=True)
    loss_ref[...] = beta * e_lat / jnp.float32(M * D)

    # perplexity = exp(-sum(p * log(p + 1e-10)))
    avg = jnp.dot(ones, enc, preferred_element_type=jnp.float32) / jnp.float32(M)
    ent = jnp.sum(avg * jnp.log(avg + 1e-10), axis=1, keepdims=True)
    ppl_ref[...] = jnp.exp(-ent)


def vector_quantize(flat, embed, e2, bn_next, beta):
    """VQ + fused BN1+ReLU (of the decoder's first ResBlock) in one kernel."""
    M, D = flat.shape
    g = bn_next["g"].reshape(1, D).astype(F32)
    b = bn_next["b"].reshape(1, D).astype(F32)
    q, act, loss, ppl = pl.pallas_call(
        functools.partial(_vq_kernel, beta=beta, eps=BN_EPS),
        out_shape=(jax.ShapeDtypeStruct((M, D), F32),
                   jax.ShapeDtypeStruct((M, D), BF16),
                   jax.ShapeDtypeStruct((1, 1), F32),
                   jax.ShapeDtypeStruct((1, 1), F32)),
        in_specs=[VMEM_SPEC] * 5,
        out_specs=(VMEM_SPEC, VMEM_SPEC, VMEM_SPEC, VMEM_SPEC),
    )(flat.astype(F32), embed.astype(F32), e2.astype(F32), g, b)
    return q, act, loss[0, 0], ppl[0, 0]


# ------------------------------ conv glue ---------------------------------

def _im2col(x_nhwc, kh, kw, stride, pad):
    """Patch extraction (pure XLA indexing, no compute).
    TODO(synk): fold patch extraction into the Pallas kernel (shifted in-VMEM
    matmul accumulation) to avoid materializing the expanded patch matrix."""
    B, H, W, C = x_nhwc.shape
    xp = jnp.pad(x_nhwc, ((0, 0), (pad, pad), (pad, pad), (0, 0)))
    Ho = (H + 2 * pad - kh) // stride + 1
    Wo = (W + 2 * pad - kw) // stride + 1
    cols = []
    for i in range(kh):
        for j in range(kw):
            cols.append(xp[:, i:i + stride * Ho:stride, j:j + stride * Wo:stride, :])
    patches = jnp.concatenate(cols, axis=-1)               # [B, Ho, Wo, kh*kw*C]
    return patches.reshape(B * Ho * Wo, kh * kw * C), (B, Ho, Wo)


def conv_w_mat(w_oihw):
    """Conv2d weight (O,I,kh,kw) -> im2col matmul weight [kh*kw*I, O]."""
    O, I, kh, kw = w_oihw.shape
    return jnp.transpose(w_oihw, (2, 3, 1, 0)).reshape(kh * kw * I, O)


def convT_w_mat(w_iohw):
    """ConvTranspose2d(k=4, s=2, p=1) weight (I,O,4,4) -> parity-fused 3x3
    im2col weight [9*I, 4*O]: output column (r*2+s)*O+o is the (y%2, x%2)
    parity, so a single matmul over 3x3 patches of the pad-1 input yields all
    four interleaved outputs (lane-dense [M, 4*O] result, far fewer MACs than
    a dense conv over a zero-dilated input)."""
    I, O = w_iohw.shape[0], w_iohw.shape[1]
    wz = jnp.pad(w_iohw.astype(F32), ((0, 0), (0, 0), (1, 1), (1, 1)))
    row_blocks = []
    for dy in range(3):
        for dx in range(3):
            parts = []
            for r in range(2):
                for s in range(2):
                    ky = r - 2 * dy + 4      # (r - 2*dy + 3) + 1 pad offset
                    kx = s - 2 * dx + 4      # invalid taps hit the zero padding
                    parts.append(wz[:, :, ky, kx])            # [I, O]
            row_blocks.append(jnp.concatenate(parts, axis=1))  # [I, 4*O]
    return jnp.concatenate(row_blocks, axis=0)                  # [9*I, 4*O]


def deinterleave(y_flat, B, H, W, C):
    """[B*H*W, 4*C] parity-fused conv-transpose output -> [B, 2H, 2W, C]."""
    y = y_flat.reshape(B, H, W, 2, 2, C)
    y = jnp.transpose(y, (0, 1, 3, 2, 4, 5))
    return y.reshape(B, 2 * H, 2 * W, C)


def bn_rows(bn, groups=1):
    g = jnp.tile(bn["g"].astype(F32), groups).reshape(1, -1)
    b = jnp.tile(bn["b"].astype(F32), groups).reshape(1, -1)
    return g, b


# ------------------------------ forward pass -------------------------------

def vqvae_forward(params, x_nchw, *, beta=0.25):
    ep, dp, cb = params["enc"], params["dec"], params["codebook"]
    x = jnp.transpose(x_nchw, (0, 2, 3, 1)).astype(BF16)     # NCHW -> NHWC

    # ---- encoder: [conv(4,2,1) -> BN -> ReLU] x2, conv(4,2,1) ----
    a, (B, H, W) = _im2col(x, 4, 4, 2, 1)
    (h,) = fused_matmul(a, conv_w_mat(ep["conv1"]), bn=bn_rows(ep["bn1"]),
                        emit_raw=False)
    a, (B, H, W) = _im2col(h.reshape(B, H, W, -1), 4, 4, 2, 1)
    (h,) = fused_matmul(a, conv_w_mat(ep["conv2"]), bn=bn_rows(ep["bn2"]),
                        emit_raw=False)
    a, (B, H, W) = _im2col(h.reshape(B, H, W, -1), 4, 4, 2, 1)
    # conv3 raw output + fused BN1+ReLU of the first encoder ResBlock
    cur, cur_act = fused_matmul(a, conv_w_mat(ep["conv3"]),
                                bn=bn_rows(ep["res"][0]["bn1"]), emit_raw=True)
    D = cur.shape[1]

    # ---- encoder residual stack (2 fused kernels per block) ----
    n_res = len(ep["res"])
    for i, blk in enumerate(ep["res"]):
        a3, _ = _im2col(cur_act.reshape(B, H, W, D), 3, 3, 1, 1)
        (a2,) = fused_matmul(a3, conv_w_mat(blk["conv1"]),
                             bn=bn_rows(blk["bn2"]), emit_raw=False)
        if i + 1 < n_res:
            cur, cur_act = fused_matmul(a2, conv_w_mat(blk["conv2"]),
                                        residual=cur,
                                        bn=bn_rows(ep["res"][i + 1]["bn1"]),
                                        emit_raw=True)
        else:
            (cur,) = fused_matmul(a2, conv_w_mat(blk["conv2"]),
                                  residual=cur, emit_raw=True)
    z_e = cur                                               # [B*H*W, D] f32

    # ---- codebook (VectorQuantizerEMA, decay > 0): single fused VQ kernel ----
    e2 = jnp.sum(cb["embed"].astype(F32) ** 2, axis=1)[None, :]   # precomputed
    q, cur_act, q_loss, perplexity = vector_quantize(
        z_e, cb["embed"], e2, dp["res"][0]["bn1"], beta)
    # straight-through: inputs + stop_grad(q - inputs) == q numerically.
    # TODO(synk): training-time EMA cluster-size / codebook-weight buffer
    # updates are in-place Parameter mutations that do not affect this
    # forward's outputs; omitted here.
    cur = q

    # ---- decoder residual stack ----
    for i, blk in enumerate(dp["res"]):
        a3, _ = _im2col(cur_act.reshape(B, H, W, D), 3, 3, 1, 1)
        (a2,) = fused_matmul(a3, conv_w_mat(blk["conv1"]),
                             bn=bn_rows(blk["bn2"]), emit_raw=False)
        if i + 1 < len(dp["res"]):
            cur, cur_act = fused_matmul(a2, conv_w_mat(blk["conv2"]),
                                        residual=cur,
                                        bn=bn_rows(dp["res"][i + 1]["bn1"]),
                                        emit_raw=True)
        else:
            # last block: only BN_a+ReLU(x + conv1x1(...)) is needed downstream
            (cur_act,) = fused_matmul(a2, conv_w_mat(blk["conv2"]),
                                      residual=cur, bn=bn_rows(dp["bn_a"]),
                                      emit_raw=False)

    # ---- decoder transposed convs (parity-fused, lane-dense outputs) ----
    pool = jnp.tile(jnp.eye(D, dtype=F32), (4, 4))           # parity stat pooling
    a3, _ = _im2col(cur_act.reshape(B, H, W, D), 3, 3, 1, 1)
    (t,) = fused_matmul(a3, convT_w_mat(dp["convT1"]),
                        bn=bn_rows(dp["bn_b"], 4), pool=pool, emit_raw=False)
    d = deinterleave(t, B, H, W, D)
    H, W = 2 * H, 2 * W

    a3, _ = _im2col(d, 3, 3, 1, 1)
    (t,) = fused_matmul(a3, convT_w_mat(dp["convT2"]),
                        bn=bn_rows(dp["bn_c"], 4), pool=pool, emit_raw=False)
    d = deinterleave(t, B, H, W, D)
    H, W = 2 * H, 2 * W

    inc = dp["convT3"].shape[1]
    a3, _ = _im2col(d, 3, 3, 1, 1)
    (t,) = fused_matmul(a3, convT_w_mat(dp["convT3"]),
                        bias=jnp.tile(dp["convT3_b"], 4), emit_raw=True)
    d = deinterleave(t, B, H, W, inc)                        # [B, 2H, 2W, inc] f32

    x_recon = jnp.transpose(d, (0, 3, 1, 2))                 # back to NCHW
    return q_loss, x_recon, perplexity


# ------------------------------ params init --------------------------------

def init_params(key, inc, embed_dim, num_embed, num_residual):
    keys = iter(jax.random.split(key, 64))

    def w(shape, scale=0.1):
        return jax.random.normal(next(keys), shape, F32) * scale

    def bn(c):
        return {"g": jnp.ones((c,), F32), "b": jnp.zeros((c,), F32)}

    def resblock(dim):
        return {"bn1": bn(dim), "conv1": w((dim, dim, 3, 3)),
                "bn2": bn(dim), "conv2": w((dim, dim, 1, 1))}

    return {
        "enc": {
            "conv1": w((embed_dim, inc, 4, 4)),        # Conv2d weight (O,I,kh,kw)
            "bn1": bn(embed_dim),
            "conv2": w((embed_dim, embed_dim, 4, 4)),
            "bn2": bn(embed_dim),
            "conv3": w((embed_dim, embed_dim, 4, 4)),
            "res": [resblock(embed_dim) for _ in range(num_residual)],
        },
        "codebook": {
            "embed": jax.random.normal(next(keys), (num_embed, embed_dim), F32),
        },
        "dec": {
            "res": [resblock(embed_dim) for _ in range(num_residual)],
            "bn_a": bn(embed_dim),
            "convT1": w((embed_dim, embed_dim, 4, 4)),  # ConvTranspose2d (I,O,kh,kw)
            "bn_b": bn(embed_dim),
            "convT2": w((embed_dim, embed_dim, 4, 4)),
            "bn_c": bn(embed_dim),
            "convT3": w((embed_dim, inc, 4, 4)),
            "convT3_b": w((inc,), 0.05),
        },
    }


# --------------------------------- main -------------------------------------

if __name__ == "__main__":
    key = jax.random.PRNGKey(0)
    kx, kp = jax.random.split(key)

    inc, embed_dim, num_embed, num_residual = 4, 32, 64, 2
    x = jax.random.normal(kx, (2, inc, 16, 16), F32)      # NCHW, like PyTorch
    params = init_params(kp, inc, embed_dim, num_embed, num_residual)

    fwd = jax.jit(functools.partial(vqvae_forward, beta=0.25))
    q_loss, x_recon, perplexity = fwd(params, x)
    jax.block_until_ready((q_loss, x_recon, perplexity))

    assert x_recon.shape == x.shape
    assert q_loss.shape == () and perplexity.shape == ()
    assert bool(jnp.isfinite(q_loss)) and bool(jnp.isfinite(perplexity))
    print("KERNEL_OK")
</pallas_src>

<mosaic_0001>
module attributes {stable_mosaic.version = 11 : i64} {
  func.func @_fused_mm_kernel(%arg0: memref<128x64xbf16, #tpu.memory_space<vmem>>, %arg1: memref<64x32xbf16, #tpu.memory_space<vmem>>, %arg2: memref<1x32xf32, #tpu.memory_space<vmem>>, %arg3: memref<1x32xf32, #tpu.memory_space<vmem>>, %arg4: memref<128x32xbf16, #tpu.memory_space<vmem>>) attributes {dimension_semantics = [], scalar_prefetch = 0 : i64, scratch_operands = 0 : i64, tpu.core_type = #tpu.core_type<tc>} {
    %c0 = arith.constant 0 : index
    %c0_0 = arith.constant 0 : index
    %0 = vector.load %arg0[%c0, %c0_0] : memref<128x64xbf16, #tpu.memory_space<vmem>>, vector<128x64xbf16>
    %c0_1 = arith.constant 0 : index
    %c0_2 = arith.constant 0 : index
    %1 = vector.load %arg1[%c0_1, %c0_2] : memref<64x32xbf16, #tpu.memory_space<vmem>>, vector<64x32xbf16>
    %cst = arith.constant dense<0.000000e+00> : vector<128x32xf32>
    %2 = tpu.matmul %0, %1, %cst {dimension_numbers = #tpu.dot_dimension_numbers<[1], [0], [0], [1], [0, 0, 1, 1], [], []>} : vector<128x64xbf16>, vector<64x32xbf16>, vector<128x32xf32> -> vector<128x32xf32>
    %cst_3 = arith.constant 1.000000e+00 : f32
    %3 = vector.broadcast %cst_3 : f32 to vector<1x128xf32>
    %cst_4 = arith.constant dense<0.000000e+00> : vector<1x32xf32>
    %4 = tpu.matmul %3, %2, %cst_4 {dimension_numbers = #tpu.dot_dimension_numbers<[1], [0], [0], [1], [0, 0, 1, 1], [], []>} : vector<1x128xf32>, vector<128x32xf32>, vector<1x32xf32> -> vector<1x32xf32>
    %5 = arith.mulf %2, %2 : vector<128x32xf32>
    %cst_5 = arith.constant dense<0.000000e+00> : vector<1x32xf32>
    %6 = tpu.matmul %3, %5, %cst_5 {dimension_numbers = #tpu.dot_dimension_numbers<[1], [0], [0], [1], [0, 0, 1, 1], [], []>} : vector<1x128xf32>, vector<128x32xf32>, vector<1x32xf32> -> vector<1x32xf32>
    %cst_6 = arith.constant 1.280000e+02 : f32
    %7 = vector.broadcast %cst_6 : f32 to vector<1x32xf32>
    %8 = arith.divf %4, %7 : vector<1x32xf32>
    %cst_7 = arith.constant 1.280000e+02 : f32
    %9 = vector.broadcast %cst_7 : f32 to vector<1x32xf32>
    %10 = arith.divf %6, %9 : vector<1x32xf32>
    %11 = arith.mulf %8, %8 : vector<1x32xf32>
    %12 = arith.subf %10, %11 : vector<1x32xf32>
    %c0_8 = arith.constant 0 : index
    %c0_9 = arith.constant 0 : index
    %13 = vector.load %arg2[%c0_8, %c0_9] : memref<1x32xf32, #tpu.memory_space<vmem>>, vector<1x32xf32>
    %cst_10 = arith.constant 9.99999974E-6 : f32
    %14 = vector.broadcast %cst_10 : f32 to vector<1x32xf32>
    %15 = arith.addf %12, %14 : vector<1x32xf32>
    %16 = math.rsqrt %15 : vector<1x32xf32>
    %17 = arith.mulf %13, %16 : vector<1x32xf32>
    %c0_11 = arith.constant 0 : index
    %c0_12 = arith.constant 0 : index
    %18 = vector.load %arg3[%c0_11, %c0_12] : memref<1x32xf32, #tpu.memory_space<vmem>>, vector<1x32xf32>
    %19 = arith.mulf %8, %17 : vector<1x32xf32>
    %20 = arith.subf %18, %19 : vector<1x32xf32>
    %21 = vector.broadcast %17 : vector<1x32xf32> to vector<128x32xf32>
    %22 = arith.mulf %2, %21 : vector<128x32xf32>
    %23 = vector.broadcast %20 : vector<1x32xf32> to vector<128x32xf32>
    %24 = arith.addf %22, %23 : vector<128x32xf32>
    %cst_13 = arith.constant 0.000000e+00 : f32
    %25 = vector.broadcast %cst_13 : f32 to vector<128x32xf32>
    %26 = arith.maximumf %24, %25 : vector<128x32xf32>
    %27 = arith.truncf %26 : vector<128x32xf32> to vector<128x32xbf16>
    %c0_14 = arith.constant 0 : index
    %c0_15 = arith.constant 0 : index
    %28 = vector.load %arg4[%c0_14, %c0_15] : memref<128x32xbf16, #tpu.memory_space<vmem>>, vector<128x32xbf16>
    tpu.vector_store %arg4[%c0_14, %c0_15], %27 {strides = array<i32>} : memref<128x32xbf16, #tpu.memory_space<vmem>>, vector<128x32xbf16>,
    return
  }
}

module attributes {stable_mosaic.version = 11 : i64} {
  func.func @_fused_mm_kernel(%arg0: memref<32x512xbf16, #tpu.memory_space<vmem>>, %arg1: memref<512x32xbf16, #tpu.memory_space<vmem>>, %arg2: memref<1x32xf32, #tpu.memory_space<vmem>>, %arg3: memref<1x32xf32, #tpu.memory_space<vmem>>, %arg4: memref<32x32xbf16, #tpu.memory_space<vmem>>) attributes {dimension_semantics = [], scalar_prefetch = 0 : i64, scratch_operands = 0 : i64, tpu.core_type = #tpu.core_type<tc>} {
    %c0 = arith.constant 0 : index
    %c0_0 = arith.constant 0 : index
    %0 = vector.load %arg0[%c0, %c0_0] : memref<32x512xbf16, #tpu.memory_space<vmem>>, vector<32x512xbf16>
    %c0_1 = arith.constant 0 : index
    %c0_2 = arith.constant 0 : index
    %1 = vector.load %arg1[%c0_1, %c0_2] : memref<512x32xbf16, #tpu.memory_space<vmem>>, vector<512x32xbf16>
    %cst = arith.constant dense<0.000000e+00> : vector<32x32xf32>
    %2 = tpu.matmul %0, %1, %cst {dimension_numbers = #tpu.dot_dimension_numbers<[1], [0], [0], [1], [0, 0, 1, 1], [], []>} : vector<32x512xbf16>, vector<512x32xbf16>, vector<32x32xf32> -> vector<32x32xf32>
    %cst_3 = arith.constant 1.000000e+00 : f32
    %3 = vector.broadcast %cst_3 : f32 to vector<1x32xf32>
    %cst_4 = arith.constant dense<0.000000e+00> : vector<1x32xf32>
    %4 = tpu.matmul %3, %2, %cst_4 {dimension_numbers = #tpu.dot_dimension_numbers<[1], [0], [0], [1], [0, 0, 1, 1], [], []>} : vector<1x32xf32>, vector<32x32xf32>, vector<1x32xf32> -> vector<1x32xf32>
    %5 = arith.mulf %2, %2 : vector<32x32xf32>
    %cst_5 = arith.constant dense<0.000000e+00> : vector<1x32xf32>
    %6 = tpu.matmul %3, %5, %cst_5 {dimension_numbers = #tpu.dot_dimension_numbers<[1], [0], [0], [1], [0, 0, 1, 1], [], []>} : vector<1x32xf32>, vector<32x32xf32>, vector<1x32xf32> -> vector<1x32xf32>
    %cst_6 = arith.constant 3.200000e+01 : f32
    %7 = vector.broadcast %cst_6 : f32 to vector<1x32xf32>
    %8 = arith.divf %4, %7 : vector<1x32xf32>
    %cst_7 = arith.constant 3.200000e+01 : f32
    %9 = vector.broadcast %cst_7 : f32 to vector<1x32xf32>
    %10 = arith.divf %6, %9 : vector<1x32xf32>
    %11 = arith.mulf %8, %8 : vector<1x32xf32>
    %12 = arith.subf %10, %11 : vector<1x32xf32>
    %c0_8 = arith.constant 0 : index
    %c0_9 = arith.constant 0 : index
    %13 = vector.load %arg2[%c0_8, %c0_9] : memref<1x32xf32, #tpu.memory_space<vmem>>, vector<1x32xf32>
    %cst_10 = arith.constant 9.99999974E-6 : f32
    %14 = vector.broadcast %cst_10 : f32 to vector<1x32xf32>
    %15 = arith.addf %12, %14 : vector<1x32xf32>
    %16 = math.rsqrt %15 : vector<1x32xf32>
    %17 = arith.mulf %13, %16 : vector<1x32xf32>
    %c0_11 = arith.constant 0 : index
    %c0_12 = arith.constant 0 : index
    %18 = vector.load %arg3[%c0_11, %c0_12] : memref<1x32xf32, #tpu.memory_space<vmem>>, vector<1x32xf32>
    %19 = arith.mulf %8, %17 : vector<1x32xf32>
    %20 = arith.subf %18, %19 : vector<1x32xf32>
    %21 = vector.broadcast %17 : vector<1x32xf32> to vector<32x32xf32>
    %22 = arith.mulf %2, %21 : vector<32x32xf32>
    %23 = vector.broadcast %20 : vector<1x32xf32> to vector<32x32xf32>
    %24 = arith.addf %22, %23 : vector<32x32xf32>
    %cst_13 = arith.constant 0.000000e+00 : f32
    %25 = vector.broadcast %cst_13 : f32 to vector<32x32xf32>
    %26 = arith.maximumf %24, %25 : vector<32x32xf32>
    %27 = arith.truncf %26 : vector<32x32xf32> to vector<32x32xbf16>
    %c0_14 = arith.constant 0 : index
    %c0_15 = arith.constant 0 : index
    %28 = vector.load %arg4[%c0_14, %c0_15] : memref<32x32xbf16, #tpu.memory_space<vmem>>, vector<32x32xbf16>
    tpu.vector_store %arg4[%c0_14, %c0_15], %27 {strides = array<i32>} : memref<32x32xbf16, #tpu.memory_space<vmem>>, vector<32x32xbf16>,
    return
  }
}

module attributes {stable_mosaic.version = 11 : i64} {
  func.func @_fused_mm_kernel(%arg0: memref<8x512xbf16, #tpu.memory_space<vmem>>, %arg1: memref<512x32xbf16, #tpu.memory_space<vmem>>, %arg2: memref<1x32xf32, #tpu.memory_space<vmem>>, %arg3: memref<1x32xf32, #tpu.memory_space<vmem>>, %arg4: memref<8x32xf32, #tpu.memory_space<vmem>>, %arg5: memref<8x32xbf16, #tpu.memory_space<vmem>>) attributes {dimension_semantics = [], scalar_prefetch = 0 : i64, scratch_operands = 0 : i64, tpu.core_type = #tpu.core_type<tc>} {
    %c0 = arith.constant 0 : index
    %c0_0 = arith.constant 0 : index
    %0 = vector.load %arg0[%c0, %c0_0] : memref<8x512xbf16, #tpu.memory_space<vmem>>, vector<8x512xbf16>
    %c0_1 = arith.constant 0 : index
    %c0_2 = arith.constant 0 : index
    %1 = vector.load %arg1[%c0_1, %c0_2] : memref<512x32xbf16, #tpu.memory_space<vmem>>, vector<512x32xbf16>
    %cst = arith.constant dense<0.000000e+00> : vector<8x32xf32>
    %2 = tpu.matmul %0, %1, %cst {dimension_numbers = #tpu.dot_dimension_numbers<[1], [0], [0], [1], [0, 0, 1, 1], [], []>} : vector<8x512xbf16>, vector<512x32xbf16>, vector<8x32xf32> -> vector<8x32xf32>
    %c0_3 = arith.constant 0 : index
    %c0_4 = arith.constant 0 : index
    %3 = vector.load %arg4[%c0_3, %c0_4] : memref<8x32xf32, #tpu.memory_space<vmem>>, vector<8x32xf32>
    tpu.vector_store %arg4[%c0_3, %c0_4], %2 {strides = array<i32>} : memref<8x32xf32, #tpu.memory_space<vmem>>, vector<8x32xf32>,
    %cst_5 = arith.constant 1.000000e+00 : f32
    %4 = vector.broadcast %cst_5 : f32 to vector<1x8xf32>
    %cst_6 = arith.constant dense<0.000000e+00> : vector<1x32xf32>
    %5 = tpu.matmul %4, %2, %cst_6 {dimension_numbers = #tpu.dot_dimension_numbers<[1], [0], [0], [1], [0, 0, 1, 1], [], []>} : vector<1x8xf32>, vector<8x32xf32>, vector<1x32xf32> -> vector<1x32xf32>
    %6 = arith.mulf %2, %2 : vector<8x32xf32>
    %cst_7 = arith.constant dense<0.000000e+00> : vector<1x32xf32>
    %7 = tpu.matmul %4, %6, %cst_7 {dimension_numbers = #tpu.dot_dimension_numbers<[1], [0], [0], [1], [0, 0, 1, 1], [], []>} : vector<1x8xf32>, vector<8x32xf32>, vector<1x32xf32> -> vector<1x32xf32>
    %cst_8 = arith.constant 8.000000e+00 : f32
    %8 = vector.broadcast %cst_8 : f32 to vector<1x32xf32>
    %9 = arith.divf %5, %8 : vector<1x32xf32>
    %cst_9 = arith.constant 8.000000e+00 : f32
    %10 = vector.broadcast %cst_9 : f32 to vector<1x32xf32>
    %11 = arith.divf %7, %10 : vector<1x32xf32>
    %12 = arith.mulf %9, %9 : vector<1x32xf32>
    %13 = arith.subf %11, %12 : vector<1x32xf32>
    %c0_10 = arith.constant 0 : index
    %c0_11 = arith.constant 0 : index
    %14 = vector.load %arg2[%c0_10, %c0_11] : memref<1x32xf32, #tpu.memory_space<vmem>>, vector<1x32xf32>
    %cst_12 = arith.constant 9.99999974E-6 : f32
    %15 = vector.broadcast %cst_12 : f32 to vector<1x32xf32>
    %16 = arith.addf %13, %15 : vector<1x32xf32>
    %17 = math.rsqrt %16 : vector<1x32xf32>
    %18 = arith.mulf %14, %17 : vector<1x32xf32>
    %c0_13 = arith.constant 0 : index
    %c0_14 = arith.constant 0 : index
    %19 = vector.load %arg3[%c0_13, %c0_14] : memref<1x32xf32, #tpu.memory_space<vmem>>, vector<1x32xf32>
    %20 = arith.mulf %9, %18 : vector<1x32xf32>
    %21 = arith.subf %19, %20 : vector<1x32xf32>
    %22 = vector.broadcast %18 : vector<1x32xf32> to vector<8x32xf32>
    %23 = arith.mulf %2, %22 : vector<8x32xf32>
    %24 = vector.broadcast %21 : vector<1x32xf32> to vector<8x32xf32>
    %25 = arith.addf %23, %24 : vector<8x32xf32>
    %cst_15 = arith.constant 0.000000e+00 : f32
    %26 = vector.broadcast %cst_15 : f32 to vector<8x32xf32>
    %27 = arith.maximumf %25, %26 : vector<8x32xf32>
    %28 = arith.truncf %27 : vector<8x32xf32> to vector<8x32xbf16>
    %c0_16 = arith.constant 0 : index
    %c0_17 = arith.constant 0 : index
    %29 = vector.load %arg5[%c0_16, %c0_17] : memref<8x32xbf16, #tpu.memory_space<vmem>>, vector<8x32xbf16>
    tpu.vector_store %arg5[%c0_16, %c0_17], %28 {strides = array<i32>} : memref<8x32xbf16, #tpu.memory_space<vmem>>, vector<8x32xbf16>,
    return
  }
}

module attributes {stable_mosaic.version = 11 : i64} {
  func.func @_fused_mm_kernel(%arg0: memref<8x288xbf16, #tpu.memory_space<vmem>>, %arg1: memref<288x32xbf16, #tpu.memory_space<vmem>>, %arg2: memref<1x32xf32, #tpu.memory_space<vmem>>, %arg3: memref<1x32xf32, #tpu.memory_space<vmem>>, %arg4: memref<8x32xbf16, #tpu.memory_space<vmem>>) attributes {dimension_semantics = [], scalar_prefetch = 0 : i64, scratch_operands = 0 : i64, tpu.core_type = #tpu.core_type<tc>} {
    %c0 = arith.constant 0 : index
    %c0_0 = arith.constant 0 : index
    %0 = vector.load %arg0[%c0, %c0_0] : memref<8x288xbf16, #tpu.memory_space<vmem>>, vector<8x288xbf16>
    %c0_1 = arith.constant 0 : index
    %c0_2 = arith.constant 0 : index
    %1 = vector.load %arg1[%c0_1, %c0_2] : memref<288x32xbf16, #tpu.memory_space<vmem>>, vector<288x32xbf16>
    %cst = arith.constant dense<0.000000e+00> : vector<8x32xf32>
    %2 = tpu.matmul %0, %1, %cst {dimension_numbers = #tpu.dot_dimension_numbers<[1], [0], [0], [1], [0, 0, 1, 1], [], []>} : vector<8x288xbf16>, vector<288x32xbf16>, vector<8x32xf32> -> vector<8x32xf32>
    %cst_3 = arith.constant 1.000000e+00 : f32
    %3 = vector.broadcast %cst_3 : f32 to vector<1x8xf32>
    %cst_4 = arith.constant dense<0.000000e+00> : vector<1x32xf32>
    %4 = tpu.matmul %3, %2, %cst_4 {dimension_numbers = #tpu.dot_dimension_numbers<[1], [0], [0], [1], [0, 0, 1, 1], [], []>} : vector<1x8xf32>, vector<8x32xf32>, vector<1x32xf32> -> vector<1x32xf32>
    %5 = arith.mulf %2, %2 : vector<8x32xf32>
    %cst_5 = arith.constant dense<0.000000e+00> : vector<1x32xf32>
    %6 = tpu.matmul %3, %5, %cst_5 {dimension_numbers = #tpu.dot_dimension_numbers<[1], [0], [0], [1], [0, 0, 1, 1], [], []>} : vector<1x8xf32>, vector<8x32xf32>, vector<1x32xf32> -> vector<1x32xf32>
    %cst_6 = arith.constant 8.000000e+00 : f32
    %7 = vector.broadcast %cst_6 : f32 to vector<1x32xf32>
    %8 = arith.divf %4, %7 : vector<1x32xf32>
    %cst_7 = arith.constant 8.000000e+00 : f32
    %9 = vector.broadcast %cst_7 : f32 to vector<1x32xf32>
    %10 = arith.divf %6, %9 : vector<1x32xf32>
    %11 = arith.mulf %8, %8 : vector<1x32xf32>
    %12 = arith.subf %10, %11 : vector<1x32xf32>
    %c0_8 = arith.constant 0 : index
    %c0_9 = arith.constant 0 : index
    %13 = vector.load %arg2[%c0_8, %c0_9] : memref<1x32xf32, #tpu.memory_space<vmem>>, vector<1x32xf32>
    %cst_10 = arith.constant 9.99999974E-6 : f32
    %14 = vector.broadcast %cst_10 : f32 to vector<1x32xf32>
    %15 = arith.addf %12, %14 : vector<1x32xf32>
    %16 = math.rsqrt %15 : vector<1x32xf32>
    %17 = arith.mulf %13, %16 : vector<1x32xf32>
    %c0_11 = arith.constant 0 : index
    %c0_12 = arith.constant 0 : index
    %18 = vector.load %arg3[%c0_11, %c0_12] : memref<1x32xf32, #tpu.memory_space<vmem>>, vector<1x32xf32>
    %19 = arith.mulf %8, %17 : vector<1x32xf32>
    %20 = arith.subf %18, %19 : vector<1x32xf32>
    %21 = vector.broadcast %17 : vector<1x32xf32> to vector<8x32xf32>
    %22 = arith.mulf %2, %21 : vector<8x32xf32>
    %23 = vector.broadcast %20 : vector<1x32xf32> to vector<8x32xf32>
    %24 = arith.addf %22, %23 : vector<8x32xf32>
    %cst_13 = arith.constant 0.000000e+00 : f32
    %25 = vector.broadcast %cst_13 : f32 to vector<8x32xf32>
    %26 = arith.maximumf %24, %25 : vector<8x32xf32>
    %27 = arith.truncf %26 : vector<8x32xf32> to vector<8x32xbf16>
    %c0_14 = arith.constant 0 : index
    %c0_15 = arith.constant 0 : index
    %28 = vector.load %arg4[%c0_14, %c0_15] : memref<8x32xbf16, #tpu.memory_space<vmem>>, vector<8x32xbf16>
    tpu.vector_store %arg4[%c0_14, %c0_15], %27 {strides = array<i32>} : memref<8x32xbf16, #tpu.memory_space<vmem>>, vector<8x32xbf16>,
    return
  }
}

module attributes {stable_mosaic.version = 11 : i64} {
  func.func @_fused_mm_kernel(%arg0: memref<8x32xbf16, #tpu.memory_space<vmem>>, %arg1: memref<32x32xbf16, #tpu.memory_space<vmem>>, %arg2: memref<8x32xf32, #tpu.memory_space<vmem>>, %arg3: memref<1x32xf32, #tpu.memory_space<vmem>>, %arg4: memref<1x32xf32, #tpu.memory_space<vmem>>, %arg5: memref<8x32xf32, #tpu.memory_space<vmem>>, %arg6: memref<8x32xbf16, #tpu.memory_space<vmem>>) attributes {dimension_semantics = [], scalar_prefetch = 0 : i64, scratch_operands = 0 : i64, tpu.core_type = #tpu.core_type<tc>} {
    %c0 = arith.constant 0 : index
    %c0_0 = arith.constant 0 : index
    %0 = vector.load %arg0[%c0, %c0_0] : memref<8x32xbf16, #tpu.memory_space<vmem>>, vector<8x32xbf16>
    %c0_1 = arith.constant 0 : index
    %c0_2 = arith.constant 0 : index
    %1 = vector.load %arg1[%c0_1, %c0_2] : memref<32x32xbf16, #tpu.memory_space<vmem>>, vector<32x32xbf16>
    %cst = arith.constant dense<0.000000e+00> : vector<8x32xf32>
    %2 = tpu.matmul %0, %1, %cst {dimension_numbers = #tpu.dot_dimension_numbers<[1], [0], [0], [1], [0, 0, 1, 1], [], []>} : vector<8x32xbf16>, vector<32x32xbf16>, vector<8x32xf32> -> vector<8x32xf32>
    %c0_3 = arith.constant 0 : index
    %c0_4 = arith.constant 0 : index
    %3 = vector.load %arg2[%c0_3, %c0_4] : memref<8x32xf32, #tpu.memory_space<vmem>>, vector<8x32xf32>
    %4 = arith.addf %2, %3 : vector<8x32xf32>
    %c0_5 = arith.constant 0 : index
    %c0_6 = arith.constant 0 : index
    %5 = vector.load %arg5[%c0_5, %c0_6] : memref<8x32xf32, #tpu.memory_space<vmem>>, vector<8x32xf32>
    tpu.vector_store %arg5[%c0_5, %c0_6], %4 {strides = array<i32>} : memref<8x32xf32, #tpu.memory_space<vmem>>, vector<8x32xf32>,
    %cst_7 = arith.constant 1.000000e+00 : f32
    %6 = vector.broadcast %cst_7 : f32 to vector<1x8xf32>
    %cst_8 = arith.constant dense<0.000000e+00> : vector<1x32xf32>
    %7 = tpu.matmul %6, %4, %cst_8 {dimension_numbers = #tpu.dot_dimension_numbers<[1], [0], [0], [1], [0, 0, 1, 1], [], []>} : vector<1x8xf32>, vector<8x32xf32>, vector<1x32xf32> -> vector<1x32xf32>
    %8 = arith.mulf %4, %4 : vector<8x32xf32>
    %cst_9 = arith.constant dense<0.000000e+00> : vector<1x32xf32>
    %9 = tpu.matmul %6, %8, %cst_9 {dimension_numbers = #tpu.dot_dimension_numbers<[1], [0], [0], [1], [0, 0, 1, 1], [], []>} : vector<1x8xf32>, vector<8x32xf32>, vector<1x32xf32> -> vector<1x32xf32>
    %cst_10 = arith.constant 8.000000e+00 : f32
    %10 = vector.broadcast %cst_10 : f32 to vector<1x32xf32>
    %11 = arith.divf %7, %10 : vector<1x32xf32>
    %cst_11 = arith.constant 8.000000e+00 : f32
    %12 = vector.broadcast %cst_11 : f32 to vector<1x32xf32>
    %13 = arith.divf %9, %12 : vector<1x32xf32>
    %14 = arith.mulf %11, %11 : vector<1x32xf32>
    %15 = arith.subf %13, %14 : vector<1x32xf32>
    %c0_12 = arith.constant 0 : index
    %c0_13 = arith.constant 0 : index
    %16 = vector.load %arg3[%c0_12, %c0_13] : memref<1x32xf32, #tpu.memory_space<vmem>>, vector<1x32xf32>
    %cst_14 = arith.constant 9.99999974E-6 : f32
    %17 = vector.broadcast %cst_14 : f32 to vector<1x32xf32>
    %18 = arith.addf %15, %17 : vector<1x32xf32>
    %19 = math.rsqrt %18 : vector<1x32xf32>
    %20 = arith.mulf %16, %19 : vector<1x32xf32>
    %c0_15 = arith.constant 0 : index
    %c0_16 = arith.constant 0 : index
    %21 = vector.load %arg4[%c0_15, %c0_16] : memref<1x32xf32, #tpu.memory_space<vmem>>, vector<1x32xf32>
    %22 = arith.mulf %11, %20 : vector<1x32xf32>
    %23 = arith.subf %21, %22 : vector<1x32xf32>
    %24 = vector.broadcast %20 : vector<1x32xf32> to vector<8x32xf32>
    %25 = arith.mulf %4, %24 : vector<8x32xf32>
    %26 = vector.broadcast %23 : vector<1x32xf32> to vector<8x32xf32>
    %27 = arith.addf %25, %26 : vector<8x32xf32>
    %cst_17 = arith.constant 0.000000e+00 : f32
    %28 = vector.broadcast %cst_17 : f32 to vector<8x32xf32>
    %29 = arith.maximumf %27, %28 : vector<8x32xf32>
    %30 = arith.truncf %29 : vector<8x32xf32> to vector<8x32xbf16>
    %c0_18 = arith.constant 0 : index
    %c0_19 = arith.constant 0 : index
    %31 = vector.load %arg6[%c0_18, %c0_19] : memref<8x32xbf16, #tpu.memory_space<vmem>>, vector<8x32xbf16>
    tpu.vector_store %arg6[%c0_18, %c0_19], %30 {strides = array<i32>} : memref<8x32xbf16, #tpu.memory_space<vmem>>, vector<8x32xbf16>,
    return
  }
}

module attributes {stable_mosaic.version = 11 : i64} {
  func.func @_fused_mm_kernel(%arg0: memref<8x32xbf16, #tpu.memory_space<vmem>>, %arg1: memref<32x32xbf16, #tpu.memory_space<vmem>>, %arg2: memref<8x32xf32, #tpu.memory_space<vmem>>, %arg3: memref<8x32xf32, #tpu.memory_space<vmem>>) attributes {dimension_semantics = [], scalar_prefetch = 0 : i64, scratch_operands = 0 : i64, tpu.core_type = #tpu.core_type<tc>} {
    %c0 = arith.constant 0 : index
    %c0_0 = arith.constant 0 : index
    %0 = vector.load %arg0[%c0, %c0_0] : memref<8x32xbf16, #tpu.memory_space<vmem>>, vector<8x32xbf16>
    %c0_1 = arith.constant 0 : index
    %c0_2 = arith.constant 0 : index
    %1 = vector.load %arg1[%c0_1, %c0_2] : memref<32x32xbf16, #tpu.memory_space<vmem>>, vector<32x32xbf16>
    %cst = arith.constant dense<0.000000e+00> : vector<8x32xf32>
    %2 = tpu.matmul %0, %1, %cst {dimension_numbers = #tpu.dot_dimension_numbers<[1], [0], [0], [1], [0, 0, 1, 1], [], []>} : vector<8x32xbf16>, vector<32x32xbf16>, vector<8x32xf32> -> vector<8x32xf32>
    %c0_3 = arith.constant 0 : index
    %c0_4 = arith.constant 0 : index
    %3 = vector.load %arg2[%c0_3, %c0_4] : memref<8x32xf32, #tpu.memory_space<vmem>>, vector<8x32xf32>
    %4 = arith.addf %2, %3 : vector<8x32xf32>
    %c0_5 = arith.constant 0 : index
    %c0_6 = arith.constant 0 : index
    %5 = vector.load %arg3[%c0_5, %c0_6] : memref<8x32xf32, #tpu.memory_space<vmem>>, vector<8x32xf32>
    tpu.vector_store %arg3[%c0_5, %c0_6], %4 {strides = array<i32>} : memref<8x32xf32, #tpu.memory_space<vmem>>, vector<8x32xf32>,
    return
  }
}

module attributes {stable_mosaic.version = 11 : i64} {
  func.func @_fused_mm_kernel(%arg0: memref<8x32xbf16, #tpu.memory_space<vmem>>, %arg1: memref<32x32xbf16, #tpu.memory_space<vmem>>, %arg2: memref<8x32xf32, #tpu.memory_space<vmem>>, %arg3: memref<1x32xf32, #tpu.memory_space<vmem>>, %arg4: memref<1x32xf32, #tpu.memory_space<vmem>>, %arg5: memref<8x32xbf16, #tpu.memory_space<vmem>>) attributes {dimension_semantics = [], scalar_prefetch = 0 : i64, scratch_operands = 0 : i64, tpu.core_type = #tpu.core_type<tc>} {
    %c0 = arith.constant 0 : index
    %c0_0 = arith.constant 0 : index
    %0 = vector.load %arg0[%c0, %c0_0] : memref<8x32xbf16, #tpu.memory_space<vmem>>, vector<8x32xbf16>
    %c0_1 = arith.constant 0 : index
    %c0_2 = arith.constant 0 : index
    %1 = vector.load %arg1[%c0_1, %c0_2] : memref<32x32xbf16, #tpu.memory_space<vmem>>, vector<32x32xbf16>
    %cst = arith.constant dense<0.000000e+00> : vector<8x32xf32>
    %2 = tpu.matmul %0, %1, %cst {dimension_numbers = #tpu.dot_dimension_numbers<[1], [0], [0], [1], [0, 0, 1, 1], [], []>} : vector<8x32xbf16>, vector<32x32xbf16>, vector<8x32xf32> -> vector<8x32xf32>
    %c0_3 = arith.constant 0 : index
    %c0_4 = arith.constant 0 : index
    %3 = vector.load %arg2[%c0_3, %c0_4] : memref<8x32xf32, #tpu.memory_space<vmem>>, vector<8x32xf32>
    %4 = arith.addf %2, %3 : vector<8x32xf32>
    %cst_5 = arith.constant 1.000000e+00 : f32
    %5 = vector.broadcast %cst_5 : f32 to vector<1x8xf32>
    %cst_6 = arith.constant dense<0.000000e+00> : vector<1x32xf32>
    %6 = tpu.matmul %5, %4, %cst_6 {dimension_numbers = #tpu.dot_dimension_numbers<[1], [0], [0], [1], [0, 0, 1, 1], [], []>} : vector<1x8xf32>, vector<8x32xf32>, vector<1x32xf32> -> vector<1x32xf32>
    %7 = arith.mulf %4, %4 : vector<8x32xf32>
    %cst_7 = arith.constant dense<0.000000e+00> : vector<1x32xf32>
    %8 = tpu.matmul %5, %7, %cst_7 {dimension_numbers = #tpu.dot_dimension_numbers<[1], [0], [0], [1], [0, 0, 1, 1], [], []>} : vector<1x8xf32>, vector<8x32xf32>, vector<1x32xf32> -> vector<1x32xf32>
    %cst_8 = arith.constant 8.000000e+00 : f32
    %9 = vector.broadcast %cst_8 : f32 to vector<1x32xf32>
    %10 = arith.divf %6, %9 : vector<1x32xf32>
    %cst_9 = arith.constant 8.000000e+00 : f32
    %11 = vector.broadcast %cst_9 : f32 to vector<1x32xf32>
    %12 = arith.divf %8, %11 : vector<1x32xf32>
    %13 = arith.mulf %10, %10 : vector<1x32xf32>
    %14 = arith.subf %12, %13 : vector<1x32xf32>
    %c0_10 = arith.constant 0 : index
    %c0_11 = arith.constant 0 : index
    %15 = vector.load %arg3[%c0_10, %c0_11] : memref<1x32xf32, #tpu.memory_space<vmem>>, vector<1x32xf32>
    %cst_12 = arith.constant 9.99999974E-6 : f32
    %16 = vector.broadcast %cst_12 : f32 to vector<1x32xf32>
    %17 = arith.addf %14, %16 : vector<1x32xf32>
    %18 = math.rsqrt %17 : vector<1x32xf32>
    %19 = arith.mulf %15, %18 : vector<1x32xf32>
    %c0_13 = arith.constant 0 : index
    %c0_14 = arith.constant 0 : index
    %20 = vector.load %arg4[%c0_13, %c0_14] : memref<1x32xf32, #tpu.memory_space<vmem>>, vector<1x32xf32>
    %21 = arith.mulf %10, %19 : vector<1x32xf32>
    %22 = arith.subf %20, %21 : vector<1x32xf32>
    %23 = vector.broadcast %19 : vector<1x32xf32> to vector<8x32xf32>
    %24 = arith.mulf %4, %23 : vector<8x32xf32>
    %25 = vector.broadcast %22 : vector<1x32xf32> to vector<8x32xf32>
    %26 = arith.addf %24, %25 : vector<8x32xf32>
    %cst_15 = arith.constant 0.000000e+00 : f32
    %27 = vector.broadcast %cst_15 : f32 to vector<8x32xf32>
    %28 = arith.maximumf %26, %27 : vector<8x32xf32>
    %29 = arith.truncf %28 : vector<8x32xf32> to vector<8x32xbf16>
    %c0_16 = arith.constant 0 : index
    %c0_17 = arith.constant 0 : index
    %30 = vector.load %arg5[%c0_16, %c0_17] : memref<8x32xbf16, #tpu.memory_space<vmem>>, vector<8x32xbf16>
    tpu.vector_store %arg5[%c0_16, %c0_17], %29 {strides = array<i32>} : memref<8x32xbf16, #tpu.memory_space<vmem>>, vector<8x32xbf16>,
    return
  }
}

module attributes {stable_mosaic.version = 11 : i64} {
  func.func @_vq_kernel(%arg0: memref<8x32xf32, #tpu.memory_space<vmem>>, %arg1: memref<64x32xf32, #tpu.memory_space<vmem>>, %arg2: memref<1x64xf32, #tpu.memory_space<vmem>>, %arg3: memref<1x32xf32, #tpu.memory_space<vmem>>, %arg4: memref<1x32xf32, #tpu.memory_space<vmem>>, %arg5: memref<8x32xf32, #tpu.memory_space<vmem>>, %arg6: memref<8x32xbf16, #tpu.memory_space<vmem>>, %arg7: memref<1x1xf32, #tpu.memory_space<vmem>>, %arg8: memref<1x1xf32, #tpu.memory_space<vmem>>) attributes {dimension_semantics = [], scalar_prefetch = 0 : i64, scratch_operands = 0 : i64, tpu.core_type = #tpu.core_type<tc>} {
    %c0 = arith.constant 0 : index
    %c0_0 = arith.constant 0 : index
    %0 = vector.load %arg0[%c0, %c0_0] : memref<8x32xf32, #tpu.memory_space<vmem>>, vector<8x32xf32>
    %c0_1 = arith.constant 0 : index
    %c0_2 = arith.constant 0 : index
    %1 = vector.load %arg1[%c0_1, %c0_2] : memref<64x32xf32, #tpu.memory_space<vmem>>, vector<64x32xf32>
    %2 = arith.mulf %0, %0 : vector<8x32xf32>
    %cst = arith.constant dense<0.000000e+00> : vector<8xf32>
    %3 = vector.multi_reduction <add>, %2, %cst [1] : vector<8x32xf32> to vector<8xf32>
    %4 = vector.shape_cast %3 : vector<8xf32> to vector<8x1xf32>
    %cst_3 = arith.constant dense<0.000000e+00> : vector<8x64xf32>
    %5 = tpu.matmul %0, %1, %cst_3 {dimension_numbers = #tpu.dot_dimension_numbers<[1], [1], [0], [0], [0, 0, 1, 0], [], []>} : vector<8x32xf32>, vector<64x32xf32>, vector<8x64xf32> -> vector<8x64xf32>
    %c0_4 = arith.constant 0 : index
    %c0_5 = arith.constant 0 : index
    %6 = vector.load %arg2[%c0_4, %c0_5] : memref<1x64xf32, #tpu.memory_space<vmem>>, vector<1x64xf32>
    %7 = vector.broadcast %4 : vector<8x1xf32> to vector<8x64xf32>
    %8 = vector.broadcast %6 : vector<1x64xf32> to vector<8x64xf32>
    %9 = arith.addf %7, %8 : vector<8x64xf32>
    %cst_6 = arith.constant 2.000000e+00 : f32
    %10 = vector.broadcast %cst_6 : f32 to vector<8x64xf32>
    %11 = arith.mulf %10, %5 : vector<8x64xf32>
    %12 = arith.subf %9, %11 : vector<8x64xf32>
    %cst_7 = arith.constant dense<0x7F800000> : vector<8xf32>
    %13 = vector.multi_reduction <minimumf>, %12, %cst_7 [1] : vector<8x64xf32> to vector<8xf32>
    %14 = vector.shape_cast %13 : vector<8xf32> to vector<8x1xf32>
    %15 = tpu.iota {dimensions = array<i32: 1>} : vector<8x64xi32>
    %16 = vector.broadcast %14 : vector<8x1xf32> to vector<8x64xf32>
    %17 = arith.cmpf oeq, %12, %16 : vector<8x64xf32>
    %c64_i32 = arith.constant 64 : i32
    %18 = vector.broadcast %c64_i32 : i32 to vector<8x64xi32>
    %19 = arith.select %17, %15, %18 : vector<8x64xi1>, vector<8x64xi32>
    %cst_8 = arith.constant dense<2147483647> : vector<8xi32>
    %20 = vector.multi_reduction <minsi>, %19, %cst_8 [1] : vector<8x64xi32> to vector<8xi32>
    %21 = vector.shape_cast %20 : vector<8xi32> to vector<8x1xi32>
    %22 = vector.broadcast %21 : vector<8x1xi32> to vector<8x64xi32>
    %23 = arith.cmpi eq, %15, %22 : vector<8x64xi32>
    %24 = arith.extui %23 : vector<8x64xi1> to vector<8x64xi32>
    %25 = arith.sitofp %24 : vector<8x64xi32> to vector<8x64xf32>
    %cst_9 = arith.constant dense<0.000000e+00> : vector<8x32xf32>
    %26 = tpu.matmul %25, %1, %cst_9 {dimension_numbers = #tpu.dot_dimension_numbers<[1], [0], [0], [1], [0, 0, 1, 1], [], []>} : vector<8x64xf32>, vector<64x32xf32>, vector<8x32xf32> -> vector<8x32xf32>
    %c0_10 = arith.constant 0 : index
    %c0_11 = arith.constant 0 : index
    %27 = vector.load %arg5[%c0_10, %c0_11] : memref<8x32xf32, #tpu.memory_space<vmem>>, vector<8x32xf32>
    tpu.vector_store %arg5[%c0_10, %c0_11], %26 {strides = array<i32>} : memref<8x32xf32, #tpu.memory_space<vmem>>, vector<8x32xf32>,
    %cst_12 = arith.constant 1.000000e+00 : f32
    %28 = vector.broadcast %cst_12 : f32 to vector<1x8xf32>
    %cst_13 = arith.constant dense<0.000000e+00> : vector<1x32xf32>
    %29 = tpu.matmul %28, %26, %cst_13 {dimension_numbers = #tpu.dot_dimension_numbers<[1], [0], [0], [1], [0, 0, 1, 1], [], []>} : vector<1x8xf32>, vector<8x32xf32>, vector<1x32xf32> -> vector<1x32xf32>
    %30 = arith.mulf %26, %26 : vector<8x32xf32>
    %cst_14 = arith.constant dense<0.000000e+00> : vector<1x32xf32>
    %31 = tpu.matmul %28, %30, %cst_14 {dimension_numbers = #tpu.dot_dimension_numbers<[1], [0], [0], [1], [0, 0, 1, 1], [], []>} : vector<1x8xf32>, vector<8x32xf32>, vector<1x32xf32> -> vector<1x32xf32>
    %cst_15 = arith.constant 8.000000e+00 : f32
    %32 = vector.broadcast %cst_15 : f32 to vector<1x32xf32>
    %33 = arith.divf %29, %32 : vector<1x32xf32>
    %cst_16 = arith.constant 8.000000e+00 : f32
    %34 = vector.broadcast %cst_16 : f32 to vector<1x32xf32>
    %35 = arith.divf %31, %34 : vector<1x32xf32>
    %36 = arith.mulf %33, %33 : vector<1x32xf32>
    %37 = arith.subf %35, %36 : vector<1x32xf32>
    %c0_17 = arith.constant 0 : index
    %c0_18 = arith.constant 0 : index
    %38 = vector.load %arg3[%c0_17, %c0_18] : memref<1x32xf32, #tpu.memory_space<vmem>>, vector<1x32xf32>
    %cst_19 = arith.constant 9.99999974E-6 : f32
    %39 = vector.broadcast %cst_19 : f32 to vector<1x32xf32>
    %40 = arith.addf %37, %39 : vector<1x32xf32>
    %41 = math.rsqrt %40 : vector<1x32xf32>
    %42 = arith.mulf %38, %41 : vector<1x32xf32>
    %c0_20 = arith.constant 0 : index
    %c0_21 = arith.constant 0 : index
    %43 = vector.load %arg4[%c0_20, %c0_21] : memref<1x32xf32, #tpu.memory_space<vmem>>, vector<1x32xf32>
    %44 = arith.mulf %33, %42 : vector<1x32xf32>
    %45 = arith.subf %43, %44 : vector<1x32xf32>
    %46 = vector.broadcast %42 : vector<1x32xf32> to vector<8x32xf32>
    %47 = arith.mulf %26, %46 : vector<8x32xf32>
    %48 = vector.broadcast %45 : vector<1x32xf32> to vector<8x32xf32>
    %49 = arith.addf %47, %48 : vector<8x32xf32>
    %cst_22 = arith.constant 0.000000e+00 : f32
    %50 = vector.broadcast %cst_22 : f32 to vector<8x32xf32>
    %51 = arith.maximumf %49, %50 : vector<8x32xf32>
    %52 = arith.truncf %51 : vector<8x32xf32> to vector<8x32xbf16>
    %c0_23 = arith.constant 0 : index
    %c0_24 = arith.constant 0 : index
    %53 = vector.load %arg6[%c0_23, %c0_24] : memref<8x32xbf16, #tpu.memory_space<vmem>>, vector<8x32xbf16>
    tpu.vector_store %arg6[%c0_23, %c0_24], %52 {strides = array<i32>} : memref<8x32xbf16, #tpu.memory_space<vmem>>, vector<8x32xbf16>,
    %54 = arith.subf %26, %0 : vector<8x32xf32>
    %55 = arith.mulf %54, %54 : vector<8x32xf32>
    %cst_25 = arith.constant dense<0.000000e+00> : vector<8xf32>
    %56 = vector.multi_reduction <add>, %55, %cst_25 [1] : vector<8x32xf32> to vector<8xf32>
    %57 = vector.shape_cast %56 : vector<8xf32> to vector<8x1xf32>
    %cst_26 = arith.constant dense<0.000000e+00> : vector<1xf32>
    %58 = vector.multi_reduction <add>, %57, %cst_26 [0] : vector<8x1xf32> to vector<1xf32>
    %59 = vector.shape_cast %58 : vector<1xf32> to vector<1x1xf32>
    %cst_27 = arith.constant 2.500000e-01 : f32
    %60 = vector.broadcast %cst_27 : f32 to vector<1x1xf32>
    %61 = arith.mulf %60, %59 : vector<1x1xf32>
    %cst_28 = arith.constant 2.560000e+02 : f32
    %62 = vector.broadcast %cst_28 : f32 to vector<1x1xf32>
    %63 = arith.divf %61, %62 : vector<1x1xf32>
    %c0_29 = arith.constant 0 : index
    %c0_30 = arith.constant 0 : index
    %64 = vector.load %arg7[%c0_29, %c0_30] : memref<1x1xf32, #tpu.memory_space<vmem>>, vector<1x1xf32>
    tpu.vector_store %arg7[%c0_29, %c0_30], %63 {strides = array<i32>} : memref<1x1xf32, #tpu.memory_space<vmem>>, vector<1x1xf32>,
    %cst_31 = arith.constant dense<0.000000e+00> : vector<1x64xf32>
    %65 = tpu.matmul %28, %25, %cst_31 {dimension_numbers = #tpu.dot_dimension_numbers<[1], [0], [0], [1], [0, 0, 1, 1], [], []>} : vector<1x8xf32>, vector<8x64xf32>, vector<1x64xf32> -> vector<1x64xf32>
    %cst_32 = arith.constant 8.000000e+00 : f32
    %66 = vector.broadcast %cst_32 : f32 to vector<1x64xf32>
    %67 = arith.divf %65, %66 : vector<1x64xf32>
    %cst_33 = arith.constant 1.000000e-10 : f32
    %68 = vector.broadcast %cst_33 : f32 to vector<1x64xf32>
    %69 = arith.addf %67, %68 : vector<1x64xf32>
    %70 = math.log %69 : vector<1x64xf32>
    %71 = arith.mulf %67, %70 : vector<1x64xf32>
    %cst_34 = arith.constant dense<0.000000e+00> : vector<1xf32>
    %72 = vector.multi_reduction <add>, %71, %cst_34 [1] : vector<1x64xf32> to vector<1xf32>
    %73 = vector.shape_cast %72 : vector<1xf32> to vector<1x1xf32>
    %cst_35 = arith.constant 0.000000e+00 : f32
    %74 = vector.broadcast %cst_35 : f32 to vector<1x1xf32>
    %75 = arith.subf %74, %73 : vector<1x1xf32>
    %76 = math.exp %75 : vector<1x1xf32>
    %c0_36 = arith.constant 0 : index
    %c0_37 = arith.constant 0 : index
    %77 = vector.load %arg8[%c0_36, %c0_37] : memref<1x1xf32, #tpu.memory_space<vmem>>, vector<1x1xf32>
    tpu.vector_store %arg8[%c0_36, %c0_37], %76 {strides = array<i32>} : memref<1x1xf32, #tpu.memory_space<vmem>>, vector<1x1xf32>,
    return
  }
}

module attributes {stable_mosaic.version = 11 : i64} {
  func.func @_fused_mm_kernel(%arg0: memref<8x288xbf16, #tpu.memory_space<vmem>>, %arg1: memref<288x128xbf16, #tpu.memory_space<vmem>>, %arg2: memref<128x128xf32, #tpu.memory_space<vmem>>, %arg3: memref<1x128xf32, #tpu.memory_space<vmem>>, %arg4: memref<1x128xf32, #tpu.memory_space<vmem>>, %arg5: memref<8x128xbf16, #tpu.memory_space<vmem>>) attributes {dimension_semantics = [], scalar_prefetch = 0 : i64, scratch_operands = 0 : i64, tpu.core_type = #tpu.core_type<tc>} {
    %c0 = arith.constant 0 : index
    %c0_0 = arith.constant 0 : index
    %0 = vector.load %arg0[%c0, %c0_0] : memref<8x288xbf16, #tpu.memory_space<vmem>>, vector<8x288xbf16>
    %c0_1 = arith.constant 0 : index
    %c0_2 = arith.constant 0 : index
    %1 = vector.load %arg1[%c0_1, %c0_2] : memref<288x128xbf16, #tpu.memory_space<vmem>>, vector<288x128xbf16>
    %cst = arith.constant dense<0.000000e+00> : vector<8x128xf32>
    %2 = tpu.matmul %0, %1, %cst {dimension_numbers = #tpu.dot_dimension_numbers<[1], [0], [0], [1], [0, 0, 1, 1], [], []>} : vector<8x288xbf16>, vector<288x128xbf16>, vector<8x128xf32> -> vector<8x128xf32>
    %cst_3 = arith.constant 1.000000e+00 : f32
    %3 = vector.broadcast %cst_3 : f32 to vector<1x8xf32>
    %cst_4 = arith.constant dense<0.000000e+00> : vector<1x128xf32>
    %4 = tpu.matmul %3, %2, %cst_4 {dimension_numbers = #tpu.dot_dimension_numbers<[1], [0], [0], [1], [0, 0, 1, 1], [], []>} : vector<1x8xf32>, vector<8x128xf32>, vector<1x128xf32> -> vector<1x128xf32>
    %5 = arith.mulf %2, %2 : vector<8x128xf32>
    %cst_5 = arith.constant dense<0.000000e+00> : vector<1x128xf32>
    %6 = tpu.matmul %3, %5, %cst_5 {dimension_numbers = #tpu.dot_dimension_numbers<[1], [0], [0], [1], [0, 0, 1, 1], [], []>} : vector<1x8xf32>, vector<8x128xf32>, vector<1x128xf32> -> vector<1x128xf32>
    %c0_6 = arith.constant 0 : index
    %c0_7 = arith.constant 0 : index
    %7 = vector.load %arg2[%c0_6, %c0_7] : memref<128x128xf32, #tpu.memory_space<vmem>>, vector<128x128xf32>
    %cst_8 = arith.constant dense<0.000000e+00> : vector<1x128xf32>
    %8 = tpu.matmul %4, %7, %cst_8 {dimension_numbers = #tpu.dot_dimension_numbers<[1], [0], [0], [1], [0, 0, 1, 1], [], []>} : vector<1x128xf32>, vector<128x128xf32>, vector<1x128xf32> -> vector<1x128xf32>
    %c0_9 = arith.constant 0 : index
    %c0_10 = arith.constant 0 : index
    %9 = vector.load %arg2[%c0_9, %c0_10] : memref<128x128xf32, #tpu.memory_space<vmem>>, vector<128x128xf32>
    %cst_11 = arith.constant dense<0.000000e+00> : vector<1x128xf32>
    %10 = tpu.matmul %6, %9, %cst_11 {dimension_numbers = #tpu.dot_dimension_numbers<[1], [0], [0], [1], [0, 0, 1, 1], [], []>} : vector<1x128xf32>, vector<128x128xf32>, vector<1x128xf32> -> vector<1x128xf32>
    %cst_12 = arith.constant 3.200000e+01 : f32
    %11 = vector.broadcast %cst_12 : f32 to vector<1x128xf32>
    %12 = arith.divf %8, %11 : vector<1x128xf32>
    %cst_13 = arith.constant 3.200000e+01 : f32
    %13 = vector.broadcast %cst_13 : f32 to vector<1x128xf32>
    %14 = arith.divf %10, %13 : vector<1x128xf32>
    %15 = arith.mulf %12, %12 : vector<1x128xf32>
    %16 = arith.subf %14, %15 : vector<1x128xf32>
    %c0_14 = arith.constant 0 : index
    %c0_15 = arith.constant 0 : index
    %17 = vector.load %arg3[%c0_14, %c0_15] : memref<1x128xf32, #tpu.memory_space<vmem>>, vector<1x128xf32>
    %cst_16 = arith.constant 9.99999974E-6 : f32
    %18 = vector.broadcast %cst_16 : f32 to vector<1x128xf32>
    %19 = arith.addf %16, %18 : vector<1x128xf32>
    %20 = math.rsqrt %19 : vector<1x128xf32>
    %21 = arith.mulf %17, %20 : vector<1x128xf32>
    %c0_17 = arith.constant 0 : index
    %c0_18 = arith.constant 0 : index
    %22 = vector.load %arg4[%c0_17, %c0_18] : memref<1x128xf32, #tpu.memory_space<vmem>>, vector<1x128xf32>
    %23 = arith.mulf %12, %21 : vector<1x128xf32>
    %24 = arith.subf %22, %23 : vector<1x128xf32>
    %25 = vector.broadcast %21 : vector<1x128xf32> to vector<8x128xf32>
    %26 = arith.mulf %2, %25 : vector<8x128xf32>
    %27 = vector.broadcast %24 : vector<1x128xf32> to vector<8x128xf32>
    %28 = arith.addf %26, %27 : vector<8x128xf32>
    %cst_19 = arith.constant 0.000000e+00 : f32
    %29 = vector.broadcast %cst_19 : f32 to vector<8x128xf32>
    %30 = arith.maximumf %28, %29 : vector<8x128xf32>
    %31 = arith.truncf %30 : vector<8x128xf32> to vector<8x128xbf16>
    %c0_20 = arith.constant 0 : index
    %c0_21 = arith.constant 0 : index
    %32 = vector.load %arg5[%c0_20, %c0_21] : memref<8x128xbf16, #tpu.memory_space<vmem>>, vector<8x128xbf16>
    tpu.vector_store %arg5[%c0_20, %c0_21], %31 {strides = array<i32>} : memref<8x128xbf16, #tpu.memory_space<vmem>>, vector<8x128xbf16>,
    return
  }
}

module attributes {stable_mosaic.version = 11 : i64} {
  func.func @_fused_mm_kernel(%arg0: memref<32x288xbf16, #tpu.memory_space<vmem>>, %arg1: memref<288x128xbf16, #tpu.memory_space<vmem>>, %arg2: memref<128x128xf32, #tpu.memory_space<vmem>>, %arg3: memref<1x128xf32, #tpu.memory_space<vmem>>, %arg4: memref<1x128xf32, #tpu.memory_space<vmem>>, %arg5: memref<32x128xbf16, #tpu.memory_space<vmem>>) attributes {dimension_semantics = [], scalar_prefetch = 0 : i64, scratch_operands = 0 : i64, tpu.core_type = #tpu.core_type<tc>} {
    %c0 = arith.constant 0 : index
    %c0_0 = arith.constant 0 : index
    %0 = vector.load %arg0[%c0, %c0_0] : memref<32x288xbf16, #tpu.memory_space<vmem>>, vector<32x288xbf16>
    %c0_1 = arith.constant 0 : index
    %c0_2 = arith.constant 0 : index
    %1 = vector.load %arg1[%c0_1, %c0_2] : memref<288x128xbf16, #tpu.memory_space<vmem>>, vector<288x128xbf16>
    %cst = arith.constant dense<0.000000e+00> : vector<32x128xf32>
    %2 = tpu.matmul %0, %1, %cst {dimension_numbers = #tpu.dot_dimension_numbers<[1], [0], [0], [1], [0, 0, 1, 1], [], []>} : vector<32x288xbf16>, vector<288x128xbf16>, vector<32x128xf32> -> vector<32x128xf32>
    %cst_3 = arith.constant 1.000000e+00 : f32
    %3 = vector.broadcast %cst_3 : f32 to vector<1x32xf32>
    %cst_4 = arith.constant dense<0.000000e+00> : vector<1x128xf32>
    %4 = tpu.matmul %3, %2, %cst_4 {dimension_numbers = #tpu.dot_dimension_numbers<[1], [0], [0], [1], [0, 0, 1, 1], [], []>} : vector<1x32xf32>, vector<32x128xf32>, vector<1x128xf32> -> vector<1x128xf32>
    %5 = arith.mulf %2, %2 : vector<32x128xf32>
    %cst_5 = arith.constant dense<0.000000e+00> : vector<1x128xf32>
    %6 = tpu.matmul %3, %5, %cst_5 {dimension_numbers = #tpu.dot_dimension_numbers<[1], [0], [0], [1], [0, 0, 1, 1], [], []>} : vector<1x32xf32>, vector<32x128xf32>, vector<1x128xf32> -> vector<1x128xf32>
    %c0_6 = arith.constant 0 : index
    %c0_7 = arith.constant 0 : index
    %7 = vector.load %arg2[%c0_6, %c0_7] : memref<128x128xf32, #tpu.memory_space<vmem>>, vector<128x128xf32>
    %cst_8 = arith.constant dense<0.000000e+00> : vector<1x128xf32>
    %8 = tpu.matmul %4, %7, %cst_8 {dimension_numbers = #tpu.dot_dimension_numbers<[1], [0], [0], [1], [0, 0, 1, 1], [], []>} : vector<1x128xf32>, vector<128x128xf32>, vector<1x128xf32> -> vector<1x128xf32>
    %c0_9 = arith.constant 0 : index
    %c0_10 = arith.constant 0 : index
    %9 = vector.load %arg2[%c0_9, %c0_10] : memref<128x128xf32, #tpu.memory_space<vmem>>, vector<128x128xf32>
    %cst_11 = arith.constant dense<0.000000e+00> : vector<1x128xf32>
    %10 = tpu.matmul %6, %9, %cst_11 {dimension_numbers = #tpu.dot_dimension_numbers<[1], [0], [0], [1], [0, 0, 1, 1], [], []>} : vector<1x128xf32>, vector<128x128xf32>, vector<1x128xf32> -> vector<1x128xf32>
    %cst_12 = arith.constant 1.280000e+02 : f32
    %11 = vector.broadcast %cst_12 : f32 to vector<1x128xf32>
    %12 = arith.divf %8, %11 : vector<1x128xf32>
    %cst_13 = arith.constant 1.280000e+02 : f32
    %13 = vector.broadcast %cst_13 : f32 to vector<1x128xf32>
    %14 = arith.divf %10, %13 : vector<1x128xf32>
    %15 = arith.mulf %12, %12 : vector<1x128xf32>
    %16 = arith.subf %14, %15 : vector<1x128xf32>
    %c0_14 = arith.constant 0 : index
    %c0_15 = arith.constant 0 : index
    %17 = vector.load %arg3[%c0_14, %c0_15] : memref<1x128xf32, #tpu.memory_space<vmem>>, vector<1x128xf32>
    %cst_16 = arith.constant 9.99999974E-6 : f32
    %18 = vector.broadcast %cst_16 : f32 to vector<1x128xf32>
    %19 = arith.addf %16, %18 : vector<1x128xf32>
    %20 = math.rsqrt %19 : vector<1x128xf32>
    %21 = arith.mulf %17, %20 : vector<1x128xf32>
    %c0_17 = arith.constant 0 : index
    %c0_18 = arith.constant 0 : index
    %22 = vector.load %arg4[%c0_17, %c0_18] : memref<1x128xf32, #tpu.memory_space<vmem>>, vector<1x128xf32>
    %23 = arith.mulf %12, %21 : vector<1x128xf32>
    %24 = arith.subf %22, %23 : vector<1x128xf32>
    %25 = vector.broadcast %21 : vector<1x128xf32> to vector<32x128xf32>
    %26 = arith.mulf %2, %25 : vector<32x128xf32>
    %27 = vector.broadcast %24 : vector<1x128xf32> to vector<32x128xf32>
    %28 = arith.addf %26, %27 : vector<32x128xf32>
    %cst_19 = arith.constant 0.000000e+00 : f32
    %29 = vector.broadcast %cst_19 : f32 to vector<32x128xf32>
    %30 = arith.maximumf %28, %29 : vector<32x128xf32>
    %31 = arith.truncf %30 : vector<32x128xf32> to vector<32x128xbf16>
    %c0_20 = arith.constant 0 : index
    %c0_21 = arith.constant 0 : index
    %32 = vector.load %arg5[%c0_20, %c0_21] : memref<32x128xbf16, #tpu.memory_space<vmem>>, vector<32x128xbf16>
    tpu.vector_store %arg5[%c0_20, %c0_21], %31 {strides = array<i32>} : memref<32x128xbf16, #tpu.memory_space<vmem>>, vector<32x128xbf16>,
    return
  }
}

module attributes {stable_mosaic.version = 11 : i64} {
  func.func @_fused_mm_kernel(%arg0: memref<128x288xbf16, #tpu.memory_space<vmem>>, %arg1: memref<288x16xbf16, #tpu.memory_space<vmem>>, %arg2: memref<1x16xf32, #tpu.memory_space<vmem>>, %arg3: memref<128x16xf32, #tpu.memory_space<vmem>>) attributes {dimension_semantics = [], scalar_prefetch = 0 : i64, scratch_operands = 0 : i64, tpu.core_type = #tpu.core_type<tc>} {
    %c0 = arith.constant 0 : index
    %c0_0 = arith.constant 0 : index
    %0 = vector.load %arg0[%c0, %c0_0] : memref<128x288xbf16, #tpu.memory_space<vmem>>, vector<128x288xbf16>
    %c0_1 = arith.constant 0 : index
    %c0_2 = arith.constant 0 : index
    %1 = vector.load %arg1[%c0_1, %c0_2] : memref<288x16xbf16, #tpu.memory_space<vmem>>, vector<288x16xbf16>
    %cst = arith.constant dense<0.000000e+00> : vector<128x16xf32>
    %2 = tpu.matmul %0, %1, %cst {dimension_numbers = #tpu.dot_dimension_numbers<[1], [0], [0], [1], [0, 0, 1, 1], [], []>} : vector<128x288xbf16>, vector<288x16xbf16>, vector<128x16xf32> -> vector<128x16xf32>
    %c0_3 = arith.constant 0 : index
    %c0_4 = arith.constant 0 : index
    %3 = vector.load %arg2[%c0_3, %c0_4] : memref<1x16xf32, #tpu.memory_space<vmem>>, vector<1x16xf32>
    %4 = vector.broadcast %3 : vector<1x16xf32> to vector<128x16xf32>
    %5 = arith.addf %2, %4 : vector<128x16xf32>
    %c0_5 = arith.constant 0 : index
    %c0_6 = arith.constant 0 : index
    %6 = vector.load %arg3[%c0_5, %c0_6] : memref<128x16xf32, #tpu.memory_space<vmem>>, vector<128x16xf32>
    tpu.vector_store %arg3[%c0_5, %c0_6], %5 {strides = array<i32>} : memref<128x16xf32, #tpu.memory_space<vmem>>, vector<128x16xf32>,
    return
  }
}

</mosaic_0001>

<bundles_post_ra>
// kernel: vqvae_forward.15
= control target key start
LH: loop header
LB: loop body
LE: loop exit
PB: predicated region body
PF: predicated region fallthrough
CT: control target
= control target key end

     0   :  { %vm106_vm0 = vcmask 523264   ;;  %v799_v12 = vmov 0.0|0.0   ;;  %vm800_vm1 = vmmov 0   ;;  %v801_v13 = vmov 0.0   ;;  %s1036_s1 = inlined_call_operand.vmem [shape: bf16[64,32], index: 1, kind: input, shape index: {}]   ;;  %s1037_s0 = inlined_call_operand.vmem [shape: bf16[128,64], index: 0, kind: input, shape index: {}]   ;;  %s1038_s2 = inlined_call_operand.vmem [shape: f32[1,32], index: 2, kind: input, shape index: {}]   ;;  %s1039_s3 = inlined_call_operand.vmem [shape: f32[1,32], index: 3, kind: input, shape index: {}]   ;;  %s1040_s4 = inlined_call_operand.vmem [shape: bf16[128,32], index: 4, kind: output, shape index: {}]  }
   0x1   :  { %v785_v0 = vld [vmem:[%s1036_s1] sm:$0xff]   ;;  %v786_v1 = vld [vmem:[%s1036_s1 + $0x8] sm:$0xff]   ;;  %v787_v2 = vld [vmem:[%s1036_s1 + $0x10] sm:$0xff]   ;;  %733 = vmatprep.subr.bf16.mxu1 %v799_v12  ;;  %695 = vmatprep.mubr.msk.f32.mxu1 %vm800_vm1, %v801_v13  ;;  %v802_v62 = vmov 1.0   ;;  %vm520_vm2 = vcmask 257024  }
   0x2   :  { %639 = vmatprep.subr.bf16.mxu0 %v785_v0  ;;  %v789_v3 = vld [vmem:[%s1037_s0] sm:$0xff]   ;;  %v788_v4 = vld [vmem:[%s1036_s1 + $0x18] sm:$0xff]   ;;  %v790_v5 = vld [vmem:[%s1037_s0 + $0x8] sm:$0xff]  }
   0x3   :  { %640 = vmatpush3.bf16.msra.mxu0 %v785_v0  ;;  %647 = vmatprep.mubr.msk.bf16.mxu0 %vm106_vm0, %v789_v3  ;;  %v791_v6 = vld [vmem:[%s1037_s0 + $0x10] sm:$0xff]   ;;  %v792_v7 = vld [vmem:[%s1037_s0 + $0x18] sm:$0xff]   ;;  %v793_v8 = vld [vmem:[%s1037_s0 + $0x20] sm:$0xff]  }
   0x4   :  { %641 = vmatprep.subr.bf16.mxu0 %v786_v1  ;;  %v794_v9 = vld [vmem:[%s1037_s0 + $0x28] sm:$0xff]   ;;  %v795_v10 = vld [vmem:[%s1037_s0 + $0x30] sm:$0xff]   ;;  %v796_v11 = vld [vmem:[%s1037_s0 + $0x38] sm:$0xff]  }
   0x7   :  { %642 = vmatpush3.bf16.msra.mxu0 %v786_v1 }
   0x8   :  { %643 = vmatprep.subr.bf16.mxu0 %v787_v2 }
   0xb   :  { %644 = vmatpush3.bf16.msra.mxu0 %v787_v2 }
   0xc   :  { %645 = vmatprep.subr.bf16.mxu0 %v788_v4 }
   0xf   :  { %646 = vmatpush3.bf16.msra.mxu0 %v788_v4 }
  0x10   :  { %757 = vmatprep.subr.bf16.mxu0 %v799_v12 }
  0x12   :  { %648 = vmatmul.mubr.msk.bf16.vlgmr.msra.gmra.mrb[0].mxu0 %vm106_vm0, %v790_v5 }
  0x13   :  { %651 = vmatprep.mubr.msk.bf16.mxu0 %vm106_vm0, %v791_v6 }
  0x1a   :  { %652 = vmatmul.mubr.msk.bf16.gmra.mrb[4].mxu0 %vm106_vm0, %v792_v7 }
  0x1b   :  { %655 = vmatprep.mubr.msk.bf16.mxu0 %vm106_vm0, %v793_v8  ;;  %v397_v8 = vlaneseq }
  0x22   :  { %656 = vmatmul.mubr.msk.bf16.gmra.mrb[8].mxu0 %vm106_vm0, %v794_v9  ;;  %v398_v9 = vshrl.u32 %v397_v8, 7 }
  0x23   :  { %659 = vmatprep.mubr.msk.bf16.mxu0 %vm106_vm0, %v795_v10  ;;  %v389_v10 = vld [vmem:[%s1038_s2] sm:$0x1] }
  0x2a   :  { %660 = vmatmul.mubr.msk.bf16.gmra.mrb[12].mxu0 %vm106_vm0, %v796_v11  ;;  %v399_v11 = vsub.s32 0, %v398_v9 }
  0x2b   :  { %730 = vmatprep.mubr.msk.f32.mxu0 %vm800_vm1, %v801_v13 }
  0xe5   :  { %v874_v14 = vpop.f32.mrb[0].mxu0 }
  0xe6   :  { %v876_v15 = vpop.f32.mrb[1].mxu0  ;;  %v300_v17 = vmul.f32 %v874_v14, %v874_v14 }
  0xe7   :  { %v878_v16 = vpop.f32.mrb[2].mxu0  ;;  %v298_v21 = vmul.f32 %v876_v15, %v876_v15 }
  0xe8   :  { %v737_v18 = vpack.c.bf16 %v878_v16, %v874_v14  ;;  %v301_v19 = vmul.f32 %v878_v16, %v878_v16  ;;  %v886_v20 = vpop.f32.mrb[3].mxu0 }
  0xe9   :  { %v299_v22 = vmul.f32 %v886_v20, %v886_v20  ;;  %v734_v23 = vpack.c.bf16 %v886_v20, %v876_v15 }
  0xea   :  { %v761_v24 = vpack.c.bf16 %v301_v19, %v300_v17  ;;  %v393_v17 = vld [vmem:[%s1039_s3] sm:$0x1] }
  0xeb   :  { %v758_v25 = vpack.c.bf16 %v299_v22, %v298_v21  ;;  %735 = vmatpush3.bf16.msra.mxu1 %v734_v23 }
  0xec   :  { %736 = vmatprep.subr.bf16.mxu1 %v799_v12 }
  0xed   :  { %v895_v26 = vpop.f32.mrb[4].mxu0  ;;  %759 = vmatpush3.bf16.msra.mxu0 %v758_v25 }
  0xee   :  { %v897_v27 = vpop.f32.mrb[5].mxu0  ;;  %760 = vmatprep.subr.bf16.mxu0 %v799_v12  ;;  %v304_v29 = vmul.f32 %v895_v26, %v895_v26 }
  0xef   :  { %v900_v28 = vpop.f32.mrb[6].mxu0  ;;  %738 = vmatpush3.bf16.msra.mxu1 %v737_v18  ;;  %v302_v33 = vmul.f32 %v897_v27, %v897_v27 }
  0xf0   :  { %v743_v30 = vpack.c.bf16 %v900_v28, %v895_v26  ;;  %v305_v31 = vmul.f32 %v900_v28, %v900_v28  ;;  %v908_v32 = vpop.f32.mrb[7].mxu0  ;;  %739 = vmatprep.subr.bf16.mxu1 %v799_v12 }
  0xf1   :  { %v740_v34 = vpack.c.bf16 %v908_v32, %v897_v27  ;;  %v303_v35 = vmul.f32 %v908_v32, %v908_v32  ;;  %762 = vmatpush3.bf16.msra.mxu0 %v761_v24 }
  0xf2   :  { %v767_v36 = vpack.c.bf16 %v305_v31, %v304_v29  ;;  %763 = vmatprep.subr.bf16.mxu0 %v799_v12 }
  0xf3   :  { %v764_v37 = vpack.c.bf16 %v303_v35, %v302_v33  ;;  %741 = vmatpush3.bf16.msra.mxu1 %v740_v34 }
  0xf4   :  { %742 = vmatprep.subr.bf16.mxu1 %v799_v12 }
  0xf5   :  { %v919_v38 = vpop.f32.mrb[8].mxu0  ;;  %765 = vmatpush3.bf16.msra.mxu0 %v764_v37 }
  0xf6   :  { %v921_v39 = vpop.f32.mrb[9].mxu0  ;;  %766 = vmatprep.subr.bf16.mxu0 %v799_v12  ;;  %v308_v41 = vmul.f32 %v919_v38, %v919_v38 }
  0xf7   :  { %v924_v40 = vpop.f32.mrb[10].mxu0  ;;  %744 = vmatpush3.bf16.msra.mxu1 %v743_v30  ;;  %v306_v45 = vmul.f32 %v921_v39, %v921_v39 }
  0xf8   :  { %v749_v42 = vpack.c.bf16 %v924_v40, %v919_v38  ;;  %v309_v43 = vmul.f32 %v924_v40, %v924_v40  ;;  %v932_v44 = vpop.f32.mrb[11].mxu0  ;;  %745 = vmatprep.subr.bf16.mxu1 %v799_v12 }
  0xf9   :  { %v746_v46 = vpack.c.bf16 %v932_v44, %v921_v39  ;;  %v307_v47 = vmul.f32 %v932_v44, %v932_v44  ;;  %768 = vmatpush3.bf16.msra.mxu0 %v767_v36 }
  0xfa   :  { %v773_v48 = vpack.c.bf16 %v309_v43, %v308_v41  ;;  %769 = vmatprep.subr.bf16.mxu0 %v799_v12 }
  0xfb   :  { %v770_v49 = vpack.c.bf16 %v307_v47, %v306_v45  ;;  %747 = vmatpush3.bf16.msra.mxu1 %v746_v46 }
  0xfc   :  { %748 = vmatprep.subr.bf16.mxu1 %v799_v12 }
  0xfd   :  { %v943_v50 = vpop.f32.mrb[12].mxu0  ;;  %771 = vmatpush3.bf16.msra.mxu0 %v770_v49 }
  0xfe   :  { %v213_v51 = vpop.f32.mrb[13].mxu0  ;;  %772 = vmatprep.subr.bf16.mxu0 %v799_v12  ;;  %v312_v53 = vmul.f32 %v943_v50, %v943_v50 }
  0xff   :  { %v662_v52 = vpop.f32.mrb[14].mxu0  ;;  %750 = vmatpush3.bf16.msra.mxu1 %v749_v42  ;;  %v310_v57 = vmul.f32 %v213_v51, %v213_v51 }
 0x100   :  { %v755_v54 = vpack.c.bf16 %v662_v52, %v943_v50  ;;  %v313_v55 = vmul.f32 %v662_v52, %v662_v52  ;;  %v216_v56 = vpop.f32.mrb[15].mxu0  ;;  %751 = vmatprep.subr.bf16.mxu1 %v799_v12 }
 0x101   :  { %v752_v58 = vpack.c.bf16 %v216_v56, %v213_v51  ;;  %v311_v59 = vmul.f32 %v216_v56, %v216_v56  ;;  %774 = vmatpush3.bf16.msra.mxu0 %v773_v48 }
 0x102   :  { %v779_v60 = vpack.c.bf16 %v313_v55, %v312_v53  ;;  %775 = vmatprep.subr.bf16.mxu0 %v799_v12 }
 0x103   :  { %v776_v61 = vpack.c.bf16 %v311_v59, %v310_v57  ;;  %753 = vmatpush3.bf16.msra.mxu1 %v752_v58 }
 0x104   :  { %754 = vmatprep.subr.bf16.mxu1 %v799_v12 }
 0x105   :  { %777 = vmatpush3.bf16.msra.mxu0 %v776_v61 }
 0x106   :  { %778 = vmatprep.subr.bf16.mxu0 %v799_v12 }
 0x107   :  { %756 = vmatpush3.bf16.msra.mxu1 %v755_v54 }
 0x109   :  { %780 = vmatpush3.bf16.msra.mxu0 %v779_v60 }
 0x10a   :  { %696 = vmatmul.mubr.f32.vlgmr.msra.gmra.mrb[0].mxu1 %v802_v62 }
 0x10c   :  { %731 = vmatmul.mubr.f32.vlgmr.msra.gmra.mrb[16].mxu0 %v802_v62 }
 0x1dd   :  { %v294_v63 = vpop.f32.mrb[0].mxu1 }
 0x1de   :  { %v385_v0 = vmul.f32 0.0078125, %v294_v63  ;;  %v697_v1 = vpop.f32.mrb[1].mxu1 }
 0x1df   :  { %v380_v2 = vpop.f32.mrb[16].mxu0 }
 0x1e0   :  { %v387_v3 = vmul.f32 %v385_v0, %v385_v0  ;;  %v386_v4 = vmul.f32 0.0078125, %v380_v2  ;;  %v732_v5 = vpop.f32.mrb[17].mxu0 }
 0x1e2   :  { %v388_v6 = vsub.f32 %v386_v4, %v387_v3 }
 0x1e4   :  { %v390_v7 = vadd.f32 1e-05, %v388_v6 }
 0x1e6   :  { %797 = vrsqrt.f32 %v390_v7 }
 0x1f0   :  { %v798_v12 = vpop.eup %797 }
 0x1f1   :  { %v392_v13 = vmul.f32 %v798_v12, %v389_v10 }
 0x1f3   :  { %v394_v18 = vmul.f32 %v392_v13, %v385_v0  ;;  %v400_v19 = vrot.slane %v392_v13, %v399_v11 }
 0x1f5   :  { %v395_v21 = vsub.f32 %v393_v17, %v394_v18  ;;  %v402_v22 = vmul.f32 %v400_v19, %v876_v15  ;;  %v403_v23 = vmul.f32 %v400_v19, %v886_v20  ;;  %v404_v24 = vmul.f32 %v874_v14, %v400_v19 }
 0x1f6   :  { %v405_v25 = vmul.f32 %v878_v16, %v400_v19  ;;  %v406_v29 = vmul.f32 %v400_v19, %v897_v27  ;;  %v407_v30 = vmul.f32 %v400_v19, %v908_v32  ;;  %v408_v31 = vmul.f32 %v895_v26, %v400_v19 }
 0x1f7   :  { %v409_v33 = vmul.f32 %v900_v28, %v400_v19  ;;  %v410_v34 = vmul.f32 %v400_v19, %v921_v39  ;;  %v411_v35 = vmul.f32 %v400_v19, %v932_v44  ;;  %v412_v15 = vmul.f32 %v919_v38, %v400_v19 }
 0x1f8   :  { %v413_v20 = vmul.f32 %v924_v40, %v400_v19  ;;  %v414_v36 = vmul.f32 %v400_v19, %v213_v51  ;;  %v415_v14 = vmul.f32 %v400_v19, %v216_v56  ;;  %v416_v16 = vmul.f32 %v943_v50, %v400_v19 }
 0x1f9   :  { %v417_v37 = vmul.f32 %v662_v52, %v400_v19  ;;  %v422_v27 = vrot.slane %v395_v21, %v399_v11 }
 0x1fb   :  { %v424_v32 = vadd.f32 %v422_v27, %v402_v22  ;;  %v425_v41 = vadd.f32 %v422_v27, %v403_v23  ;;  %v426_v26 = vadd.f32 %v422_v27, %v404_v24  ;;  %v427_v42 = vadd.f32 %v422_v27, %v405_v25 }
 0x1fc   :  { %v428_v28 = vadd.f32 %v422_v27, %v406_v29  ;;  %v429_v43 = vadd.f32 %v422_v27, %v407_v30  ;;  %v430_v39 = vadd.f32 %v422_v27, %v408_v31  ;;  %v431_v45 = vadd.f32 %v422_v27, %v409_v33 }
 0x1fd   :  { %v432_v44 = vadd.f32 %v422_v27, %v410_v34  ;;  %v433_v46 = vadd.f32 %v422_v27, %v411_v35  ;;  %v434_v38 = vadd.f32 %v422_v27, %v412_v15  ;;  %v435_v47 = vadd.f32 %v422_v27, %v413_v20 }
 0x1fe   :  { %v436_v40 = vadd.f32 %v422_v27, %v414_v36  ;;  %v437_v48 = vadd.f32 %v422_v27, %v415_v14  ;;  %v438_v49 = vadd.f32 %v422_v27, %v416_v16  ;;  %v439_v51 = vadd.f32 %v422_v27, %v417_v37 }
 0x1ff   :  { %v440_v50 = vmax.f32 %v424_v32, 0.0  ;;  %v441_v52 = vmax.f32 %v425_v41, 0.0  ;;  %v442_v53 = vmax.f32 %v426_v26, 0.0  ;;  %v443_v54 = vmax.f32 %v427_v42, 0.0 }
 0x200   :  { %v444_v55 = vmax.f32 %v428_v28, 0.0  ;;  %v445_v56 = vmax.f32 %v429_v43, 0.0  ;;  %v446_v57 = vmax.f32 %v430_v39, 0.0  ;;  %v447_v58 = vmax.f32 %v431_v45, 0.0 }
 0x201   :  { %v448_v59 = vmax.f32 %v432_v44, 0.0  ;;  %v449_v60 = vmax.f32 %v433_v46, 0.0  ;;  %v450_v61 = vmax.f32 %v434_v38, 0.0  ;;  %v451_v62 = vmax.f32 %v435_v47, 0.0 }
 0x202   :  { %v452_v63 = vmax.f32 %v436_v40, 0.0  ;;  %v453_v0 = vmax.f32 %v437_v48, 0.0  ;;  %v454_v1 = vmax.f32 %v438_v49, 0.0  ;;  %v455_v2 = vmax.f32 %v439_v51, 0.0 }
 0x203   :  { %v577_v3 = vpack.c.bf16 %v440_v50, %v440_v50  ;;  %v578_v4 = vpack.c.bf16 %v441_v52, %v441_v52  ;;  %v579_v5 = vpack.c.bf16 %v442_v53, %v442_v53  ;;  %v580_v6 = vpack.c.bf16 %v443_v54, %v443_v54 }
 0x204   :  { %v581_v7 = vpack.c.bf16 %v444_v55, %v444_v55  ;;  %v582_v8 = vpack.c.bf16 %v445_v56, %v445_v56  ;;  %v583_v9 = vpack.c.bf16 %v446_v57, %v446_v57  ;;  %v584_v10 = vpack.c.bf16 %v447_v58, %v447_v58 }
 0x205   :  { %v585_v11 = vpack.c.bf16 %v448_v59, %v448_v59  ;;  %v586_v12 = vpack.c.bf16 %v449_v60, %v449_v60  ;;  %v587_v13 = vpack.c.bf16 %v450_v61, %v450_v61  ;;  %v588_v17 = vpack.c.bf16 %v451_v62, %v451_v62  ;;  %521 = vst.msk [vmem:[%s1040_s4] sm:$0xf] %vm520_vm2, %v577_v3 }
 0x206   :  { %522 = vst.msk [vmem:[%s1040_s4 + $0x4] sm:$0xf] %vm520_vm2, %v578_v4  ;;  %523 = vst.msk [vmem:[%s1040_s4 + $0x8] sm:$0xf] %vm520_vm2, %v579_v5  ;;  %v589_v18 = vpack.c.bf16 %v452_v63, %v452_v63  ;;  %v590_v19 = vpack.c.bf16 %v453_v0, %v453_v0  ;;  %v591_v21 = vpack.c.bf16 %v454_v1, %v454_v1 }
 0x207   :  { %524 = vst.msk [vmem:[%s1040_s4 + $0xc] sm:$0xf] %vm520_vm2, %v580_v6  ;;  %v592_v22 = vpack.c.bf16 %v455_v2, %v455_v2  ;;  %525 = vst.msk [vmem:[%s1040_s4 + $0x10] sm:$0xf] %vm520_vm2, %v581_v7 }
 0x208   :  { %526 = vst.msk [vmem:[%s1040_s4 + $0x14] sm:$0xf] %vm520_vm2, %v582_v8  ;;  %527 = vst.msk [vmem:[%s1040_s4 + $0x18] sm:$0xf] %vm520_vm2, %v583_v9 }
 0x209   :  { %528 = vst.msk [vmem:[%s1040_s4 + $0x1c] sm:$0xf] %vm520_vm2, %v584_v10  ;;  %529 = vst.msk [vmem:[%s1040_s4 + $0x20] sm:$0xf] %vm520_vm2, %v585_v11 }
 0x20a   :  { %530 = vst.msk [vmem:[%s1040_s4 + $0x24] sm:$0xf] %vm520_vm2, %v586_v12  ;;  %531 = vst.msk [vmem:[%s1040_s4 + $0x28] sm:$0xf] %vm520_vm2, %v587_v13 }
 0x20b   :  { %532 = vst.msk [vmem:[%s1040_s4 + $0x2c] sm:$0xf] %vm520_vm2, %v588_v17  ;;  %533 = vst.msk [vmem:[%s1040_s4 + $0x30] sm:$0xf] %vm520_vm2, %v589_v18 }
 0x20c   :  { %534 = vst.msk [vmem:[%s1040_s4 + $0x34] sm:$0xf] %vm520_vm2, %v590_v19  ;;  %535 = vst.msk [vmem:[%s1040_s4 + $0x38] sm:$0xf] %vm520_vm2, %v591_v21 }
 0x20d   :  { %536 = vst.msk [vmem:[%s1040_s4 + $0x3c] sm:$0xf] %vm520_vm2, %v592_v22 }

// kernel: vqvae_forward.16
= control target key start
LH: loop header
LB: loop body
LE: loop exit
PB: predicated region body
PF: predicated region fallthrough
CT: control target
= control target key end

     0   :  { %v829_v40 = vmov 0.0|0.0   ;;  %vm830_vm0 = vmmov 0   ;;  %v831_v41 = vmov 0.0   ;;  %vm420_vm1 = vcmask 261120   ;;  %s996_s1 = inlined_call_operand.vmem [shape: bf16[512,32], index: 1, kind: input, shape index: {}]   ;;  %s997_s0 = inlined_call_operand.vmem [shape: bf16[32,512], index: 0, kind: input, shape index: {}]   ;;  %s998_s2 = inlined_call_operand.vmem [shape: f32[1,32], index: 2, kind: input, shape index: {}]   ;;  %s999_s3 = inlined_call_operand.vmem [shape: f32[1,32], index: 3, kind: input, shape index: {}]   ;;  %s1000_s4 = inlined_call_operand.vmem [shape: bf16[32,32], index: 4, kind: output, shape index: {}]  }
   0x1   :  { %v783_v0 = vld [vmem:[%s996_s1 + $0x40] sm:$0xff]   ;;  %v787_v4 = vld [vmem:[%s996_s1 + $0x48] sm:$0xff]   ;;  %v791_v8 = vld [vmem:[%s996_s1 + $0x50] sm:$0xff]   ;;  %vm620_vm2 = vcmask 257024  }
   0x2   :  { %v784_v1 = vld [vmem:[%s996_s1 + $0xc0] sm:$0xff]   ;;  %679 = vmatprep.subr.bf16.mxu0 %v783_v0  ;;  %v788_v5 = vld [vmem:[%s996_s1 + $0xc8] sm:$0xff]   ;;  %v792_v9 = vld [vmem:[%s996_s1 + $0xd0] sm:$0xff]  }
   0x3   :  { %v785_v2 = vld [vmem:[%s996_s1] sm:$0xff]   ;;  %707 = vmatprep.subr.bf16.mxu1 %v784_v1  ;;  %v789_v6 = vld [vmem:[%s996_s1 + $0x8] sm:$0xff]   ;;  %v793_v10 = vld [vmem:[%s996_s1 + $0x10] sm:$0xff]  }
   0x4   :  { %v786_v3 = vld [vmem:[%s996_s1 + $0x80] sm:$0xff]   ;;  %680 = vmatpush3.bf16.msra.mxu0 %v785_v2  ;;  %v790_v7 = vld [vmem:[%s996_s1 + $0x88] sm:$0xff]   ;;  %v794_v11 = vld [vmem:[%s996_s1 + $0x90] sm:$0xff]  }
   0x5   :  { %708 = vmatpush3.bf16.msra.mxu1 %v786_v3  ;;  %681 = vmatprep.subr.bf16.mxu0 %v787_v4  ;;  %v795_v12 = vld [vmem:[%s996_s1 + $0x58] sm:$0xff]   ;;  %v799_v16 = vld [vmem:[%s996_s1 + $0x60] sm:$0xff]   ;;  %v803_v20 = vld [vmem:[%s996_s1 + $0x68] sm:$0xff]  }
   0x6   :  { %709 = vmatprep.subr.bf16.mxu1 %v788_v5  ;;  %v796_v13 = vld [vmem:[%s996_s1 + $0xd8] sm:$0xff]   ;;  %v800_v17 = vld [vmem:[%s996_s1 + $0xe0] sm:$0xff]   ;;  %v804_v21 = vld [vmem:[%s996_s1 + $0xe8] sm:$0xff]  }
   0x7   :  { %v797_v14 = vld [vmem:[%s996_s1 + $0x18] sm:$0xff]   ;;  %v801_v18 = vld [vmem:[%s996_s1 + $0x20] sm:$0xff]   ;;  %v805_v22 = vld [vmem:[%s996_s1 + $0x28] sm:$0xff]  }
   0x8   :  { %682 = vmatpush3.bf16.msra.mxu0 %v789_v6  ;;  %v798_v15 = vld [vmem:[%s996_s1 + $0x98] sm:$0xff]   ;;  %v802_v19 = vld [vmem:[%s996_s1 + $0xa0] sm:$0xff]   ;;  %v806_v23 = vld [vmem:[%s996_s1 + $0xa8] sm:$0xff]  }
   0x9   :  { %710 = vmatpush3.bf16.msra.mxu1 %v790_v7  ;;  %683 = vmatprep.subr.bf16.mxu0 %v791_v8  ;;  %v807_v24 = vld [vmem:[%s996_s1 + $0x70] sm:$0xff]   ;;  %v811_v28 = vld [vmem:[%s996_s1 + $0x78] sm:$0xff]  }
   0xa   :  { %711 = vmatprep.subr.bf16.mxu1 %v792_v9  ;;  %v808_v25 = vld [vmem:[%s996_s1 + $0xf0] sm:$0xff]   ;;  %v812_v29 = vld [vmem:[%s996_s1 + $0xf8] sm:$0xff]  }
   0xb   :  { %v809_v26 = vld [vmem:[%s996_s1 + $0x30] sm:$0xff]   ;;  %v813_v30 = vld [vmem:[%s996_s1 + $0x38] sm:$0xff]  }
   0xc   :  { %684 = vmatpush3.bf16.msra.mxu0 %v793_v10  ;;  %v810_v27 = vld [vmem:[%s996_s1 + $0xb0] sm:$0xff]   ;;  %v814_v31 = vld [vmem:[%s996_s1 + $0xb8] sm:$0xff]  }
   0xd   :  { %712 = vmatpush3.bf16.msra.mxu1 %v794_v11  ;;  %685 = vmatprep.subr.bf16.mxu0 %v795_v12  ;;  %v815_v32 = vld [vmem:[%s997_s0] ss:$16 sps:$4 sm:$0xff]   ;;  %v817_v33 = vld [vmem:[%s997_s0 + $0x4] ss:$16 sps:$4 sm:$0xff]   ;;  %v818_v34 = vld [vmem:[%s997_s0 + $0x8] ss:$16 sps:$4 sm:$0xff]  }
   0xe   :  { %713 = vmatprep.subr.bf16.mxu1 %v796_v13  ;;  %v820_v35 = vld [vmem:[%s997_s0 + $0xc] ss:$16 sps:$4 sm:$0xff]   ;;  %354 = vmatprep.mubr.bf16.mxu0 %v817_v33  ;;  %v821_v36 = vld [vmem:[%s997_s0 + $0x24] ss:$16 sps:$4 sm:$0xff]   ;;  %v825_v38 = vld [vmem:[%s997_s0 + $0x20] ss:$16 sps:$4 sm:$0xff]  }
   0xf   :  { %403 = vmatprep.mubr.bf16.mxu1 %v820_v35  ;;  %v823_v37 = vld [vmem:[%s997_s0 + $0x2c] ss:$16 sps:$4 sm:$0xff]   ;;  %v826_v39 = vld [vmem:[%s997_s0 + $0x28] ss:$16 sps:$4 sm:$0xff]  }
  0x10   :  { %686 = vmatpush3.bf16.msra.mxu0 %v797_v14  ;;  %v832_v14 = vmov 1.0  }
  0x11   :  { %714 = vmatpush3.bf16.msra.mxu1 %v798_v15  ;;  %687 = vmatprep.subr.bf16.mxu0 %v799_v16 }
  0x12   :  { %715 = vmatprep.subr.bf16.mxu1 %v800_v17 }
  0x14   :  { %688 = vmatpush3.bf16.msra.mxu0 %v801_v18 }
  0x15   :  { %716 = vmatpush3.bf16.msra.mxu1 %v802_v19  ;;  %689 = vmatprep.subr.bf16.mxu0 %v803_v20 }
  0x16   :  { %717 = vmatprep.subr.bf16.mxu1 %v804_v21 }
  0x18   :  { %690 = vmatpush3.bf16.msra.mxu0 %v805_v22 }
  0x19   :  { %718 = vmatpush3.bf16.msra.mxu1 %v806_v23  ;;  %691 = vmatprep.subr.bf16.mxu0 %v807_v24  ;;  %v581_v24 = vlaneseq }
  0x1a   :  { %719 = vmatprep.subr.bf16.mxu1 %v808_v25 }
  0x1b   :  { %v582_v25 = vshrl.u32 %v581_v24, 7 }
  0x1c   :  { %692 = vmatpush3.bf16.msra.mxu0 %v809_v26  ;;  %v573_v26 = vld [vmem:[%s998_s2] sm:$0x1] }
  0x1d   :  { %720 = vmatpush3.bf16.msra.mxu1 %v810_v27  ;;  %693 = vmatprep.subr.bf16.mxu0 %v811_v28  ;;  %v583_v27 = vsub.s32 0, %v582_v25 }
  0x1e   :  { %721 = vmatprep.subr.bf16.mxu1 %v812_v29 }
  0x20   :  { %694 = vmatpush3.bf16.msra.mxu0 %v813_v30  ;;  %v577_v30 = vld [vmem:[%s999_s3] sm:$0x1] }
  0x21   :  { %722 = vmatpush3.bf16.msra.mxu1 %v814_v31  ;;  %767 = vmatprep.subr.bf16.mxu0 %v829_v40 }
  0x22   :  { %773 = vmatprep.subr.bf16.mxu1 %v829_v40 }
  0x23   :  { %355 = vmatmul.mubr.bf16.vlgmr.msra.gmra.mrb[0].mxu0 %v815_v32 }
  0x24   :  { %404 = vmatmul.mubr.bf16.vlgmr.msra.gmra.mrb[0].mxu1 %v818_v34  ;;  %362 = vmatprep.mubr.bf16.mxu0 %v821_v36 }
  0x25   :  { %411 = vmatprep.mubr.bf16.mxu1 %v823_v37 }
  0x2b   :  { %363 = vmatmul.mubr.bf16.gmra.mrb[4].mxu0 %v825_v38 }
  0x2c   :  { %412 = vmatmul.mubr.bf16.gmra.mrb[4].mxu1 %v826_v39  ;;  %753 = vmatprep.mubr.msk.f32.mxu0 %vm830_vm0, %v831_v41 }
  0x2d   :  { %764 = vmatprep.mubr.msk.f32.mxu1 %vm830_vm0, %v831_v41 }
  0xf6   :  { %v695_v42 = vpop.f32.mrb[0].mxu0 }
  0xf7   :  { %v723_v43 = vpop.f32.mrb[0].mxu1  ;;  %v696_v44 = vpop.f32.mrb[1].mxu0 }
  0xf8   :  { %v697_v45 = vadd.f32 %v696_v44, %v695_v42  ;;  %v724_v46 = vpop.f32.mrb[1].mxu1  ;;  %v698_v47 = vpop.f32.mrb[2].mxu0 }
  0xf9   :  { %v725_v48 = vadd.f32 %v724_v46, %v723_v43  ;;  %v726_v49 = vpop.f32.mrb[2].mxu1  ;;  %v699_v50 = vpop.f32.mrb[3].mxu0 }
  0xfa   :  { %v700_v51 = vadd.f32 %v699_v50, %v698_v47  ;;  %v727_v52 = vpop.f32.mrb[3].mxu1 }
  0xfb   :  { %v406_v53 = vadd.f32 %v725_v48, %v697_v45  ;;  %v728_v54 = vadd.f32 %v727_v52, %v726_v49 }
  0xfd   :  { %v409_v55 = vadd.f32 %v728_v54, %v700_v51  ;;  %v494_v57 = vmul.f32 %v406_v53, %v406_v53 }
  0xfe   :  { %v701_v56 = vpop.f32.mrb[4].mxu0 }
  0xff   :  { %v768_v58 = vpack.c.bf16 %v409_v55, %v406_v53  ;;  %v495_v59 = vmul.f32 %v409_v55, %v409_v55  ;;  %v729_v60 = vpop.f32.mrb[4].mxu1  ;;  %v702_v61 = vpop.f32.mrb[5].mxu0 }
 0x100   :  { %v703_v62 = vadd.f32 %v702_v61, %v701_v56  ;;  %v730_v63 = vpop.f32.mrb[5].mxu1  ;;  %v704_v0 = vpop.f32.mrb[6].mxu0 }
 0x101   :  { %v731_v1 = vadd.f32 %v730_v63, %v729_v60  ;;  %v732_v2 = vpop.f32.mrb[6].mxu1  ;;  %769 = vmatpush3.bf16.msra.mxu0 %v768_v58  ;;  %v705_v3 = vpop.f32.mrb[7].mxu0  ;;  %v774_v4 = vpack.c.bf16 %v495_v59, %v494_v57 }
 0x102   :  { %v706_v5 = vadd.f32 %v705_v3, %v704_v0  ;;  %v733_v6 = vpop.f32.mrb[7].mxu1  ;;  %770 = vmatprep.subr.bf16.mxu0 %v829_v40 }
 0x103   :  { %v414_v7 = vadd.f32 %v731_v1, %v703_v62  ;;  %v734_v8 = vadd.f32 %v733_v6, %v732_v2  ;;  %775 = vmatpush3.bf16.msra.mxu1 %v774_v4 }
 0x104   :  { %776 = vmatprep.subr.bf16.mxu1 %v829_v40 }
 0x105   :  { %v417_v9 = vadd.f32 %v734_v8, %v706_v5  ;;  %v496_v10 = vmul.f32 %v414_v7, %v414_v7 }
 0x107   :  { %v771_v11 = vpack.c.bf16 %v417_v9, %v414_v7  ;;  %v497_v12 = vmul.f32 %v417_v9, %v417_v9 }
 0x109   :  { %772 = vmatpush3.bf16.msra.mxu0 %v771_v11  ;;  %v777_v13 = vpack.c.bf16 %v497_v12, %v496_v10 }
 0x10b   :  { %778 = vmatpush3.bf16.msra.mxu1 %v777_v13 }
 0x10c   :  { %754 = vmatmul.mubr.msk.f32.vlgmr.msra.gmra.mrb[8].mxu0 %vm420_vm1, %v832_v14 }
 0x10e   :  { %765 = vmatmul.mubr.msk.f32.vlgmr.msra.gmra.mrb[8].mxu1 %vm420_vm1, %v832_v14 }
 0x1df   :  { %v490_v15 = vpop.f32.mrb[8].mxu0 }
 0x1e0   :  { %v569_v16 = vmul.f32 0.03125, %v490_v15  ;;  %v755_v17 = vpop.f32.mrb[9].mxu0 }
 0x1e1   :  { %v564_v18 = vpop.f32.mrb[8].mxu1 }
 0x1e2   :  { %v571_v19 = vmul.f32 %v569_v16, %v569_v16  ;;  %v570_v20 = vmul.f32 0.03125, %v564_v18  ;;  %v766_v21 = vpop.f32.mrb[9].mxu1 }
 0x1e4   :  { %v572_v22 = vsub.f32 %v570_v20, %v571_v19 }
 0x1e6   :  { %v574_v23 = vadd.f32 1e-05, %v572_v22 }
 0x1e8   :  { %827 = vrsqrt.f32 %v574_v23 }
 0x1f2   :  { %v828_v28 = vpop.eup %827 }
 0x1f3   :  { %v576_v29 = vmul.f32 %v828_v28, %v573_v26 }
 0x1f5   :  { %v578_v31 = vmul.f32 %v576_v29, %v569_v16  ;;  %v584_v32 = vrot.slane %v576_v29, %v583_v27 }
 0x1f7   :  { %v579_v33 = vsub.f32 %v577_v30, %v578_v31  ;;  %v586_v34 = vmul.f32 %v584_v32, %v406_v53  ;;  %v587_v35 = vmul.f32 %v584_v32, %v409_v55  ;;  %v588_v36 = vmul.f32 %v584_v32, %v414_v7 }
 0x1f8   :  { %v589_v37 = vmul.f32 %v584_v32, %v417_v9 }
 0x1f9   :  { %v594_v38 = vrot.slane %v579_v33, %v583_v27 }
 0x1fb   :  { %v596_v39 = vadd.f32 %v594_v38, %v586_v34  ;;  %v597_v40 = vadd.f32 %v594_v38, %v587_v35  ;;  %v598_v41 = vadd.f32 %v594_v38, %v588_v36  ;;  %v599_v42 = vadd.f32 %v594_v38, %v589_v37 }
 0x1fd   :  { %v600_v43 = vmax.f32 %v596_v39, 0.0  ;;  %v601_v44 = vmax.f32 %v597_v40, 0.0  ;;  %v602_v45 = vmax.f32 %v598_v41, 0.0  ;;  %v603_v46 = vmax.f32 %v599_v42, 0.0 }
 0x1ff   :  { %v675_v47 = vpack.c.bf16 %v600_v43, %v600_v43  ;;  %v676_v48 = vpack.c.bf16 %v601_v44, %v601_v44  ;;  %v677_v49 = vpack.c.bf16 %v602_v45, %v602_v45  ;;  %v678_v50 = vpack.c.bf16 %v603_v46, %v603_v46 }
 0x201   :  { %621 = vst.msk [vmem:[%s1000_s4] sm:$0xf] %vm620_vm2, %v675_v47  ;;  %622 = vst.msk [vmem:[%s1000_s4 + $0x4] sm:$0xf] %vm620_vm2, %v676_v48 }
 0x202   :  { %623 = vst.msk [vmem:[%s1000_s4 + $0x8] sm:$0xf] %vm620_vm2, %v677_v49  ;;  %624 = vst.msk [vmem:[%s1000_s4 + $0xc] sm:$0xf] %vm620_vm2, %v678_v50 }

// kernel: vqvae_forward.18
= control target key start
LH: loop header
LB: loop body
LE: loop exit
PB: predicated region body
PF: predicated region fallthrough
CT: control target
= control target key end

     0   :  { %v534_v1 = vmov 0.0   ;;  %vm535_vm0 = vmmov 0   ;;  %vm174_vm1 = vcmask 261120   ;;  %vm258_vm2 = vcmask 64512   ;;  %s641_s1 = inlined_call_operand.vmem [shape: bf16[288,32], index: 1, kind: input, shape index: {}]   ;;  %s642_s0 = inlined_call_operand.vmem [shape: bf16[8,288], index: 0, kind: input, shape index: {}]   ;;  %s643_s2 = inlined_call_operand.vmem [shape: f32[1,32], index: 2, kind: input, shape index: {}]   ;;  %s644_s3 = inlined_call_operand.vmem [shape: f32[1,32], index: 3, kind: input, shape index: {}]   ;;  %s645_s4 = inlined_call_operand.vmem [shape: bf16[8,32], index: 4, kind: output, shape index: {}]  }
   0x1   :  { %v511_v0 = vld [vmem:[%s641_s1 + $0x40] sm:$0xff]   ;;  %490 = vmatprep.subr.bf16.mxu1 %v534_v1  ;;  %494 = vmatprep.mubr.msk.bf16.mxu1 %vm535_vm0, %v534_v1  ;;  %v513_v3 = vld [vmem:[%s641_s1 + $0x48] sm:$0xff]   ;;  %v515_v5 = vld [vmem:[%s641_s1 + $0x50] sm:$0xff]   ;;  %v536_v34 = vmov 1.0   ;;  %v416_v44 = vlaneseq  ;;  %vm431_vm3 = vcmask 257024  }
   0x2   :  { %v512_v2 = vld [vmem:[%s641_s1] sm:$0xff]   ;;  %461 = vmatprep.subr.bf16.mxu0 %v511_v0  ;;  %v514_v4 = vld [vmem:[%s641_s1 + $0x8] sm:$0xff]   ;;  %v516_v6 = vld [vmem:[%s641_s1 + $0x10] sm:$0xff]  }
   0x3   :  { %462 = vmatpush3.bf16.msra.mxu0 %v512_v2  ;;  %v517_v7 = vld [vmem:[%s641_s1 + $0x58] sm:$0xff]   ;;  %v519_v9 = vld [vmem:[%s641_s1 + $0x60] sm:$0xff]   ;;  %v521_v12 = vld [vmem:[%s641_s1 + $0x68] sm:$0xff]   ;;  %v417_v45 = vshrl.u32 %v416_v44, 7 }
   0x4   :  { %463 = vmatprep.subr.bf16.mxu0 %v513_v3  ;;  %v518_v8 = vld [vmem:[%s641_s1 + $0x18] sm:$0xff]   ;;  %v525_v10 = vld [vmem:[%s641_s1 + $0x80] sm:$0xff]   ;;  %v528_v13 = vld [vmem:[%s641_s1 + $0x88] sm:$0xff]  }
   0x5   :  { %v520_v11 = vld [vmem:[%s641_s1 + $0x20] sm:$0xff]   ;;  %491 = vmatpush3.bf16.msra.mxu1 %v525_v10  ;;  %v522_v15 = vld [vmem:[%s641_s1 + $0x28] sm:$0xff]   ;;  %v523_v18 = vld [vmem:[%s641_s1 + $0x70] sm:$0xff]   ;;  %v418_v47 = vsub.s32 0, %v417_v45 }
   0x6   :  { %492 = vmatprep.subr.bf16.mxu1 %v534_v1  ;;  %v18_v14 = vld [vmem:[%s642_s0] sm:$0xff]  ;;  %v531_v17 = vld [vmem:[%s642_s0 + $0x8] ss:$0 sps:$4 sm:$0xff]   ;;  %v524_v19 = vld [vmem:[%s641_s1 + $0x30] sm:$0xff]  }
   0x7   :  { %464 = vmatpush3.bf16.msra.mxu0 %v514_v4  ;;  %v438_v16 = vcombine.high %v18_v14, %v18_v14  ;;  %v526_v20 = vld [vmem:[%s641_s1 + $0x78] sm:$0xff]   ;;  %v437_v22 = vcombine.low %v18_v14, %v18_v14  ;;  %v408_v46 = vld [vmem:[%s643_s2] sm:$0x1] }
   0x8   :  { %465 = vmatprep.subr.bf16.mxu0 %v515_v5  ;;  %v527_v21 = vld [vmem:[%s641_s1 + $0x38] sm:$0xff]   ;;  %v412_v50 = vld [vmem:[%s644_s3] sm:$0x1] }
   0x9   :  { %493 = vmatpush3.bf16.msra.mxu1 %v528_v13  ;;  %210 = vmatprep.mubr.bf16.mxu0 %v438_v16 }
   0xa   :  { %498 = vmatprep.subr.mxu1 %v534_v1 }
   0xb   :  { %466 = vmatpush3.bf16.msra.mxu0 %v516_v6 }
   0xc   :  { %467 = vmatprep.subr.bf16.mxu0 %v517_v7  ;;  %495 = vmatmul.mubr.msk.bf16.vlgmr.msra.gmra.mrb[0].mxu1 %vm174_vm1, %v531_v17 }
   0xd   :  { %500 = vmatprep.mubr.msk.f32.mxu1 %vm535_vm0, %v534_v1 }
   0xf   :  { %468 = vmatpush3.bf16.msra.mxu0 %v518_v8 }
  0x10   :  { %469 = vmatprep.subr.bf16.mxu0 %v519_v9 }
  0x13   :  { %470 = vmatpush3.bf16.msra.mxu0 %v520_v11 }
  0x14   :  { %471 = vmatprep.subr.bf16.mxu0 %v521_v12 }
  0x17   :  { %472 = vmatpush3.bf16.msra.mxu0 %v522_v15 }
  0x18   :  { %473 = vmatprep.subr.bf16.mxu0 %v523_v18 }
  0x1b   :  { %474 = vmatpush3.bf16.msra.mxu0 %v524_v19 }
  0x1c   :  { %475 = vmatprep.subr.bf16.mxu0 %v526_v20 }
  0x1f   :  { %476 = vmatpush3.bf16.msra.mxu0 %v527_v21 }
  0x22   :  { %211 = vmatmul.mubr.bf16.vlgmr.msra.gmra.mrb[0].mxu0 %v437_v22 }
  0xdf   :  { %v252_v23 = vpop.f32.mrb[0].mxu1 }
  0xe0   :  { %v496_v24 = vpop.f32.mrb[1].mxu1 }
  0xe1   :  { %v255_v25 = vpop.f32.mrb[2].mxu1 }
  0xe2   :  { %v497_v26 = vpop.f32.mrb[3].mxu1 }
  0xf5   :  { %v477_v27 = vpop.f32.mrb[0].mxu0 }
  0xf6   :  { %v478_v28 = vpop.f32.mrb[1].mxu0 }
  0xf7   :  { %v479_v29 = vadd.f32 %v478_v28, %v477_v27  ;;  %v480_v30 = vpop.f32.mrb[2].mxu0 }
  0xf8   :  { %v481_v31 = vpop.f32.mrb[3].mxu0 }
  0xf9   :  { %v253_v32 = vadd.f32 %v479_v29, %v252_v23 }
  0xfb   :  { %v332_v33 = vmul.f32 %v253_v32, %v253_v32  ;;  %499 = vmatpush3.msra.mxu1 %v253_v32 }
  0xfc   :  { %501 = vmatmul.mubr.msk.f32.vlgmr.msra.gmra.mrb[4].mxu1 %vm258_vm2, %v536_v34  ;;  %503 = vmatprep.subr.mxu1 %v534_v1 }
  0xfd   :  { %504 = vmatpush3.msra.mxu1 %v332_v33  ;;  %505 = vmatprep.mubr.msk.f32.mxu1 %vm535_vm0, %v534_v1 }
 0x100   :  { %506 = vmatmul.mubr.msk.f32.vlgmr.msra.gmra.mrb[6].mxu1 %vm258_vm2, %v536_v34 }
 0x1cf   :  { %v328_v35 = vpop.f32.mrb[4].mxu1 }
 0x1d0   :  { %v404_v36 = vmul.f32 0.125, %v328_v35  ;;  %v502_v37 = vpop.f32.mrb[5].mxu1 }
 0x1d2   :  { %v406_v39 = vmul.f32 %v404_v36, %v404_v36 }
 0x1d3   :  { %v399_v38 = vpop.f32.mrb[6].mxu1 }
 0x1d4   :  { %v405_v40 = vmul.f32 0.125, %v399_v38  ;;  %v507_v41 = vpop.f32.mrb[7].mxu1 }
 0x1d6   :  { %v407_v42 = vsub.f32 %v405_v40, %v406_v39 }
 0x1d8   :  { %v409_v43 = vadd.f32 1e-05, %v407_v42 }
 0x1da   :  { %532 = vrsqrt.f32 %v409_v43 }
 0x1e4   :  { %v533_v48 = vpop.eup %532 }
 0x1e5   :  { %v411_v49 = vmul.f32 %v533_v48, %v408_v46 }
 0x1e7   :  { %v413_v51 = vmul.f32 %v411_v49, %v404_v36  ;;  %v419_v52 = vrot.slane %v411_v49, %v418_v47 }
 0x1e9   :  { %v414_v53 = vsub.f32 %v412_v50, %v413_v51  ;;  %v421_v54 = vmul.f32 %v419_v52, %v253_v32 }
 0x1eb   :  { %v426_v55 = vrot.slane %v414_v53, %v418_v47 }
 0x1ed   :  { %v428_v56 = vadd.f32 %v426_v55, %v421_v54 }
 0x1ef   :  { %v429_v57 = vmax.f32 %v428_v56, 0.0 }
 0x1f1   :  { %v430_v58 = vpack.c.bf16 %v429_v57, %v429_v57 }
 0x1f3   :  { %432 = vst.msk [vmem:[%s645_s4] sm:$0xf] %vm431_vm3, %v430_v58 }

// kernel: vqvae_forward.17
= control target key start
LH: loop header
LB: loop body
LE: loop exit
PB: predicated region body
PF: predicated region fallthrough
CT: control target
= control target key end

     0   :  { %v694_v38 = vmov 0.0   ;;  %vm695_vm0 = vmmov 0   ;;  %vm372_vm1 = vcmask 261120   ;;  %vm374_vm2 = vcmask 64512   ;;  %s841_s1 = inlined_call_operand.vmem [shape: bf16[512,32], index: 1, kind: input, shape index: {}]   ;;  %s842_s0 = inlined_call_operand.vmem [shape: bf16[8,512], index: 0, kind: input, shape index: {}]   ;;  %s843_s4 = inlined_call_operand.vmem [shape: f32[8,32], index: 4, kind: output, shape index: {0}]   ;;  %s844_s2 = inlined_call_operand.vmem [shape: f32[1,32], index: 2, kind: input, shape index: {}]   ;;  %s845_s3 = inlined_call_operand.vmem [shape: f32[1,32], index: 3, kind: input, shape index: {}]   ;;  %s846_s5 = inlined_call_operand.vmem [shape: bf16[8,32], index: 5, kind: output, shape index: {1}]  }
   0x1   :  { %v656_v0 = vld [vmem:[%s841_s1 + $0x40] sm:$0xff]   ;;  %v660_v4 = vld [vmem:[%s841_s1 + $0x48] sm:$0xff]   ;;  %v664_v8 = vld [vmem:[%s841_s1 + $0x50] sm:$0xff]   ;;  %v696_v51 = vmov 1.0   ;;  %v532_v61 = vlaneseq  ;;  %vm547_vm3 = vcmask 257024  }
   0x2   :  { %v657_v1 = vld [vmem:[%s841_s1 + $0xc0] sm:$0xff]   ;;  %595 = vmatprep.subr.bf16.mxu0 %v656_v0  ;;  %v661_v5 = vld [vmem:[%s841_s1 + $0xc8] sm:$0xff]   ;;  %v665_v9 = vld [vmem:[%s841_s1 + $0xd0] sm:$0xff]  }
   0x3   :  { %v658_v2 = vld [vmem:[%s841_s1] sm:$0xff]   ;;  %617 = vmatprep.subr.bf16.mxu1 %v657_v1  ;;  %v662_v6 = vld [vmem:[%s841_s1 + $0x8] sm:$0xff]   ;;  %v666_v10 = vld [vmem:[%s841_s1 + $0x10] sm:$0xff]   ;;  %v533_v62 = vshrl.u32 %v532_v61, 7 }
   0x4   :  { %v659_v3 = vld [vmem:[%s841_s1 + $0x80] sm:$0xff]   ;;  %596 = vmatpush3.bf16.msra.mxu0 %v658_v2  ;;  %v663_v7 = vld [vmem:[%s841_s1 + $0x88] sm:$0xff]   ;;  %v667_v11 = vld [vmem:[%s841_s1 + $0x90] sm:$0xff]  }
   0x5   :  { %618 = vmatpush3.bf16.msra.mxu1 %v659_v3  ;;  %597 = vmatprep.subr.bf16.mxu0 %v660_v4  ;;  %v668_v12 = vld [vmem:[%s841_s1 + $0x58] sm:$0xff]   ;;  %v672_v16 = vld [vmem:[%s841_s1 + $0x60] sm:$0xff]   ;;  %v676_v20 = vld [vmem:[%s841_s1 + $0x68] sm:$0xff]   ;;  %v534_v0 = vsub.s32 0, %v533_v62 }
   0x6   :  { %619 = vmatprep.subr.bf16.mxu1 %v661_v5  ;;  %v669_v13 = vld [vmem:[%s841_s1 + $0xd8] sm:$0xff]   ;;  %v673_v17 = vld [vmem:[%s841_s1 + $0xe0] sm:$0xff]   ;;  %v677_v21 = vld [vmem:[%s841_s1 + $0xe8] sm:$0xff]  }
   0x7   :  { %v670_v14 = vld [vmem:[%s841_s1 + $0x18] sm:$0xff]   ;;  %v674_v18 = vld [vmem:[%s841_s1 + $0x20] sm:$0xff]   ;;  %v678_v22 = vld [vmem:[%s841_s1 + $0x28] sm:$0xff]  }
   0x8   :  { %598 = vmatpush3.bf16.msra.mxu0 %v662_v6  ;;  %v671_v15 = vld [vmem:[%s841_s1 + $0x98] sm:$0xff]   ;;  %v675_v19 = vld [vmem:[%s841_s1 + $0xa0] sm:$0xff]   ;;  %v679_v23 = vld [vmem:[%s841_s1 + $0xa8] sm:$0xff]  }
   0x9   :  { %620 = vmatpush3.bf16.msra.mxu1 %v663_v7  ;;  %599 = vmatprep.subr.bf16.mxu0 %v664_v8  ;;  %v680_v24 = vld [vmem:[%s841_s1 + $0x70] sm:$0xff]   ;;  %v684_v28 = vld [vmem:[%s841_s1 + $0x78] sm:$0xff]   ;;  %v20_v32 = vld [vmem:[%s842_s0] sm:$0xff] }
   0xa   :  { %621 = vmatprep.subr.bf16.mxu1 %v665_v9  ;;  %v681_v25 = vld [vmem:[%s841_s1 + $0xf0] sm:$0xff]   ;;  %v685_v29 = vld [vmem:[%s841_s1 + $0xf8] sm:$0xff]   ;;  %v21_v33 = vld [vmem:[%s842_s0 + $0x8] sm:$0xff]  ;;  %v557_v34 = vcombine.low %v20_v32, %v20_v32  ;;  %v558_v35 = vcombine.high %v20_v32, %v20_v32 }
   0xb   :  { %v682_v26 = vld [vmem:[%s841_s1 + $0x30] sm:$0xff]   ;;  %v686_v30 = vld [vmem:[%s841_s1 + $0x38] sm:$0xff]   ;;  %v559_v36 = vcombine.low %v21_v33, %v21_v33  ;;  %v560_v37 = vcombine.high %v21_v33, %v21_v33  ;;  %v524_v63 = vld [vmem:[%s844_s2] sm:$0x1] }
   0xc   :  { %600 = vmatpush3.bf16.msra.mxu0 %v666_v10  ;;  %v683_v27 = vld [vmem:[%s841_s1 + $0xb0] sm:$0xff]   ;;  %v687_v31 = vld [vmem:[%s841_s1 + $0xb8] sm:$0xff]   ;;  %324 = vmatprep.mubr.bf16.mxu0 %v558_v35  ;;  %v528_v3 = vld [vmem:[%s845_s3] sm:$0x1] }
   0xd   :  { %622 = vmatpush3.bf16.msra.mxu1 %v667_v11  ;;  %601 = vmatprep.subr.bf16.mxu0 %v668_v12 }
   0xe   :  { %623 = vmatprep.subr.bf16.mxu1 %v669_v13  ;;  %364 = vmatprep.mubr.bf16.mxu1 %v560_v37 }
  0x10   :  { %602 = vmatpush3.bf16.msra.mxu0 %v670_v14 }
  0x11   :  { %624 = vmatpush3.bf16.msra.mxu1 %v671_v15  ;;  %603 = vmatprep.subr.bf16.mxu0 %v672_v16 }
  0x12   :  { %625 = vmatprep.subr.bf16.mxu1 %v673_v17 }
  0x14   :  { %604 = vmatpush3.bf16.msra.mxu0 %v674_v18 }
  0x15   :  { %626 = vmatpush3.bf16.msra.mxu1 %v675_v19  ;;  %605 = vmatprep.subr.bf16.mxu0 %v676_v20 }
  0x16   :  { %627 = vmatprep.subr.bf16.mxu1 %v677_v21 }
  0x18   :  { %606 = vmatpush3.bf16.msra.mxu0 %v678_v22 }
  0x19   :  { %628 = vmatpush3.bf16.msra.mxu1 %v679_v23  ;;  %607 = vmatprep.subr.bf16.mxu0 %v680_v24 }
  0x1a   :  { %629 = vmatprep.subr.bf16.mxu1 %v681_v25 }
  0x1c   :  { %608 = vmatpush3.bf16.msra.mxu0 %v682_v26 }
  0x1d   :  { %630 = vmatpush3.bf16.msra.mxu1 %v683_v27  ;;  %609 = vmatprep.subr.bf16.mxu0 %v684_v28 }
  0x1e   :  { %631 = vmatprep.subr.bf16.mxu1 %v685_v29 }
  0x20   :  { %610 = vmatpush3.bf16.msra.mxu0 %v686_v30 }
  0x21   :  { %632 = vmatpush3.bf16.msra.mxu1 %v687_v31  ;;  %643 = vmatprep.subr.mxu0 %v694_v38 }
  0x22   :  { %648 = vmatprep.subr.mxu1 %v694_v38 }
  0x23   :  { %325 = vmatmul.mubr.bf16.vlgmr.msra.gmra.mrb[0].mxu0 %v557_v34 }
  0x24   :  { %365 = vmatmul.mubr.bf16.vlgmr.msra.gmra.mrb[0].mxu1 %v559_v36  ;;  %645 = vmatprep.mubr.msk.f32.mxu0 %vm695_vm0, %v694_v38 }
  0x25   :  { %650 = vmatprep.mubr.msk.f32.mxu1 %vm695_vm0, %v694_v38 }
  0xf6   :  { %v611_v39 = vpop.f32.mrb[0].mxu0 }
  0xf7   :  { %v633_v40 = vpop.f32.mrb[0].mxu1  ;;  %v612_v41 = vpop.f32.mrb[1].mxu0 }
  0xf8   :  { %v634_v42 = vpop.f32.mrb[1].mxu1  ;;  %v613_v43 = vadd.f32 %v612_v41, %v611_v39  ;;  %v614_v45 = vpop.f32.mrb[2].mxu0 }
  0xf9   :  { %v635_v44 = vadd.f32 %v634_v42, %v633_v40  ;;  %v636_v46 = vpop.f32.mrb[2].mxu1  ;;  %v615_v47 = vpop.f32.mrb[3].mxu0 }
  0xfa   :  { %v637_v48 = vpop.f32.mrb[3].mxu1 }
  0xfb   :  { %v367_v49 = vadd.f32 %v635_v44, %v613_v43 }
  0xfd   :  { %373 = vst.msk [vmem:[%s843_s4] sm:$0xff] %vm372_vm1, %v367_v49  ;;  %644 = vmatpush3.msra.mxu0 %v367_v49  ;;  %v448_v50 = vmul.f32 %v367_v49, %v367_v49 }
  0xfe   :  { %646 = vmatmul.mubr.msk.f32.vlgmr.msra.gmra.mrb[4].mxu0 %vm374_vm2, %v696_v51 }
  0xff   :  { %649 = vmatpush3.msra.mxu1 %v448_v50 }
 0x100   :  { %651 = vmatmul.mubr.msk.f32.vlgmr.msra.gmra.mrb[4].mxu1 %vm374_vm2, %v696_v51 }
 0x1d1   :  { %v444_v52 = vpop.f32.mrb[4].mxu0 }
 0x1d2   :  { %v520_v53 = vmul.f32 0.125, %v444_v52  ;;  %v647_v54 = vpop.f32.mrb[5].mxu0 }
 0x1d3   :  { %v515_v55 = vpop.f32.mrb[4].mxu1 }
 0x1d4   :  { %v522_v56 = vmul.f32 %v520_v53, %v520_v53  ;;  %v521_v57 = vmul.f32 0.125, %v515_v55  ;;  %v652_v58 = vpop.f32.mrb[5].mxu1 }
 0x1d6   :  { %v523_v59 = vsub.f32 %v521_v57, %v522_v56 }
 0x1d8   :  { %v525_v60 = vadd.f32 1e-05, %v523_v59 }
 0x1da   :  { %692 = vrsqrt.f32 %v525_v60 }
 0x1e4   :  { %v693_v1 = vpop.eup %692 }
 0x1e5   :  { %v527_v2 = vmul.f32 %v693_v1, %v524_v63 }
 0x1e7   :  { %v529_v4 = vmul.f32 %v527_v2, %v520_v53  ;;  %v535_v5 = vrot.slane %v527_v2, %v534_v0 }
 0x1e9   :  { %v530_v6 = vsub.f32 %v528_v3, %v529_v4  ;;  %v537_v7 = vmul.f32 %v535_v5, %v367_v49 }
 0x1eb   :  { %v542_v8 = vrot.slane %v530_v6, %v534_v0 }
 0x1ed   :  { %v544_v9 = vadd.f32 %v542_v8, %v537_v7 }
 0x1ef   :  { %v545_v10 = vmax.f32 %v544_v9, 0.0 }
 0x1f1   :  { %v546_v11 = vpack.c.bf16 %v545_v10, %v545_v10 }
 0x1f3   :  { %548 = vst.msk [vmem:[%s846_s5] sm:$0xf] %vm547_vm3, %v546_v11 }

// kernel: vqvae_forward.21
= control target key start
LH: loop header
LB: loop body
LE: loop exit
PB: predicated region body
PF: predicated region fallthrough
CT: control target
= control target key end

     0   :  { %v100_v0 = vmov 0.0   ;;  %vm101_vm0 = vmmov 0   ;;  %vm33_vm1 = vcmask 261120   ;;  %s137_s1 = inlined_call_operand.vmem [shape: bf16[32,32], index: 1, kind: input, shape index: {}]   ;;  %s138_s0 = inlined_call_operand.vmem [shape: bf16[8,32], index: 0, kind: input, shape index: {}]   ;;  %s139_s2 = inlined_call_operand.vmem [shape: f32[8,32], index: 2, kind: input, shape index: {}]   ;;  %s140_s3 = inlined_call_operand.vmem [shape: f32[8,32], index: 3, kind: output, shape index: {}]  }
   0x1   :  { %88 = vmatprep.subr.bf16.mxu0 %v100_v0  ;;  %v98_v1 = vld [vmem:[%s137_s1] sm:$0xff]   ;;  %92 = vmatprep.mubr.msk.bf16.mxu0 %vm101_vm0, %v100_v0  ;;  %v99_v2 = vld [vmem:[%s137_s1 + $0x8] sm:$0xff]  }
   0x2   :  { %89 = vmatpush3.bf16.msra.mxu0 %v98_v1  ;;  %v15_v3 = vld [vmem:[%s138_s0] sm:$0xf] }
   0x3   :  { %90 = vmatprep.subr.bf16.mxu0 %v100_v0  ;;  %v20_v4 = vld [vmem:[%s139_s2] sm:$0xff] }
   0x6   :  { %91 = vmatpush3.bf16.msra.mxu0 %v99_v2 }
   0x9   :  { %93 = vmatmul.mubr.msk.bf16.vlgmr.msra.gmra.mrb[0].mxu0 %vm33_vm1, %v15_v3 }
  0xdc   :  { %v71_v5 = vpop.f32.mrb[0].mxu0 }
  0xdd   :  { %v72_v6 = vadd.f32 %v71_v5, %v20_v4  ;;  %v94_v7 = vpop.f32.mrb[1].mxu0 }
  0xde   :  { %v74_v8 = vpop.f32.mrb[2].mxu0 }
  0xdf   :  { %77 = vst.msk [vmem:[%s140_s3] sm:$0xff] %vm33_vm1, %v72_v6  ;;  %v95_v9 = vpop.f32.mrb[3].mxu0 }

// kernel: vqvae_forward.19
= control target key start
LH: loop header
LB: loop body
LE: loop exit
PB: predicated region body
PF: predicated region fallthrough
CT: control target
= control target key end

     0   :  { %v306_v0 = vmov 0.0   ;;  %vm307_vm0 = vmmov 0   ;;  %vm41_vm1 = vcmask 261120   ;;  %vm86_vm2 = vcmask 64512   ;;  %s371_s1 = inlined_call_operand.vmem [shape: bf16[32,32], index: 1, kind: input, shape index: {}]   ;;  %s372_s0 = inlined_call_operand.vmem [shape: bf16[8,32], index: 0, kind: input, shape index: {}]   ;;  %s373_s2 = inlined_call_operand.vmem [shape: f32[8,32], index: 2, kind: input, shape index: {}]   ;;  %s374_s5 = inlined_call_operand.vmem [shape: f32[8,32], index: 5, kind: output, shape index: {0}]   ;;  %s375_s3 = inlined_call_operand.vmem [shape: f32[1,32], index: 3, kind: input, shape index: {}]   ;;  %s376_s4 = inlined_call_operand.vmem [shape: f32[1,32], index: 4, kind: input, shape index: {}]   ;;  %s377_s6 = inlined_call_operand.vmem [shape: bf16[8,32], index: 6, kind: output, shape index: {1}]  }
   0x1   :  { %281 = vmatprep.subr.bf16.mxu0 %v306_v0  ;;  %v302_v1 = vld [vmem:[%s371_s1] sm:$0xff]   ;;  %285 = vmatprep.mubr.msk.bf16.mxu0 %vm307_vm0, %v306_v0  ;;  %v303_v2 = vld [vmem:[%s371_s1 + $0x8] sm:$0xff]   ;;  %v308_v11 = vmov 1.0   ;;  %v244_v21 = vlaneseq  ;;  %vm259_vm3 = vcmask 257024  }
   0x2   :  { %289 = vmatprep.subr.mxu1 %v306_v0  ;;  %291 = vmatprep.mubr.msk.f32.mxu1 %vm307_vm0, %v306_v0  ;;  %v23_v3 = vld [vmem:[%s372_s0] sm:$0xf] }
   0x3   :  { %282 = vmatpush3.bf16.msra.mxu0 %v302_v1  ;;  %v28_v4 = vld [vmem:[%s373_s2] sm:$0xff]  ;;  %v245_v22 = vshrl.u32 %v244_v21, 7 }
   0x4   :  { %283 = vmatprep.subr.bf16.mxu0 %v306_v0  ;;  %v236_v23 = vld [vmem:[%s375_s3] sm:$0x1] }
   0x5   :  { %v246_v24 = vsub.s32 0, %v245_v22  ;;  %v240_v27 = vld [vmem:[%s376_s4] sm:$0x1] }
   0x7   :  { %284 = vmatpush3.bf16.msra.mxu0 %v303_v2 }
   0xa   :  { %286 = vmatmul.mubr.msk.bf16.vlgmr.msra.gmra.mrb[0].mxu0 %vm41_vm1, %v23_v3 }
  0xdd   :  { %v79_v5 = vpop.f32.mrb[0].mxu0 }
  0xde   :  { %v80_v6 = vadd.f32 %v79_v5, %v28_v4  ;;  %v287_v7 = vpop.f32.mrb[1].mxu0 }
  0xdf   :  { %v82_v8 = vpop.f32.mrb[2].mxu0 }
  0xe0   :  { %85 = vst.msk [vmem:[%s374_s5] sm:$0xff] %vm41_vm1, %v80_v6  ;;  %v288_v9 = vpop.f32.mrb[3].mxu0  ;;  %290 = vmatpush3.msra.mxu1 %v80_v6  ;;  %v160_v10 = vmul.f32 %v80_v6, %v80_v6 }
  0xe1   :  { %292 = vmatmul.mubr.msk.f32.vlgmr.msra.gmra.mrb[0].mxu1 %vm86_vm2, %v308_v11  ;;  %294 = vmatprep.subr.mxu1 %v306_v0 }
  0xe2   :  { %295 = vmatpush3.msra.mxu1 %v160_v10  ;;  %296 = vmatprep.mubr.msk.f32.mxu1 %vm307_vm0, %v306_v0 }
  0xe5   :  { %297 = vmatmul.mubr.msk.f32.vlgmr.msra.gmra.mrb[2].mxu1 %vm86_vm2, %v308_v11 }
 0x1b4   :  { %v156_v12 = vpop.f32.mrb[0].mxu1 }
 0x1b5   :  { %v232_v13 = vmul.f32 0.125, %v156_v12  ;;  %v293_v14 = vpop.f32.mrb[1].mxu1 }
 0x1b7   :  { %v234_v16 = vmul.f32 %v232_v13, %v232_v13 }
 0x1b8   :  { %v227_v15 = vpop.f32.mrb[2].mxu1 }
 0x1b9   :  { %v233_v17 = vmul.f32 0.125, %v227_v15  ;;  %v298_v18 = vpop.f32.mrb[3].mxu1 }
 0x1bb   :  { %v235_v19 = vsub.f32 %v233_v17, %v234_v16 }
 0x1bd   :  { %v237_v20 = vadd.f32 1e-05, %v235_v19 }
 0x1bf   :  { %304 = vrsqrt.f32 %v237_v20 }
 0x1c9   :  { %v305_v25 = vpop.eup %304 }
 0x1ca   :  { %v239_v26 = vmul.f32 %v305_v25, %v236_v23 }
 0x1cc   :  { %v241_v28 = vmul.f32 %v239_v26, %v232_v13  ;;  %v247_v29 = vrot.slane %v239_v26, %v246_v24 }
 0x1ce   :  { %v242_v30 = vsub.f32 %v240_v27, %v241_v28  ;;  %v249_v31 = vmul.f32 %v247_v29, %v80_v6 }
 0x1d0   :  { %v254_v32 = vrot.slane %v242_v30, %v246_v24 }
 0x1d2   :  { %v256_v33 = vadd.f32 %v254_v32, %v249_v31 }
 0x1d4   :  { %v257_v34 = vmax.f32 %v256_v33, 0.0 }
 0x1d6   :  { %v258_v35 = vpack.c.bf16 %v257_v34, %v257_v34 }
 0x1d8   :  { %260 = vst.msk [vmem:[%s377_s6] sm:$0xf] %vm259_vm3, %v258_v35 }

// kernel: vqvae_forward.26
= control target key start
LH: loop header
LB: loop body
LE: loop exit
PB: predicated region body
PF: predicated region fallthrough
CT: control target
= control target key end

     0   :  { %v299_v0 = vmov 0.0   ;;  %vm300_vm0 = vmmov 0   ;;  %vm39_vm1 = vcmask 261120   ;;  %vm83_vm2 = vcmask 64512   ;;  %s356_s1 = inlined_call_operand.vmem [shape: bf16[32,32], index: 1, kind: input, shape index: {}]   ;;  %s357_s0 = inlined_call_operand.vmem [shape: bf16[8,32], index: 0, kind: input, shape index: {}]   ;;  %s358_s2 = inlined_call_operand.vmem [shape: f32[8,32], index: 2, kind: input, shape index: {}]   ;;  %s359_s3 = inlined_call_operand.vmem [shape: f32[1,32], index: 3, kind: input, shape index: {}]   ;;  %s360_s4 = inlined_call_operand.vmem [shape: f32[1,32], index: 4, kind: input, shape index: {}]   ;;  %s361_s5 = inlined_call_operand.vmem [shape: bf16[8,32], index: 5, kind: output, shape index: {}]  }
   0x1   :  { %274 = vmatprep.subr.bf16.mxu0 %v299_v0  ;;  %v295_v1 = vld [vmem:[%s356_s1] sm:$0xff]   ;;  %278 = vmatprep.mubr.msk.bf16.mxu0 %vm300_vm0, %v299_v0  ;;  %v296_v2 = vld [vmem:[%s356_s1 + $0x8] sm:$0xff]   ;;  %v301_v11 = vmov 1.0   ;;  %v241_v21 = vlaneseq  ;;  %vm256_vm3 = vcmask 257024  }
   0x2   :  { %282 = vmatprep.subr.mxu1 %v299_v0  ;;  %284 = vmatprep.mubr.msk.f32.mxu1 %vm300_vm0, %v299_v0  ;;  %v21_v3 = vld [vmem:[%s357_s0] sm:$0xf] }
   0x3   :  { %275 = vmatpush3.bf16.msra.mxu0 %v295_v1  ;;  %v26_v4 = vld [vmem:[%s358_s2] sm:$0xff]  ;;  %v242_v22 = vshrl.u32 %v241_v21, 7 }
   0x4   :  { %276 = vmatprep.subr.bf16.mxu0 %v299_v0  ;;  %v233_v23 = vld [vmem:[%s359_s3] sm:$0x1] }
   0x5   :  { %v243_v24 = vsub.s32 0, %v242_v22  ;;  %v237_v27 = vld [vmem:[%s360_s4] sm:$0x1] }
   0x7   :  { %277 = vmatpush3.bf16.msra.mxu0 %v296_v2 }
   0xa   :  { %279 = vmatmul.mubr.msk.bf16.vlgmr.msra.gmra.mrb[0].mxu0 %vm39_vm1, %v21_v3 }
  0xdd   :  { %v77_v5 = vpop.f32.mrb[0].mxu0 }
  0xde   :  { %v78_v6 = vadd.f32 %v77_v5, %v26_v4  ;;  %v280_v7 = vpop.f32.mrb[1].mxu0 }
  0xdf   :  { %v80_v8 = vpop.f32.mrb[2].mxu0 }
  0xe0   :  { %v157_v9 = vmul.f32 %v78_v6, %v78_v6  ;;  %v281_v10 = vpop.f32.mrb[3].mxu0  ;;  %283 = vmatpush3.msra.mxu1 %v78_v6 }
  0xe1   :  { %285 = vmatmul.mubr.msk.f32.vlgmr.msra.gmra.mrb[0].mxu1 %vm83_vm2, %v301_v11  ;;  %287 = vmatprep.subr.mxu1 %v299_v0 }
  0xe2   :  { %288 = vmatpush3.msra.mxu1 %v157_v9  ;;  %289 = vmatprep.mubr.msk.f32.mxu1 %vm300_vm0, %v299_v0 }
  0xe5   :  { %290 = vmatmul.mubr.msk.f32.vlgmr.msra.gmra.mrb[2].mxu1 %vm83_vm2, %v301_v11 }
 0x1b4   :  { %v153_v12 = vpop.f32.mrb[0].mxu1 }
 0x1b5   :  { %v229_v13 = vmul.f32 0.125, %v153_v12  ;;  %v286_v14 = vpop.f32.mrb[1].mxu1 }
 0x1b7   :  { %v231_v16 = vmul.f32 %v229_v13, %v229_v13 }
 0x1b8   :  { %v224_v15 = vpop.f32.mrb[2].mxu1 }
 0x1b9   :  { %v230_v17 = vmul.f32 0.125, %v224_v15  ;;  %v291_v18 = vpop.f32.mrb[3].mxu1 }
 0x1bb   :  { %v232_v19 = vsub.f32 %v230_v17, %v231_v16 }
 0x1bd   :  { %v234_v20 = vadd.f32 1e-05, %v232_v19 }
 0x1bf   :  { %297 = vrsqrt.f32 %v234_v20 }
 0x1c9   :  { %v298_v25 = vpop.eup %297 }
 0x1ca   :  { %v236_v26 = vmul.f32 %v298_v25, %v233_v23 }
 0x1cc   :  { %v238_v28 = vmul.f32 %v236_v26, %v229_v13  ;;  %v244_v29 = vrot.slane %v236_v26, %v243_v24 }
 0x1ce   :  { %v239_v30 = vsub.f32 %v237_v27, %v238_v28  ;;  %v246_v31 = vmul.f32 %v244_v29, %v78_v6 }
 0x1d0   :  { %v251_v32 = vrot.slane %v239_v30, %v243_v24 }
 0x1d2   :  { %v253_v33 = vadd.f32 %v251_v32, %v246_v31 }
 0x1d4   :  { %v254_v34 = vmax.f32 %v253_v33, 0.0 }
 0x1d6   :  { %v255_v35 = vpack.c.bf16 %v254_v34, %v254_v34 }
 0x1d8   :  { %257 = vst.msk [vmem:[%s361_s5] sm:$0xf] %vm256_vm3, %v255_v35 }

// kernel: vqvae_forward.22
= control target key start
LH: loop header
LB: loop body
LE: loop exit
PB: predicated region body
PF: predicated region fallthrough
CT: control target
= control target key end

     0   :  { %14 = vsyncpa [#allocation3], 0  ;;  %vm36_vm0 = vcmask 261120   ;;  %v738_v2 = vmov 0.0|0.0   ;;  %vm739_vm2 = vmmov 0   ;;  %v740_v7 = vmov 0.0   ;;  %s905_s0 = inlined_call_operand.vmem [shape: f32[8,32], index: 0, kind: input, shape index: {}]   ;;  %s906_s1 = inlined_call_operand.vmem [shape: f32[64,32], index: 1, kind: input, shape index: {}]   ;;  %s907_s2 = inlined_call_operand.vmem [shape: f32[1,64], index: 2, kind: input, shape index: {}]   ;;  %s908_s3 = inlined_call_operand.vmem [shape: f32[1,32], index: 3, kind: input, shape index: {}]   ;;  %s909_s4 = inlined_call_operand.vmem [shape: f32[1,32], index: 4, kind: input, shape index: {}]   ;;  %s910_s5 = inlined_call_operand.vmem [shape: f32[8,32], index: 5, kind: output, shape index: {0}]   ;;  %s911_s6 = inlined_call_operand.vmem [shape: bf16[8,32], index: 6, kind: output, shape index: {1}]   ;;  %s912_s7 = inlined_call_operand.hbm [shape: f32[1,1], index: 7, kind: output, shape index: {2}]   ;;  %s913_s8 = inlined_call_operand.hbm [shape: f32[1,1], index: 8, kind: output, shape index: {3}]  }
   0x1   :  { %v27_v0 = vld [vmem:[%s906_s1] sm:$0xff]  ;;  %v28_v1 = vld [vmem:[%s906_s1 + $0x8] sm:$0xff]  ;;  %650 = vmatprep.subr.bf16.mxu0 %v738_v2  ;;  %vm797_vm1 = vmpackc.low %vm36_vm0, %vm36_vm0  ;;  %666 = vmatprep.subr.bf16.mxu1 %v738_v2 }
   0x2   :  { %v651_v3 = vpack.c.bf16 %v28_v1, %v27_v0  ;;  %v29_v5 = vld [vmem:[%s906_s1 + $0x10] sm:$0xff]  ;;  %v30_v6 = vld [vmem:[%s906_s1 + $0x18] sm:$0xff]  ;;  %613 = vmatprep.mubr.msk.f32.mxu0 %vm739_vm2, %v740_v7  ;;  %632 = vmatprep.mubr.msk.f32.mxu1 %vm739_vm2, %v740_v7  ;;  %v816_v8 = vld [vmem:[%s905_s0] sm:$0xff] }
   0x4   :  { %653 = vmatpush3.bf16.xpose.msk.msra.mxu0 %vm797_vm1, %v651_v3  ;;  %668 = vmatpush3.bf16.msra.mxu1 %v651_v3 }
   0x5   :  { %15 = vsyncpa [#allocation5], 0  ;;  %654 = vmatprep.subr.bf16.mxu0 %v738_v2  ;;  %v35_v9 = vmul.f32 %v816_v8, %v816_v8  ;;  %669 = vmatprep.subr.bf16.mxu1 %v738_v2  ;;  %v655_v10 = vpack.c.bf16 %v30_v6, %v29_v5  ;;  %v31_v11 = vld [vmem:[%s906_s1 + $0x20] sm:$0xff]  ;;  %v32_v12 = vld [vmem:[%s906_s1 + $0x28] sm:$0xff]  ;;  %vm147_vm3 = vcmask 523264   ;;  %v151_v26 = vlaneseq  ;;  %s742_s28 = smov [#allocation2]  }
   0x6   :  { %v659_v14 = vpack.c.bf16 %v32_v12, %v31_v11  ;;  %v33_v15 = vld [vmem:[%s906_s1 + $0x30] sm:$0xff]  ;;  %v34_v16 = vld [vmem:[%s906_s1 + $0x38] sm:$0xff]  ;;  %v566_v18 = vld [vmem:[%s907_s2] ss:$0 sm:$0xff]  ;;  %vm247_vm7 = vcmask 64512   ;;  %v741_v47 = vmov 1.0  }
   0x7   :  { %v37_v13 = vsel %vm36_vm0, %v35_v9, 0.0  ;;  %v663_v17 = vpack.c.bf16 %v34_v16, %v33_v15  ;;  %v152_v27 = vand.u32 127, %v151_v26  ;;  %vm436_vm8 = vcmask 0   ;;  %v397_v9 = vld [vmem:[%s908_s3] sm:$0x1] }
   0x8   :  { %38 = vadd.xlane.f32.xlu0 %v37_v13  ;;  %671 = vmatpush3.bf16.msra.mxu1 %v655_v10  ;;  %vm513_vm9 = vcmask 516096   ;;  %vm420_vm10 = vcmask 257024  }
   0x9   :  { %672 = vmatprep.subr.bf16.mxu1 %v738_v2 }
   0xc   :  { %657 = vmatpush3.bf16.xpose.msk.msra.mxu0 %vm797_vm1, %v655_v10  ;;  %674 = vmatpush3.bf16.msra.mxu1 %v659_v14 }
   0xd   :  { %658 = vmatprep.subr.bf16.mxu0 %v738_v2  ;;  %675 = vmatprep.subr.bf16.mxu1 %v738_v2 }
  0x10   :  { %677 = vmatpush3.bf16.msra.mxu1 %v663_v17 }
  0x11   :  { %635 = vmatprep.subr.mxu1 %v740_v7 }
  0x14   :  { %661 = vmatpush3.bf16.xpose.msk.msra.mxu0 %vm797_vm1, %v659_v14  ;;  %v401_v14 = vld [vmem:[%s909_s4] sm:$0x1]  ;;  %s531_s4 = sshll.u32 %s742_s28, 4  ;;  %s532_s4 = int_to_ptr.vmem [resolvable:$true] %s531_s4 }
  0x15   :  { %662 = vmatprep.subr.bf16.mxu0 %v738_v2  ;;  %s690_s29 = scalar_lea.vmem %s532_s4, 16  ;;  %s694_s30 = scalar_lea.vmem %s532_s4, 32 }
  0x16   :  { %p691_p0 = scmp.ne.s32.totalorder %s532_s4, %s690_s29  ;;  %p695_p1 = scmp.lt.s32.totalorder %s532_s4, %s532_s4 }
  0x17   :  { %p696_p2 = scmp.lt.s32.totalorder %s694_s30, %s690_s29 }
  0x19   :  { %p697_p3 = por %p696_p2, %p695_p1 }
  0x1b   :  { %p698_p4 = pnand %p697_p3, %p691_p0 }
  0x1c   :  { %665 = vmatpush3.bf16.xpose.msk.msra.mxu0 %vm797_vm1, %v663_v17 }
  0x23   :  { %614 = vmatmul.mubr.msk.f32.vlgmr.msra.gmra.mrb[0].mxu0 %vm36_vm0, %v816_v8 }
  0x95   :  { %v39_v19 = vpop.xlane.xlu0 %38 }
  0x96   :  { %v144_v20 = vadd.f32 %v566_v18, %v39_v19 }
  0xf6   :  { %v133_v21 = vpop.f32.mrb[0].mxu0 }
  0xf7   :  { %v145_v22 = vmul.f32 2.0, %v133_v21  ;;  %v615_v23 = vpop.f32.mrb[1].mxu0 }
  0xf9   :  { %v146_v24 = vsub.f32 %v144_v20, %v145_v22 }
  0xfb   :  { %v148_v25 = vsel %vm147_vm3, %v146_v24, inf }
  0xfc   :  { %149 = vmin.xlane.f32.xlu0 %v148_v25 }
 0x189   :  { %v150_v28 = vpop.xlane.xlu0 %149 }
 0x18a   :  { %vm153_vm4 = vcmp.eq.f32.partialorder %v146_v24, %v150_v28 }
 0x18b   :  { %v154_v29 = vsel %vm153_vm4, %v152_v27, 64 }
 0x18c   :  { %v155_v30 = vsel %vm147_vm3, %v154_v29, 2147483647 }
 0x18d   :  { %v157_v31 = vshra.s32 %v155_v30, 16  ;;  %v156_v33 = vand.u32 65535, %v155_v30 }
 0x18f   :  { %v159_v32 = vcvt.s32.f32 %v157_v31  ;;  %v158_v35 = vcvt.s32.f32 %v156_v33 }
 0x191   :  { %160 = vmin.xlane.f32.xlu1 %v159_v32 }
 0x21e   :  { %v161_v34 = vpop.xlane.xlu1 %160 }
 0x21f   :  { %vm162_vm5 = vcmp.eq.f32.partialorder %v159_v32, %v161_v34  ;;  %v167_v37 = vcvt.f32.s32 %v161_v34 }
 0x220   :  { %v163_v36 = vsel %vm162_vm5, %v158_v35, inf }
 0x221   :  { %164 = vmin.xlane.f32.xlu1 %v163_v36  ;;  %v168_v39 = vshll.u32 %v167_v37, 16 }
 0x2ae   :  { %v165_v38 = vpop.xlane.xlu1 %164 }
 0x2af   :  { %v166_v40 = vcvt.f32.s32 %v165_v38 }
 0x2b1   :  { %v169_v41 = vadd.s32 %v168_v39, %v166_v40 }
 0x2b3   :  { %vm170_vm6 = vcmp.eq.s32.totalorder %v152_v27, %v169_v41 }
 0x2b4   :  { %v567_v42 = vsel %vm170_vm6, 1.0, %v740_v7 }
 0x2b5   :  { %633 = vmatmul.mubr.msk.f32.vlgmr.msra.gmra.mrb[0].mxu1 %vm147_vm3, %v567_v42 }
 0x2b6   :  { %637 = vmatprep.mubr.msk.f32.mxu1 %vm739_vm2, %v740_v7 }
 0x388   :  { %v242_v43 = vpop.f32.mrb[0].mxu1 }
 0x389   :  { %246 = vst.msk [vmem:[%s910_s5] sm:$0xff] %vm36_vm0, %v242_v43  ;;  %v634_v44 = vpop.f32.mrb[1].mxu1  ;;  %636 = vmatpush3.msra.mxu1 %v242_v43  ;;  %v321_v45 = vmul.f32 %v242_v43, %v242_v43  ;;  %v422_v46 = vsub.f32 %v242_v43, %v816_v8  ;;  %v406_v8 = vshrl.u32 %v151_v26, 7 }
 0x38a   :  { %638 = vmatmul.mubr.msk.f32.vlgmr.msra.gmra.mrb[2].mxu1 %vm247_vm7, %v741_v47  ;;  %640 = vmatprep.subr.mxu1 %v740_v7 }
 0x38b   :  { %641 = vmatpush3.msra.mxu1 %v321_v45  ;;  %642 = vmatprep.mubr.msk.f32.mxu1 %vm739_vm2, %v740_v7  ;;  %v423_v48 = vmul.f32 %v422_v46, %v422_v46  ;;  %v407_v10 = vsub.s32 0, %v406_v8 }
 0x38c   :  { %645 = vmatprep.subr.mxu1 %v740_v7 }
 0x38d   :  { %v424_v49 = vsel %vm36_vm0, %v423_v48, 0.0 }
 0x38e   :  { %425 = vadd.xlane.f32.xlu0 %v424_v49  ;;  %643 = vmatmul.mubr.msk.f32.vlgmr.msra.gmra.mrb[4].mxu1 %vm247_vm7, %v741_v47 }
 0x38f   :  { %646 = vmatpush3.msk.msra.mxu1 %vm170_vm6, %v741_v47  ;;  %647 = vmatprep.mubr.msk.f32.mxu1 %vm739_vm2, %v740_v7 }
 0x392   :  { %648 = vmatmul.mubr.msk.f32.vlgmr.msra.gmra.mrb[6].mxu1 %vm247_vm7, %v741_v47 }
 0x41b   :  { %v426_v50 = vpop.xlane.xlu0 %425 }
 0x41c   :  { %v427_v51 = vrot.slane %v426_v50, 4 }
 0x41e   :  { %v428_v52 = vadd.f32 %v427_v51, %v426_v50 }
 0x420   :  { %v429_v53 = vrot.slane %v428_v52, 2 }
 0x422   :  { %v430_v54 = vadd.f32 %v429_v53, %v428_v52 }
 0x424   :  { %v431_v55 = vrot.slane %v430_v54, 1 }
 0x426   :  { %v432_v56 = vadd.f32 %v431_v55, %v430_v54 }
 0x428   :  { %v433_v57 = vmul.f32 0.25, %v432_v56 }
 0x42a   :  { %v435_v58 = vmul.f32 0.00390625, %v433_v57 }
 0x42c   :  { %437 = vst.msk [vmem:[#allocation2] sm:$0x1] %vm436_vm8, %v435_v58 }
 0x45d   :  { %v317_v59 = vpop.f32.mrb[2].mxu1 }
 0x45e   :  { %v393_v60 = vmul.f32 0.125, %v317_v59  ;;  %v639_v61 = vpop.f32.mrb[3].mxu1 }
 0x460   :  { %v395_v63 = vmul.f32 %v393_v60, %v393_v60 }
 0x461   :  { %v388_v62 = vpop.f32.mrb[4].mxu1 }
 0x462   :  { %v394_v0 = vmul.f32 0.125, %v388_v62  ;;  %v644_v1 = vpop.f32.mrb[5].mxu1 }
 0x464   :  { %v396_v2 = vsub.f32 %v394_v0, %v395_v63 }
 0x465   :  { %v504_v3 = vpop.f32.mrb[6].mxu1 }
 0x466   :  { %v398_v4 = vadd.f32 1e-05, %v396_v2  ;;  %v508_v5 = vmul.f32 0.125, %v504_v3  ;;  %v649_v6 = vpop.f32.mrb[7].mxu1 }
 0x468   :  { %684 = vrsqrt.f32 %v398_v4  ;;  %v509_v7 = vadd.f32 1e-10, %v508_v5 }
 0x46a   :  { %686 = vlog2.f32 %v509_v7 }
 0x472   :  { %v685_v11 = vpop.eup %684 }
 0x473   :  { %v400_v12 = vmul.f32 %v685_v11, %v397_v9 }
 0x474   :  { %v687_v13 = vpop.eup %686 }
 0x475   :  { %v402_v15 = vmul.f32 %v400_v12, %v393_v60  ;;  %v408_v16 = vrot.slane %v400_v12, %v407_v10  ;;  %v511_v17 = vmul.f32 0.6931472, %v687_v13 }
 0x477   :  { %v403_v18 = vsub.f32 %v401_v14, %v402_v15  ;;  %v410_v19 = vmul.f32 %v408_v16, %v242_v43  ;;  %v512_v20 = vmul.f32 %v511_v17, %v508_v5 }
 0x479   :  { %v415_v21 = vrot.slane %v403_v18, %v407_v10  ;;  %v514_v22 = vsel %vm513_vm9, %v512_v20, 0.0 }
 0x47a   :  { %515 = vadd.xlane.f32.xlu1 %v514_v22 }
 0x47b   :  { %v417_v23 = vadd.f32 %v415_v21, %v410_v19 }
 0x47d   :  { %v418_v24 = vmax.f32 %v417_v23, 0.0 }
 0x47f   :  { %v419_v25 = vpack.c.bf16 %v418_v24, %v418_v24 }
 0x481   :  { %421 = vst.msk [vmem:[%s911_s6] sm:$0xf] %vm420_vm10, %v419_v25 }
 0x482   :  { %701 = shalt.err (!%p698_p4)
}
 0x483   :  { %s702_s11 = scalar_lea.hbm %s912_s7, 16 }
 0x484   :  { %p703_p5 = scmp.ne.s32.totalorder %s912_s7, %s702_s11  ;;  %p706_p6 = scmp.lt.u32.totalorder %s702_s11, %s912_s7 }
 0x486   :  { %p708_p7 = pnand %p706_p6, %p703_p5 }
 0x488   :  { %711 = shalt.err (!%p708_p7)
}
 0x489   :  { %534 = dma.vmem_to_hbm [thread:$0]  %s532_s4, 16, %s912_s7, [#allocation3]  }
 0x48a   :  { %s743_s17 = smov [#allocation4]  }
 0x48b   :  { %s541_s18 = sshll.u32 %s743_s17, 4  ;;  %s542_s18 = int_to_ptr.vmem [resolvable:$true] %s541_s18 }
 0x48c   :  { %s712_s0 = scalar_lea.vmem %s542_s18, 16  ;;  %s716_s19 = scalar_lea.vmem %s542_s18, 32 }
 0x48d   :  { %p713_p8 = scmp.ne.s32.totalorder %s542_s18, %s712_s0  ;;  %p717_p9 = scmp.lt.s32.totalorder %s542_s18, %s542_s18 }
 0x48e   :  { %p718_p10 = scmp.lt.s32.totalorder %s716_s19, %s712_s0 }
 0x490   :  { %p719_p11 = por %p718_p10, %p717_p9 }
 0x492   :  { %p720_p12 = pnand %p719_p11, %p713_p8 }
 0x507   :  { %v516_v26 = vpop.xlane.xlu1 %515 }
 0x508   :  { %v517_v27 = vsub.f32 0.0, %v516_v26 }
 0x50a   :  { %v518_v28 = vmul.f32 1.442695, %v517_v27 }
 0x50c   :  { %688 = vpow2.f32 %v518_v28 }
 0x516   :  { %v689_v29 = vpop.eup %688 }
 0x517   :  { %520 = vst.msk [vmem:[#allocation4] sm:$0x1] %vm436_vm8, %v689_v29 }
 0x518   :  { %723 = shalt.err (!%p720_p12)
}
 0x519   :  { %s724_s21 = scalar_lea.hbm %s913_s8, 16 }
 0x51a   :  { %p725_p13 = scmp.ne.s32.totalorder %s913_s8, %s724_s21  ;;  %p728_p0 = scmp.lt.u32.totalorder %s724_s21, %s913_s8 }
 0x51c   :  { %p730_p1 = pnand %p728_p0, %p725_p13 }
 0x51e   :  { %733 = shalt.err (!%p730_p1)
}
 0x51f   :  { %544 = dma.vmem_to_hbm [thread:$0]  %s542_s18, 16, %s913_s8, [#allocation5]  }
 0x520   :  { %734 = dma.done.wait [#allocation3], 16  }
 0x521   :  { %735 = vsyncadd [#allocation3], 4294967280 }
 0x522   :  { %736 = dma.done.wait [#allocation5], 16  }
 0x523   :  { %737 = vsyncadd [#allocation5], 4294967280 }
 0x524   :  { %555 = vsyncpa [#allocation3], 1 }
 0x525   :  { %556 = vsyncpa [#allocation5], 1 }

// kernel: tile.73
= control target key start
LH: loop header
LB: loop body
LE: loop exit
PB: predicated region body
PF: predicated region fallthrough
CT: control target
= control target key end

     0   :  { %s1012_s0 = inlined_call_operand.vmem [shape: f32[32,32], index: 0, kind: input, shape index: {}]   ;;  %s1013_s1 = inlined_call_operand.vmem [shape: f32[4,32,4,32], index: 1, kind: output, shape index: {}]  }
   0x1   :  { %v4_v0 = vld [vmem:[%s1012_s0] ss:$0 sm:$0xff]  ;;  %v367_v1 = vld [vmem:[%s1012_s0 + $0x1] ss:$0 sm:$0xff]  ;;  %v372_v2 = vld [vmem:[%s1012_s0 + $0x2] ss:$0 sm:$0xff] }
   0x2   :  { %5 = vst [vmem:[%s1013_s1] sm:$0xf] %v4_v0  ;;  %364 = vst [vmem:[%s1013_s1 + $0x80] sm:$0xf] %v4_v0  ;;  %v377_v3 = vld [vmem:[%s1012_s0 + $0x3] ss:$0 sm:$0xff] }
   0x3   :  { %365 = vst [vmem:[%s1013_s1 + $0x100] sm:$0xf] %v4_v0  ;;  %366 = vst [vmem:[%s1013_s1 + $0x180] sm:$0xf] %v4_v0  ;;  %v382_v4 = vld [vmem:[%s1012_s0 + $0x4] ss:$0 sm:$0xff] }
   0x4   :  { %368 = vst [vmem:[%s1013_s1 + $0x4] sm:$0xf] %v367_v1  ;;  %369 = vst [vmem:[%s1013_s1 + $0x84] sm:$0xf] %v367_v1  ;;  %v387_v5 = vld [vmem:[%s1012_s0 + $0x5] ss:$0 sm:$0xff] }
   0x5   :  { %370 = vst [vmem:[%s1013_s1 + $0x104] sm:$0xf] %v367_v1  ;;  %371 = vst [vmem:[%s1013_s1 + $0x184] sm:$0xf] %v367_v1  ;;  %v392_v6 = vld [vmem:[%s1012_s0 + $0x6] ss:$0 sm:$0xff] }
   0x6   :  { %373 = vst [vmem:[%s1013_s1 + $0x8] sm:$0xf] %v372_v2  ;;  %374 = vst [vmem:[%s1013_s1 + $0x88] sm:$0xf] %v372_v2  ;;  %v397_v7 = vld [vmem:[%s1012_s0 + $0x7] ss:$0 sm:$0xff] }
   0x7   :  { %375 = vst [vmem:[%s1013_s1 + $0x108] sm:$0xf] %v372_v2  ;;  %376 = vst [vmem:[%s1013_s1 + $0x188] sm:$0xf] %v372_v2  ;;  %v402_v8 = vld [vmem:[%s1012_s0 + $0x8] ss:$0 sm:$0xff] }
   0x8   :  { %378 = vst [vmem:[%s1013_s1 + $0xc] sm:$0xf] %v377_v3  ;;  %379 = vst [vmem:[%s1013_s1 + $0x8c] sm:$0xf] %v377_v3  ;;  %v407_v9 = vld [vmem:[%s1012_s0 + $0x9] ss:$0 sm:$0xff] }
   0x9   :  { %380 = vst [vmem:[%s1013_s1 + $0x10c] sm:$0xf] %v377_v3  ;;  %381 = vst [vmem:[%s1013_s1 + $0x18c] sm:$0xf] %v377_v3  ;;  %v412_v10 = vld [vmem:[%s1012_s0 + $0xa] ss:$0 sm:$0xff] }
   0xa   :  { %383 = vst [vmem:[%s1013_s1 + $0x10] sm:$0xf] %v382_v4  ;;  %384 = vst [vmem:[%s1013_s1 + $0x90] sm:$0xf] %v382_v4  ;;  %v417_v11 = vld [vmem:[%s1012_s0 + $0xb] ss:$0 sm:$0xff] }
   0xb   :  { %385 = vst [vmem:[%s1013_s1 + $0x110] sm:$0xf] %v382_v4  ;;  %386 = vst [vmem:[%s1013_s1 + $0x190] sm:$0xf] %v382_v4  ;;  %v422_v12 = vld [vmem:[%s1012_s0 + $0xc] ss:$0 sm:$0xff] }
   0xc   :  { %388 = vst [vmem:[%s1013_s1 + $0x14] sm:$0xf] %v387_v5  ;;  %389 = vst [vmem:[%s1013_s1 + $0x94] sm:$0xf] %v387_v5  ;;  %v427_v13 = vld [vmem:[%s1012_s0 + $0xd] ss:$0 sm:$0xff] }
   0xd   :  { %390 = vst [vmem:[%s1013_s1 + $0x114] sm:$0xf] %v387_v5  ;;  %391 = vst [vmem:[%s1013_s1 + $0x194] sm:$0xf] %v387_v5  ;;  %v432_v14 = vld [vmem:[%s1012_s0 + $0xe] ss:$0 sm:$0xff] }
   0xe   :  { %393 = vst [vmem:[%s1013_s1 + $0x18] sm:$0xf] %v392_v6  ;;  %394 = vst [vmem:[%s1013_s1 + $0x98] sm:$0xf] %v392_v6  ;;  %v437_v15 = vld [vmem:[%s1012_s0 + $0xf] ss:$0 sm:$0xff] }
   0xf   :  { %395 = vst [vmem:[%s1013_s1 + $0x118] sm:$0xf] %v392_v6  ;;  %396 = vst [vmem:[%s1013_s1 + $0x198] sm:$0xf] %v392_v6  ;;  %v442_v16 = vld [vmem:[%s1012_s0 + $0x10] ss:$0 sm:$0xff] }
  0x10   :  { %398 = vst [vmem:[%s1013_s1 + $0x1c] sm:$0xf] %v397_v7  ;;  %399 = vst [vmem:[%s1013_s1 + $0x9c] sm:$0xf] %v397_v7  ;;  %v447_v17 = vld [vmem:[%s1012_s0 + $0x11] ss:$0 sm:$0xff] }
  0x11   :  { %400 = vst [vmem:[%s1013_s1 + $0x11c] sm:$0xf] %v397_v7  ;;  %401 = vst [vmem:[%s1013_s1 + $0x19c] sm:$0xf] %v397_v7  ;;  %v452_v18 = vld [vmem:[%s1012_s0 + $0x12] ss:$0 sm:$0xff] }
  0x12   :  { %403 = vst [vmem:[%s1013_s1 + $0x20] sm:$0xf] %v402_v8  ;;  %404 = vst [vmem:[%s1013_s1 + $0xa0] sm:$0xf] %v402_v8  ;;  %v457_v19 = vld [vmem:[%s1012_s0 + $0x13] ss:$0 sm:$0xff] }
  0x13   :  { %405 = vst [vmem:[%s1013_s1 + $0x120] sm:$0xf] %v402_v8  ;;  %406 = vst [vmem:[%s1013_s1 + $0x1a0] sm:$0xf] %v402_v8  ;;  %v462_v20 = vld [vmem:[%s1012_s0 + $0x14] ss:$0 sm:$0xff] }
  0x14   :  { %408 = vst [vmem:[%s1013_s1 + $0x24] sm:$0xf] %v407_v9  ;;  %409 = vst [vmem:[%s1013_s1 + $0xa4] sm:$0xf] %v407_v9  ;;  %v467_v21 = vld [vmem:[%s1012_s0 + $0x15] ss:$0 sm:$0xff] }
  0x15   :  { %410 = vst [vmem:[%s1013_s1 + $0x124] sm:$0xf] %v407_v9  ;;  %411 = vst [vmem:[%s1013_s1 + $0x1a4] sm:$0xf] %v407_v9  ;;  %v472_v22 = vld [vmem:[%s1012_s0 + $0x16] ss:$0 sm:$0xff] }
  0x16   :  { %413 = vst [vmem:[%s1013_s1 + $0x28] sm:$0xf] %v412_v10  ;;  %414 = vst [vmem:[%s1013_s1 + $0xa8] sm:$0xf] %v412_v10  ;;  %v477_v23 = vld [vmem:[%s1012_s0 + $0x17] ss:$0 sm:$0xff] }
  0x17   :  { %415 = vst [vmem:[%s1013_s1 + $0x128] sm:$0xf] %v412_v10  ;;  %416 = vst [vmem:[%s1013_s1 + $0x1a8] sm:$0xf] %v412_v10  ;;  %v482_v24 = vld [vmem:[%s1012_s0 + $0x18] ss:$0 sm:$0xff] }
  0x18   :  { %418 = vst [vmem:[%s1013_s1 + $0x2c] sm:$0xf] %v417_v11  ;;  %419 = vst [vmem:[%s1013_s1 + $0xac] sm:$0xf] %v417_v11  ;;  %v487_v25 = vld [vmem:[%s1012_s0 + $0x19] ss:$0 sm:$0xff] }
  0x19   :  { %420 = vst [vmem:[%s1013_s1 + $0x12c] sm:$0xf] %v417_v11  ;;  %421 = vst [vmem:[%s1013_s1 + $0x1ac] sm:$0xf] %v417_v11  ;;  %v492_v26 = vld [vmem:[%s1012_s0 + $0x1a] ss:$0 sm:$0xff] }
  0x1a   :  { %423 = vst [vmem:[%s1013_s1 + $0x30] sm:$0xf] %v422_v12  ;;  %424 = vst [vmem:[%s1013_s1 + $0xb0] sm:$0xf] %v422_v12  ;;  %v497_v27 = vld [vmem:[%s1012_s0 + $0x1b] ss:$0 sm:$0xff] }
  0x1b   :  { %425 = vst [vmem:[%s1013_s1 + $0x130] sm:$0xf] %v422_v12  ;;  %426 = vst [vmem:[%s1013_s1 + $0x1b0] sm:$0xf] %v422_v12  ;;  %v502_v28 = vld [vmem:[%s1012_s0 + $0x1c] ss:$0 sm:$0xff] }
  0x1c   :  { %428 = vst [vmem:[%s1013_s1 + $0x34] sm:$0xf] %v427_v13  ;;  %429 = vst [vmem:[%s1013_s1 + $0xb4] sm:$0xf] %v427_v13  ;;  %v507_v29 = vld [vmem:[%s1012_s0 + $0x1d] ss:$0 sm:$0xff] }
  0x1d   :  { %430 = vst [vmem:[%s1013_s1 + $0x134] sm:$0xf] %v427_v13  ;;  %431 = vst [vmem:[%s1013_s1 + $0x1b4] sm:$0xf] %v427_v13  ;;  %v512_v30 = vld [vmem:[%s1012_s0 + $0x1e] ss:$0 sm:$0xff] }
  0x1e   :  { %433 = vst [vmem:[%s1013_s1 + $0x38] sm:$0xf] %v432_v14  ;;  %434 = vst [vmem:[%s1013_s1 + $0xb8] sm:$0xf] %v432_v14  ;;  %v517_v31 = vld [vmem:[%s1012_s0 + $0x1f] ss:$0 sm:$0xff] }
  0x1f   :  { %435 = vst [vmem:[%s1013_s1 + $0x138] sm:$0xf] %v432_v14  ;;  %436 = vst [vmem:[%s1013_s1 + $0x1b8] sm:$0xf] %v432_v14 }
  0x20   :  { %438 = vst [vmem:[%s1013_s1 + $0x3c] sm:$0xf] %v437_v15  ;;  %439 = vst [vmem:[%s1013_s1 + $0xbc] sm:$0xf] %v437_v15 }
  0x21   :  { %440 = vst [vmem:[%s1013_s1 + $0x13c] sm:$0xf] %v437_v15  ;;  %441 = vst [vmem:[%s1013_s1 + $0x1bc] sm:$0xf] %v437_v15 }
  0x22   :  { %443 = vst [vmem:[%s1013_s1 + $0x40] sm:$0xf] %v442_v16  ;;  %444 = vst [vmem:[%s1013_s1 + $0xc0] sm:$0xf] %v442_v16 }
  0x23   :  { %445 = vst [vmem:[%s1013_s1 + $0x140] sm:$0xf] %v442_v16  ;;  %446 = vst [vmem:[%s1013_s1 + $0x1c0] sm:$0xf] %v442_v16 }
  0x24   :  { %448 = vst [vmem:[%s1013_s1 + $0x44] sm:$0xf] %v447_v17  ;;  %449 = vst [vmem:[%s1013_s1 + $0xc4] sm:$0xf] %v447_v17 }
  0x25   :  { %450 = vst [vmem:[%s1013_s1 + $0x144] sm:$0xf] %v447_v17  ;;  %451 = vst [vmem:[%s1013_s1 + $0x1c4] sm:$0xf] %v447_v17 }
  0x26   :  { %453 = vst [vmem:[%s1013_s1 + $0x48] sm:$0xf] %v452_v18  ;;  %454 = vst [vmem:[%s1013_s1 + $0xc8] sm:$0xf] %v452_v18 }
  0x27   :  { %455 = vst [vmem:[%s1013_s1 + $0x148] sm:$0xf] %v452_v18  ;;  %456 = vst [vmem:[%s1013_s1 + $0x1c8] sm:$0xf] %v452_v18 }
  0x28   :  { %458 = vst [vmem:[%s1013_s1 + $0x4c] sm:$0xf] %v457_v19  ;;  %459 = vst [vmem:[%s1013_s1 + $0xcc] sm:$0xf] %v457_v19 }
  0x29   :  { %460 = vst [vmem:[%s1013_s1 + $0x14c] sm:$0xf] %v457_v19  ;;  %461 = vst [vmem:[%s1013_s1 + $0x1cc] sm:$0xf] %v457_v19 }
  0x2a   :  { %463 = vst [vmem:[%s1013_s1 + $0x50] sm:$0xf] %v462_v20  ;;  %464 = vst [vmem:[%s1013_s1 + $0xd0] sm:$0xf] %v462_v20 }
  0x2b   :  { %465 = vst [vmem:[%s1013_s1 + $0x150] sm:$0xf] %v462_v20  ;;  %466 = vst [vmem:[%s1013_s1 + $0x1d0] sm:$0xf] %v462_v20 }
  0x2c   :  { %468 = vst [vmem:[%s1013_s1 + $0x54] sm:$0xf] %v467_v21  ;;  %469 = vst [vmem:[%s1013_s1 + $0xd4] sm:$0xf] %v467_v21 }
  0x2d   :  { %470 = vst [vmem:[%s1013_s1 + $0x154] sm:$0xf] %v467_v21  ;;  %471 = vst [vmem:[%s1013_s1 + $0x1d4] sm:$0xf] %v467_v21 }
  0x2e   :  { %473 = vst [vmem:[%s1013_s1 + $0x58] sm:$0xf] %v472_v22  ;;  %474 = vst [vmem:[%s1013_s1 + $0xd8] sm:$0xf] %v472_v22 }
  0x2f   :  { %475 = vst [vmem:[%s1013_s1 + $0x158] sm:$0xf] %v472_v22  ;;  %476 = vst [vmem:[%s1013_s1 + $0x1d8] sm:$0xf] %v472_v22 }
  0x30   :  { %478 = vst [vmem:[%s1013_s1 + $0x5c] sm:$0xf] %v477_v23  ;;  %479 = vst [vmem:[%s1013_s1 + $0xdc] sm:$0xf] %v477_v23 }
  0x31   :  { %480 = vst [vmem:[%s1013_s1 + $0x15c] sm:$0xf] %v477_v23  ;;  %481 = vst [vmem:[%s1013_s1 + $0x1dc] sm:$0xf] %v477_v23 }
  0x32   :  { %483 = vst [vmem:[%s1013_s1 + $0x60] sm:$0xf] %v482_v24  ;;  %484 = vst [vmem:[%s1013_s1 + $0xe0] sm:$0xf] %v482_v24 }
  0x33   :  { %485 = vst [vmem:[%s1013_s1 + $0x160] sm:$0xf] %v482_v24  ;;  %486 = vst [vmem:[%s1013_s1 + $0x1e0] sm:$0xf] %v482_v24 }
  0x34   :  { %488 = vst [vmem:[%s1013_s1 + $0x64] sm:$0xf] %v487_v25  ;;  %489 = vst [vmem:[%s1013_s1 + $0xe4] sm:$0xf] %v487_v25 }
  0x35   :  { %490 = vst [vmem:[%s1013_s1 + $0x164] sm:$0xf] %v487_v25  ;;  %491 = vst [vmem:[%s1013_s1 + $0x1e4] sm:$0xf] %v487_v25 }
  0x36   :  { %493 = vst [vmem:[%s1013_s1 + $0x68] sm:$0xf] %v492_v26  ;;  %494 = vst [vmem:[%s1013_s1 + $0xe8] sm:$0xf] %v492_v26 }
  0x37   :  { %495 = vst [vmem:[%s1013_s1 + $0x168] sm:$0xf] %v492_v26  ;;  %496 = vst [vmem:[%s1013_s1 + $0x1e8] sm:$0xf] %v492_v26 }
  0x38   :  { %498 = vst [vmem:[%s1013_s1 + $0x6c] sm:$0xf] %v497_v27  ;;  %499 = vst [vmem:[%s1013_s1 + $0xec] sm:$0xf] %v497_v27 }
  0x39   :  { %500 = vst [vmem:[%s1013_s1 + $0x16c] sm:$0xf] %v497_v27  ;;  %501 = vst [vmem:[%s1013_s1 + $0x1ec] sm:$0xf] %v497_v27 }
  0x3a   :  { %503 = vst [vmem:[%s1013_s1 + $0x70] sm:$0xf] %v502_v28  ;;  %504 = vst [vmem:[%s1013_s1 + $0xf0] sm:$0xf] %v502_v28 }
  0x3b   :  { %505 = vst [vmem:[%s1013_s1 + $0x170] sm:$0xf] %v502_v28  ;;  %506 = vst [vmem:[%s1013_s1 + $0x1f0] sm:$0xf] %v502_v28 }
  0x3c   :  { %508 = vst [vmem:[%s1013_s1 + $0x74] sm:$0xf] %v507_v29  ;;  %509 = vst [vmem:[%s1013_s1 + $0xf4] sm:$0xf] %v507_v29 }
  0x3d   :  { %510 = vst [vmem:[%s1013_s1 + $0x174] sm:$0xf] %v507_v29  ;;  %511 = vst [vmem:[%s1013_s1 + $0x1f4] sm:$0xf] %v507_v29 }
  0x3e   :  { %513 = vst [vmem:[%s1013_s1 + $0x78] sm:$0xf] %v512_v30  ;;  %514 = vst [vmem:[%s1013_s1 + $0xf8] sm:$0xf] %v512_v30 }
  0x3f   :  { %515 = vst [vmem:[%s1013_s1 + $0x178] sm:$0xf] %v512_v30  ;;  %516 = vst [vmem:[%s1013_s1 + $0x1f8] sm:$0xf] %v512_v30 }
  0x40   :  { %518 = vst [vmem:[%s1013_s1 + $0x7c] sm:$0xf] %v517_v31  ;;  %519 = vst [vmem:[%s1013_s1 + $0xfc] sm:$0xf] %v517_v31 }
  0x41   :  { %520 = vst [vmem:[%s1013_s1 + $0x17c] sm:$0xf] %v517_v31  ;;  %521 = vst [vmem:[%s1013_s1 + $0x1fc] sm:$0xf] %v517_v31 }

// kernel: tile.74
= control target key start
LH: loop header
LB: loop body
LE: loop exit
PB: predicated region body
PF: predicated region fallthrough
CT: control target
= control target key end

     0   :  { %vm642_vm0 = vcmask 1047556   ;;  %s1622_s10 = smov 96   ;;  %vm644_vm1 = vcmask 261120   ;;  %s1624_s16 = smov 32   ;;  %vm789_vm2 = vcmask 1048320   ;;  %vm964_vm3 = vcmask 785920   ;;  %s2387_s0 = inlined_call_operand.vmem [shape: f32[4,32,4,32], index: 0, kind: input, shape index: {}]   ;;  %s2388_s1 = inlined_call_operand.vmem [shape: f32[128,128], index: 1, kind: output, shape index: {}]  }
   0x1   :  { %v1552_v0 = vld [vmem:[%s2387_s0 + $0x1c] sm:$0xf]  ;;  %v1553_v1 = vld [vmem:[%s2387_s0 + $0x18] sm:$0xf]  ;;  %v1554_v2 = vld [vmem:[%s2387_s0 + $0x14] sm:$0xf] }
   0x2   :  { %608 = vst [vmem:[#allocation0 + $0x38] sm:$0xf] %v1552_v0  ;;  %613 = vst [vmem:[#allocation0 + $0x30] sm:$0xf] %v1553_v1  ;;  %v1555_v3 = vld [vmem:[%s2387_s0 + $0x10] sm:$0xf] }
   0x3   :  { %618 = vst [vmem:[#allocation0 + $0x28] sm:$0xf] %v1554_v2  ;;  %v1556_v4 = vld [vmem:[%s2387_s0 + $0xc] sm:$0xf]  ;;  %v1557_v5 = vld [vmem:[%s2387_s0 + $0x8] sm:$0xf] }
   0x4   :  { %623 = vst [vmem:[#allocation0 + $0x20] sm:$0xf] %v1555_v3  ;;  %628 = vst [vmem:[#allocation0 + $0x18] sm:$0xf] %v1556_v4  ;;  %v1558_v6 = vld [vmem:[%s2387_s0 + $0x4] sm:$0xf] }
   0x5   :  { %633 = vst [vmem:[#allocation0 + $0x10] sm:$0xf] %v1557_v5  ;;  %v638_v7 = vld [vmem:[%s2387_s0] sm:$0xf]  ;;  %637 = vst [vmem:[#allocation0 + $0x8] sm:$0xf] %v1558_v6 }
   0x6   :  { %639 = vst [vmem:[#allocation0] sm:$0xf] %v638_v7  ;;  %v1488_v8 = vld [vmem:[%s2387_s0 + $0x11c] sm:$0xf]  ;;  %v1489_v9 = vld [vmem:[%s2387_s0 + $0x118] sm:$0xf] }
   0x7   :  { %v1490_v10 = vld [vmem:[%s2387_s0 + $0x114] sm:$0xf]  ;;  %288 = vst [vmem:[#allocation0 + $0x238] sm:$0xf] %v1488_v8  ;;  %293 = vst [vmem:[#allocation0 + $0x230] sm:$0xf] %v1489_v9 }
   0x8   :  { %298 = vst [vmem:[#allocation0 + $0x228] sm:$0xf] %v1490_v10  ;;  %v1491_v11 = vld [vmem:[%s2387_s0 + $0x110] sm:$0xf]  ;;  %v1492_v12 = vld [vmem:[%s2387_s0 + $0x10c] sm:$0xf] }
   0x9   :  { %v1493_v13 = vld [vmem:[%s2387_s0 + $0x108] sm:$0xf]  ;;  %303 = vst [vmem:[#allocation0 + $0x220] sm:$0xf] %v1491_v11  ;;  %308 = vst [vmem:[#allocation0 + $0x218] sm:$0xf] %v1492_v12 }
   0xa   :  { %313 = vst [vmem:[#allocation0 + $0x210] sm:$0xf] %v1493_v13  ;;  %v1494_v14 = vld [vmem:[%s2387_s0 + $0x104] sm:$0xf]  ;;  %v1495_v15 = vld [vmem:[%s2387_s0 + $0x100] sm:$0xf] }
   0xb   :  { %v1520_v16 = vld [vmem:[%s2387_s0 + $0x9c] sm:$0xf]  ;;  %318 = vst [vmem:[#allocation0 + $0x208] sm:$0xf] %v1494_v14  ;;  %323 = vst [vmem:[#allocation0 + $0x200] sm:$0xf] %v1495_v15 }
   0xc   :  { %448 = vst [vmem:[#allocation0 + $0x138] sm:$0xf] %v1520_v16  ;;  %v1521_v17 = vld [vmem:[%s2387_s0 + $0x98] sm:$0xf]  ;;  %v1522_v18 = vld [vmem:[%s2387_s0 + $0x94] sm:$0xf] }
   0xd   :  { %v1523_v19 = vld [vmem:[%s2387_s0 + $0x90] sm:$0xf]  ;;  %453 = vst [vmem:[#allocation0 + $0x130] sm:$0xf] %v1521_v17  ;;  %458 = vst [vmem:[#allocation0 + $0x128] sm:$0xf] %v1522_v18 }
   0xe   :  { %463 = vst [vmem:[#allocation0 + $0x120] sm:$0xf] %v1523_v19  ;;  %v1524_v20 = vld [vmem:[%s2387_s0 + $0x8c] sm:$0xf]  ;;  %v1525_v21 = vld [vmem:[%s2387_s0 + $0x88] sm:$0xf] }
   0xf   :  { %v1526_v22 = vld [vmem:[%s2387_s0 + $0x84] sm:$0xf]  ;;  %468 = vst [vmem:[#allocation0 + $0x118] sm:$0xf] %v1524_v20  ;;  %473 = vst [vmem:[#allocation0 + $0x110] sm:$0xf] %v1525_v21 }
  0x10   :  { %478 = vst [vmem:[#allocation0 + $0x108] sm:$0xf] %v1526_v22  ;;  %v1527_v23 = vld [vmem:[%s2387_s0 + $0x80] sm:$0xf]  ;;  %v1456_v24 = vld [vmem:[%s2387_s0 + $0x19c] sm:$0xf] }
  0x11   :  { %v1457_v25 = vld [vmem:[%s2387_s0 + $0x198] sm:$0xf]  ;;  %483 = vst [vmem:[#allocation0 + $0x100] sm:$0xf] %v1527_v23  ;;  %128 = vst [vmem:[#allocation0 + $0x338] sm:$0xf] %v1456_v24 }
  0x12   :  { %v784_v26 = vld [vmem:[#allocation0 + $0x3] ss:$8 sm:$0xf0]   ;;  %133 = vst [vmem:[#allocation0 + $0x330] sm:$0xf] %v1457_v25  ;;  %vm1139_vm4 = vcmask 523520  }
  0x13   :  { %v1458_v27 = vld [vmem:[%s2387_s0 + $0x194] sm:$0xf]  ;;  %v782_v28 = vld [vmem:[#allocation0 + $0x3] ss:$8 sm:$0xf]  }
  0x14   :  { %138 = vst [vmem:[#allocation0 + $0x328] sm:$0xf] %v1458_v27  ;;  %v1459_v29 = vld [vmem:[%s2387_s0 + $0x190] sm:$0xf]  ;;  %v786_v30 = vsel %vm642_vm0, %v784_v26, %v782_v28  ;;  %v1460_v31 = vld [vmem:[%s2387_s0 + $0x18c] sm:$0xf] }
  0x15   :  { %143 = vst [vmem:[#allocation0 + $0x320] sm:$0xf] %v1459_v29  ;;  %v1461_v32 = vld [vmem:[%s2387_s0 + $0x188] sm:$0xf]  ;;  %v1462_v33 = vld [vmem:[%s2387_s0 + $0x184] sm:$0xf]  ;;  %787 = vrot.lane.b32.xlu0 %v786_v30, %s1622_s10 }
  0x16   :  { %v805_v34 = vld [vmem:[#allocation0 + $0x203] ss:$8 sm:$0xf0]   ;;  %148 = vst [vmem:[#allocation0 + $0x318] sm:$0xf] %v1460_v31 }
  0x17   :  { %153 = vst [vmem:[#allocation0 + $0x310] sm:$0xf] %v1461_v32  ;;  %158 = vst [vmem:[#allocation0 + $0x308] sm:$0xf] %v1462_v33  ;;  %v1463_v35 = vld [vmem:[%s2387_s0 + $0x180] sm:$0xf] }
  0x18   :  { %v803_v36 = vld [vmem:[#allocation0 + $0x203] ss:$8 sm:$0xf]   ;;  %163 = vst [vmem:[#allocation0 + $0x300] sm:$0xf] %v1463_v35 }
  0x19   :  { %v1544_v37 = vld [vmem:[%s2387_s0 + $0x3c] sm:$0xf]  ;;  %v807_v38 = vsel %vm642_vm0, %v805_v34, %v803_v36  ;;  %v794_v39 = vld [vmem:[#allocation0 + $0x103] ss:$8 sm:$0xf0]  }
  0x1a   :  { %568 = vst [vmem:[#allocation0 + $0x78] sm:$0xf] %v1544_v37  ;;  %v1545_v40 = vld [vmem:[%s2387_s0 + $0x38] sm:$0xf]  ;;  %808 = vrot.lane.b32.xlu1 %v807_v38, %s1622_s10  ;;  %v1546_v41 = vld [vmem:[%s2387_s0 + $0x34] sm:$0xf] }
  0x1b   :  { %573 = vst [vmem:[#allocation0 + $0x70] sm:$0xf] %v1545_v40  ;;  %v1547_v42 = vld [vmem:[%s2387_s0 + $0x30] sm:$0xf]  ;;  %v1548_v43 = vld [vmem:[%s2387_s0 + $0x2c] sm:$0xf] }
  0x1c   :  { %v792_v44 = vld [vmem:[#allocation0 + $0x103] ss:$8 sm:$0xf]   ;;  %578 = vst [vmem:[#allocation0 + $0x68] sm:$0xf] %v1546_v41 }
  0x1d   :  { %583 = vst [vmem:[#allocation0 + $0x60] sm:$0xf] %v1547_v42  ;;  %588 = vst [vmem:[#allocation0 + $0x58] sm:$0xf] %v1548_v43  ;;  %v1549_v45 = vld [vmem:[%s2387_s0 + $0x28] sm:$0xf]  ;;  %v796_v46 = vsel %vm642_vm0, %v794_v39, %v792_v44 }
  0x1e   :  { %593 = vst [vmem:[#allocation0 + $0x50] sm:$0xf] %v1549_v45  ;;  %v1550_v47 = vld [vmem:[%s2387_s0 + $0x24] sm:$0xf]  ;;  %v1551_v48 = vld [vmem:[%s2387_s0 + $0x20] sm:$0xf]  ;;  %797 = vrot.lane.b32.xlu0 %v796_v46, %s1622_s10 }
  0x1f   :  { %v1512_v49 = vld [vmem:[%s2387_s0 + $0xbc] sm:$0xf]  ;;  %v816_v50 = vld [vmem:[#allocation0 + $0x303] ss:$8 sm:$0xf0]  }
  0x20   :  { %598 = vst [vmem:[#allocation0 + $0x48] sm:$0xf] %v1550_v47  ;;  %603 = vst [vmem:[#allocation0 + $0x40] sm:$0xf] %v1551_v48  ;;  %v1513_v51 = vld [vmem:[%s2387_s0 + $0xb8] sm:$0xf] }
  0x21   :  { %408 = vst [vmem:[#allocation0 + $0x178] sm:$0xf] %v1512_v49  ;;  %413 = vst [vmem:[#allocation0 + $0x170] sm:$0xf] %v1513_v51  ;;  %v1514_v52 = vld [vmem:[%s2387_s0 + $0xb4] sm:$0xf] }
  0x22   :  { %v1515_v53 = vld [vmem:[%s2387_s0 + $0xb0] sm:$0xf]  ;;  %v1516_v54 = vld [vmem:[%s2387_s0 + $0xac] sm:$0xf]  ;;  %418 = vst [vmem:[#allocation0 + $0x168] sm:$0xf] %v1514_v52 }
  0x23   :  { %v814_v55 = vld [vmem:[#allocation0 + $0x303] ss:$8 sm:$0xf]   ;;  %423 = vst [vmem:[#allocation0 + $0x160] sm:$0xf] %v1515_v53 }
  0x24   :  { %428 = vst [vmem:[#allocation0 + $0x158] sm:$0xf] %v1516_v54  ;;  %v1517_v56 = vld [vmem:[%s2387_s0 + $0xa8] sm:$0xf]  ;;  %v818_v57 = vsel %vm642_vm0, %v816_v50, %v814_v55  ;;  %v1518_v58 = vld [vmem:[%s2387_s0 + $0xa4] sm:$0xf] }
  0x25   :  { %433 = vst [vmem:[#allocation0 + $0x150] sm:$0xf] %v1517_v56  ;;  %v1519_v59 = vld [vmem:[%s2387_s0 + $0xa0] sm:$0xf]  ;;  %v1480_v60 = vld [vmem:[%s2387_s0 + $0x13c] sm:$0xf]  ;;  %819 = vrot.lane.b32.xlu1 %v818_v57, %s1622_s10 }
  0x26   :  { %438 = vst [vmem:[#allocation0 + $0x148] sm:$0xf] %v1518_v58  ;;  %443 = vst [vmem:[#allocation0 + $0x140] sm:$0xf] %v1519_v59  ;;  %v1481_v61 = vld [vmem:[%s2387_s0 + $0x138] sm:$0xf] }
  0x27   :  { %248 = vst [vmem:[#allocation0 + $0x278] sm:$0xf] %v1480_v60  ;;  %v1482_v62 = vld [vmem:[%s2387_s0 + $0x134] sm:$0xf]  ;;  %v1483_v63 = vld [vmem:[%s2387_s0 + $0x130] sm:$0xf] }
  0x28   :  { %v827_v0 = vld [vmem:[#allocation0 + $0x43] ss:$8 sm:$0xf0]   ;;  %253 = vst [vmem:[#allocation0 + $0x270] sm:$0xf] %v1481_v61 }
  0x29   :  { %258 = vst [vmem:[#allocation0 + $0x268] sm:$0xf] %v1482_v62  ;;  %263 = vst [vmem:[#allocation0 + $0x260] sm:$0xf] %v1483_v63  ;;  %v1484_v1 = vld [vmem:[%s2387_s0 + $0x12c] sm:$0xf] }
  0x2a   :  { %268 = vst [vmem:[#allocation0 + $0x258] sm:$0xf] %v1484_v1  ;;  %v1485_v2 = vld [vmem:[%s2387_s0 + $0x128] sm:$0xf]  ;;  %v1486_v3 = vld [vmem:[%s2387_s0 + $0x124] sm:$0xf] }
  0x2b   :  { %v1487_v4 = vld [vmem:[%s2387_s0 + $0x120] sm:$0xf]  ;;  %273 = vst [vmem:[#allocation0 + $0x250] sm:$0xf] %v1485_v2  ;;  %278 = vst [vmem:[#allocation0 + $0x248] sm:$0xf] %v1486_v3 }
  0x2c   :  { %v825_v5 = vld [vmem:[#allocation0 + $0x43] ss:$8 sm:$0xf]   ;;  %283 = vst [vmem:[#allocation0 + $0x240] sm:$0xf] %v1487_v4 }
  0x2d   :  { %v1448_v6 = vld [vmem:[%s2387_s0 + $0x1bc] sm:$0xf]  ;;  %v829_v7 = vsel %vm642_vm0, %v827_v0, %v825_v5  ;;  %v1449_v8 = vld [vmem:[%s2387_s0 + $0x1b8] sm:$0xf]  ;;  %v1450_v9 = vld [vmem:[%s2387_s0 + $0x1b4] sm:$0xf] }
  0x2e   :  { %88 = vst [vmem:[#allocation0 + $0x378] sm:$0xf] %v1448_v6  ;;  %v1451_v10 = vld [vmem:[%s2387_s0 + $0x1b0] sm:$0xf]  ;;  %830 = vrot.lane.b32.xlu0 %v829_v7, %s1622_s10  ;;  %93 = vst [vmem:[#allocation0 + $0x370] sm:$0xf] %v1449_v8 }
  0x2f   :  { %v838_v11 = vld [vmem:[#allocation0 + $0x143] ss:$8 sm:$0xf0]   ;;  %98 = vst [vmem:[#allocation0 + $0x368] sm:$0xf] %v1450_v9 }
  0x30   :  { %103 = vst [vmem:[#allocation0 + $0x360] sm:$0xf] %v1451_v10  ;;  %v1452_v12 = vld [vmem:[%s2387_s0 + $0x1ac] sm:$0xf]  ;;  %v1453_v13 = vld [vmem:[%s2387_s0 + $0x1a8] sm:$0xf] }
  0x31   :  { %108 = vst [vmem:[#allocation0 + $0x358] sm:$0xf] %v1452_v12  ;;  %v1454_v14 = vld [vmem:[%s2387_s0 + $0x1a4] sm:$0xf]  ;;  %v1455_v15 = vld [vmem:[%s2387_s0 + $0x1a0] sm:$0xf] }
  0x32   :  { %v836_v16 = vld [vmem:[#allocation0 + $0x143] ss:$8 sm:$0xf]   ;;  %113 = vst [vmem:[#allocation0 + $0x350] sm:$0xf] %v1453_v13 }
  0x33   :  { %118 = vst [vmem:[#allocation0 + $0x348] sm:$0xf] %v1454_v14  ;;  %123 = vst [vmem:[#allocation0 + $0x340] sm:$0xf] %v1455_v15  ;;  %v1536_v17 = vld [vmem:[%s2387_s0 + $0x5c] sm:$0xf]  ;;  %v840_v18 = vsel %vm642_vm0, %v838_v11, %v836_v16 }
  0x34   :  { %v849_v19 = vld [vmem:[#allocation0 + $0x243] ss:$8 sm:$0xf0]   ;;  %528 = vst [vmem:[#allocation0 + $0xb8] sm:$0xf] %v1536_v17  ;;  %841 = vrot.lane.b32.xlu1 %v840_v18, %s1622_s10 }
  0x35   :  { %v1537_v20 = vld [vmem:[%s2387_s0 + $0x58] sm:$0xf]  ;;  %v1538_v21 = vld [vmem:[%s2387_s0 + $0x54] sm:$0xf]  ;;  %v1539_v22 = vld [vmem:[%s2387_s0 + $0x50] sm:$0xf] }
  0x36   :  { %533 = vst [vmem:[#allocation0 + $0xb0] sm:$0xf] %v1537_v20  ;;  %v1540_v23 = vld [vmem:[%s2387_s0 + $0x4c] sm:$0xf]  ;;  %538 = vst [vmem:[#allocation0 + $0xa8] sm:$0xf] %v1538_v21 }
  0x37   :  { %v847_v24 = vld [vmem:[#allocation0 + $0x243] ss:$8 sm:$0xf]   ;;  %543 = vst [vmem:[#allocation0 + $0xa0] sm:$0xf] %v1539_v22 }
  0x38   :  { %548 = vst [vmem:[#allocation0 + $0x98] sm:$0xf] %v1540_v23  ;;  %v1541_v25 = vld [vmem:[%s2387_s0 + $0x48] sm:$0xf]  ;;  %v851_v26 = vsel %vm642_vm0, %v849_v19, %v847_v24  ;;  %v1542_v27 = vld [vmem:[%s2387_s0 + $0x44] sm:$0xf] }
  0x39   :  { %553 = vst [vmem:[#allocation0 + $0x90] sm:$0xf] %v1541_v25  ;;  %v1543_v28 = vld [vmem:[%s2387_s0 + $0x40] sm:$0xf]  ;;  %v1504_v29 = vld [vmem:[%s2387_s0 + $0xdc] sm:$0xf]  ;;  %852 = vrot.lane.b32.xlu0 %v851_v26, %s1622_s10 }
  0x3a   :  { %v860_v30 = vld [vmem:[#allocation0 + $0x343] ss:$8 sm:$0xf0]   ;;  %558 = vst [vmem:[#allocation0 + $0x88] sm:$0xf] %v1542_v27 }
  0x3b   :  { %563 = vst [vmem:[#allocation0 + $0x80] sm:$0xf] %v1543_v28  ;;  %368 = vst [vmem:[#allocation0 + $0x1b8] sm:$0xf] %v1504_v29  ;;  %v1505_v31 = vld [vmem:[%s2387_s0 + $0xd8] sm:$0xf] }
  0x3c   :  { %373 = vst [vmem:[#allocation0 + $0x1b0] sm:$0xf] %v1505_v31  ;;  %v1506_v32 = vld [vmem:[%s2387_s0 + $0xd4] sm:$0xf]  ;;  %v1507_v33 = vld [vmem:[%s2387_s0 + $0xd0] sm:$0xf] }
  0x3d   :  { %v1508_v34 = vld [vmem:[%s2387_s0 + $0xcc] sm:$0xf]  ;;  %v858_v35 = vld [vmem:[#allocation0 + $0x343] ss:$8 sm:$0xf]  }
  0x3e   :  { %378 = vst [vmem:[#allocation0 + $0x1a8] sm:$0xf] %v1506_v32  ;;  %383 = vst [vmem:[#allocation0 + $0x1a0] sm:$0xf] %v1507_v33  ;;  %v1509_v36 = vld [vmem:[%s2387_s0 + $0xc8] sm:$0xf]  ;;  %v862_v37 = vsel %vm642_vm0, %v860_v30, %v858_v35 }
  0x3f   :  { %388 = vst [vmem:[#allocation0 + $0x198] sm:$0xf] %v1508_v34  ;;  %393 = vst [vmem:[#allocation0 + $0x190] sm:$0xf] %v1509_v36  ;;  %v1510_v38 = vld [vmem:[%s2387_s0 + $0xc4] sm:$0xf]  ;;  %863 = vrot.lane.b32.xlu1 %v862_v37, %s1622_s10 }
  0x40   :  { %v1511_v39 = vld [vmem:[%s2387_s0 + $0xc0] sm:$0xf]  ;;  %v1472_v40 = vld [vmem:[%s2387_s0 + $0x15c] sm:$0xf]  ;;  %398 = vst [vmem:[#allocation0 + $0x188] sm:$0xf] %v1510_v38 }
  0x41   :  { %403 = vst [vmem:[#allocation0 + $0x180] sm:$0xf] %v1511_v39  ;;  %208 = vst [vmem:[#allocation0 + $0x2b8] sm:$0xf] %v1472_v40  ;;  %v1473_v41 = vld [vmem:[%s2387_s0 + $0x158] sm:$0xf] }
  0x42   :  { %v1474_v42 = vld [vmem:[%s2387_s0 + $0x154] sm:$0xf]  ;;  %v1475_v43 = vld [vmem:[%s2387_s0 + $0x150] sm:$0xf]  ;;  %213 = vst [vmem:[#allocation0 + $0x2b0] sm:$0xf] %v1473_v41 }
  0x43   :  { %v871_v44 = vld [vmem:[#allocation0 + $0x83] ss:$8 sm:$0xf0]   ;;  %218 = vst [vmem:[#allocation0 + $0x2a8] sm:$0xf] %v1474_v42 }
  0x44   :  { %223 = vst [vmem:[#allocation0 + $0x2a0] sm:$0xf] %v1475_v43  ;;  %v1476_v45 = vld [vmem:[%s2387_s0 + $0x14c] sm:$0xf]  ;;  %v1477_v46 = vld [vmem:[%s2387_s0 + $0x148] sm:$0xf] }
  0x45   :  { %228 = vst [vmem:[#allocation0 + $0x298] sm:$0xf] %v1476_v45  ;;  %v1478_v47 = vld [vmem:[%s2387_s0 + $0x144] sm:$0xf]  ;;  %v1479_v48 = vld [vmem:[%s2387_s0 + $0x140] sm:$0xf] }
  0x46   :  { %v869_v49 = vld [vmem:[#allocation0 + $0x83] ss:$8 sm:$0xf]   ;;  %233 = vst [vmem:[#allocation0 + $0x290] sm:$0xf] %v1477_v46 }
  0x47   :  { %238 = vst [vmem:[#allocation0 + $0x288] sm:$0xf] %v1478_v47  ;;  %243 = vst [vmem:[#allocation0 + $0x280] sm:$0xf] %v1479_v48  ;;  %v1440_v50 = vld [vmem:[%s2387_s0 + $0x1dc] sm:$0xf]  ;;  %v873_v51 = vsel %vm642_vm0, %v871_v44, %v869_v49 }
  0x48   :  { %48 = vst [vmem:[#allocation0 + $0x3b8] sm:$0xf] %v1440_v50  ;;  %v1441_v52 = vld [vmem:[%s2387_s0 + $0x1d8] sm:$0xf]  ;;  %v1442_v53 = vld [vmem:[%s2387_s0 + $0x1d4] sm:$0xf]  ;;  %874 = vrot.lane.b32.xlu0 %v873_v51, %s1622_s10 }
  0x49   :  { %v1443_v54 = vld [vmem:[%s2387_s0 + $0x1d0] sm:$0xf]  ;;  %53 = vst [vmem:[#allocation0 + $0x3b0] sm:$0xf] %v1441_v52  ;;  %58 = vst [vmem:[#allocation0 + $0x3a8] sm:$0xf] %v1442_v53 }
  0x4a   :  { %v882_v55 = vld [vmem:[#allocation0 + $0x183] ss:$8 sm:$0xf0]   ;;  %63 = vst [vmem:[#allocation0 + $0x3a0] sm:$0xf] %v1443_v54 }
  0x4b   :  { %v1444_v56 = vld [vmem:[%s2387_s0 + $0x1cc] sm:$0xf]  ;;  %v1445_v57 = vld [vmem:[%s2387_s0 + $0x1c8] sm:$0xf]  ;;  %v1446_v58 = vld [vmem:[%s2387_s0 + $0x1c4] sm:$0xf] }
  0x4c   :  { %68 = vst [vmem:[#allocation0 + $0x398] sm:$0xf] %v1444_v56  ;;  %v1447_v59 = vld [vmem:[%s2387_s0 + $0x1c0] sm:$0xf]  ;;  %73 = vst [vmem:[#allocation0 + $0x390] sm:$0xf] %v1445_v57 }
  0x4d   :  { %v880_v60 = vld [vmem:[#allocation0 + $0x183] ss:$8 sm:$0xf]   ;;  %78 = vst [vmem:[#allocation0 + $0x388] sm:$0xf] %v1446_v58 }
  0x4e   :  { %83 = vst [vmem:[#allocation0 + $0x380] sm:$0xf] %v1447_v59  ;;  %v1528_v61 = vld [vmem:[%s2387_s0 + $0x7c] sm:$0xf]  ;;  %v884_v62 = vsel %vm642_vm0, %v882_v55, %v880_v60  ;;  %v1529_v0 = vld [vmem:[%s2387_s0 + $0x78] sm:$0xf] }
  0x4f   :  { %v893_v63 = vld [vmem:[#allocation0 + $0x283] ss:$8 sm:$0xf0]   ;;  %488 = vst [vmem:[#allocation0 + $0xf8] sm:$0xf] %v1528_v61  ;;  %885 = vrot.lane.b32.xlu1 %v884_v62, %s1622_s10 }
  0x50   :  { %493 = vst [vmem:[#allocation0 + $0xf0] sm:$0xf] %v1529_v0  ;;  %v1530_v1 = vld [vmem:[%s2387_s0 + $0x74] sm:$0xf]  ;;  %v1531_v2 = vld [vmem:[%s2387_s0 + $0x70] sm:$0xf] }
  0x51   :  { %v1532_v3 = vld [vmem:[%s2387_s0 + $0x6c] sm:$0xf]  ;;  %v891_v4 = vld [vmem:[#allocation0 + $0x283] ss:$8 sm:$0xf]  }
  0x52   :  { %498 = vst [vmem:[#allocation0 + $0xe8] sm:$0xf] %v1530_v1  ;;  %503 = vst [vmem:[#allocation0 + $0xe0] sm:$0xf] %v1531_v2  ;;  %v1533_v5 = vld [vmem:[%s2387_s0 + $0x68] sm:$0xf]  ;;  %v895_v6 = vsel %vm642_vm0, %v893_v63, %v891_v4 }
  0x53   :  { %508 = vst [vmem:[#allocation0 + $0xd8] sm:$0xf] %v1532_v3  ;;  %513 = vst [vmem:[#allocation0 + $0xd0] sm:$0xf] %v1533_v5  ;;  %v1534_v7 = vld [vmem:[%s2387_s0 + $0x64] sm:$0xf]  ;;  %896 = vrot.lane.b32.xlu0 %v895_v6, %s1622_s10 }
  0x54   :  { %v1535_v8 = vld [vmem:[%s2387_s0 + $0x60] sm:$0xf]  ;;  %v1496_v9 = vld [vmem:[%s2387_s0 + $0xfc] sm:$0xf]  ;;  %518 = vst [vmem:[#allocation0 + $0xc8] sm:$0xf] %v1534_v7 }
  0x55   :  { %v904_v10 = vld [vmem:[#allocation0 + $0x383] ss:$8 sm:$0xf0]   ;;  %523 = vst [vmem:[#allocation0 + $0xc0] sm:$0xf] %v1535_v8 }
  0x56   :  { %328 = vst [vmem:[#allocation0 + $0x1f8] sm:$0xf] %v1496_v9  ;;  %v1497_v11 = vld [vmem:[%s2387_s0 + $0xf8] sm:$0xf]  ;;  %v1498_v12 = vld [vmem:[%s2387_s0 + $0xf4] sm:$0xf] }
  0x57   :  { %333 = vst [vmem:[#allocation0 + $0x1f0] sm:$0xf] %v1497_v11  ;;  %v1499_v13 = vld [vmem:[%s2387_s0 + $0xf0] sm:$0xf]  ;;  %v1500_v14 = vld [vmem:[%s2387_s0 + $0xec] sm:$0xf] }
  0x58   :  { %v902_v15 = vld [vmem:[#allocation0 + $0x383] ss:$8 sm:$0xf]   ;;  %338 = vst [vmem:[#allocation0 + $0x1e8] sm:$0xf] %v1498_v12 }
  0x59   :  { %343 = vst [vmem:[#allocation0 + $0x1e0] sm:$0xf] %v1499_v13  ;;  %348 = vst [vmem:[#allocation0 + $0x1d8] sm:$0xf] %v1500_v14  ;;  %v1501_v16 = vld [vmem:[%s2387_s0 + $0xe8] sm:$0xf]  ;;  %v906_v17 = vsel %vm642_vm0, %v904_v10, %v902_v15 }
  0x5a   :  { %353 = vst [vmem:[#allocation0 + $0x1d0] sm:$0xf] %v1501_v16  ;;  %v1502_v18 = vld [vmem:[%s2387_s0 + $0xe4] sm:$0xf]  ;;  %v1503_v19 = vld [vmem:[%s2387_s0 + $0xe0] sm:$0xf]  ;;  %907 = vrot.lane.b32.xlu1 %v906_v17, %s1622_s10 }
  0x5b   :  { %v1464_v20 = vld [vmem:[%s2387_s0 + $0x17c] sm:$0xf]  ;;  %358 = vst [vmem:[#allocation0 + $0x1c8] sm:$0xf] %v1502_v18  ;;  %363 = vst [vmem:[#allocation0 + $0x1c0] sm:$0xf] %v1503_v19 }
  0x5c   :  { %168 = vst [vmem:[#allocation0 + $0x2f8] sm:$0xf] %v1464_v20  ;;  %v1465_v21 = vld [vmem:[%s2387_s0 + $0x178] sm:$0xf]  ;;  %v1466_v22 = vld [vmem:[%s2387_s0 + $0x174] sm:$0xf] }
  0x5d   :  { %v1467_v23 = vld [vmem:[%s2387_s0 + $0x170] sm:$0xf]  ;;  %173 = vst [vmem:[#allocation0 + $0x2f0] sm:$0xf] %v1465_v21  ;;  %178 = vst [vmem:[#allocation0 + $0x2e8] sm:$0xf] %v1466_v22 }
  0x5e   :  { %v915_v24 = vld [vmem:[#allocation0 + $0xc3] ss:$8 sm:$0xf0]   ;;  %183 = vst [vmem:[#allocation0 + $0x2e0] sm:$0xf] %v1467_v23 }
  0x5f   :  { %v1468_v25 = vld [vmem:[%s2387_s0 + $0x16c] sm:$0xf]  ;;  %v1469_v26 = vld [vmem:[%s2387_s0 + $0x168] sm:$0xf]  ;;  %v1470_v27 = vld [vmem:[%s2387_s0 + $0x164] sm:$0xf] }
  0x60   :  { %188 = vst [vmem:[#allocation0 + $0x2d8] sm:$0xf] %v1468_v25  ;;  %v1471_v28 = vld [vmem:[%s2387_s0 + $0x160] sm:$0xf]  ;;  %193 = vst [vmem:[#allocation0 + $0x2d0] sm:$0xf] %v1469_v26 }
  0x61   :  { %v913_v29 = vld [vmem:[#allocation0 + $0xc3] ss:$8 sm:$0xf]   ;;  %198 = vst [vmem:[#allocation0 + $0x2c8] sm:$0xf] %v1470_v27 }
  0x62   :  { %203 = vst [vmem:[#allocation0 + $0x2c0] sm:$0xf] %v1471_v28  ;;  %v1432_v30 = vld [vmem:[%s2387_s0 + $0x1fc] sm:$0xf]  ;;  %v917_v31 = vsel %vm642_vm0, %v915_v24, %v913_v29  ;;  %v1433_v32 = vld [vmem:[%s2387_s0 + $0x1f8] sm:$0xf] }
  0x63   :  { %8 = vst [vmem:[#allocation0 + $0x3f8] sm:$0xf] %v1432_v30  ;;  %v1434_v33 = vld [vmem:[%s2387_s0 + $0x1f4] sm:$0xf]  ;;  %v1435_v34 = vld [vmem:[%s2387_s0 + $0x1f0] sm:$0xf]  ;;  %918 = vrot.lane.b32.xlu0 %v917_v31, %s1622_s10 }
  0x64   :  { %v926_v35 = vld [vmem:[#allocation0 + $0x1c3] ss:$8 sm:$0xf0]   ;;  %13 = vst [vmem:[#allocation0 + $0x3f0] sm:$0xf] %v1433_v32 }
  0x65   :  { %18 = vst [vmem:[#allocation0 + $0x3e8] sm:$0xf] %v1434_v33  ;;  %23 = vst [vmem:[#allocation0 + $0x3e0] sm:$0xf] %v1435_v34  ;;  %v1436_v36 = vld [vmem:[%s2387_s0 + $0x1ec] sm:$0xf] }
  0x66   :  { %28 = vst [vmem:[#allocation0 + $0x3d8] sm:$0xf] %v1436_v36  ;;  %v1437_v37 = vld [vmem:[%s2387_s0 + $0x1e8] sm:$0xf]  ;;  %v1438_v38 = vld [vmem:[%s2387_s0 + $0x1e4] sm:$0xf] }
  0x67   :  { %v1439_v39 = vld [vmem:[%s2387_s0 + $0x1e0] sm:$0xf]  ;;  %33 = vst [vmem:[#allocation0 + $0x3d0] sm:$0xf] %v1437_v37  ;;  %38 = vst [vmem:[#allocation0 + $0x3c8] sm:$0xf] %v1438_v38 }
  0x68   :  { %v924_v40 = vld [vmem:[#allocation0 + $0x1c3] ss:$8 sm:$0xf]   ;;  %43 = vst [vmem:[#allocation0 + $0x3c0] sm:$0xf] %v1439_v39  ;;  %s1623_s0 = smov 64  }
  0x69   :  { %v928_v41 = vsel %vm642_vm0, %v926_v35, %v924_v40  ;;  %v937_v42 = vld [vmem:[#allocation0 + $0x2c3] ss:$8 sm:$0xf0]   ;;  %v957_v43 = vld [vmem:[#allocation0 + $0x2] ss:$8 sm:$0xf]  }
  0x6a   :  { %929 = vrot.lane.b32.xlu1 %v928_v41, %s1622_s10  ;;  %v935_v44 = vld [vmem:[#allocation0 + $0x2c3] ss:$8 sm:$0xf]   ;;  %v959_v45 = vld [vmem:[#allocation0 + $0x2] ss:$8 sm:$0xf0]  }
  0x6b   :  { %v939_v46 = vsel %vm642_vm0, %v937_v42, %v935_v44  ;;  %v967_v48 = vld [vmem:[#allocation0 + $0x102] ss:$8 sm:$0xf]   ;;  %v961_v49 = vsel %vm642_vm0, %v959_v45, %v957_v43  ;;  %v1132_v29 = vld [vmem:[#allocation0 + $0x1] ss:$8 sm:$0xf]  }
  0x6c   :  { %940 = vrot.lane.b32.xlu0 %v939_v46, %s1622_s10  ;;  %v948_v47 = vld [vmem:[#allocation0 + $0x3c3] ss:$8 sm:$0xf0]   ;;  %v969_v50 = vld [vmem:[#allocation0 + $0x102] ss:$8 sm:$0xf0]  }
  0x6d   :  { %v978_v51 = vld [vmem:[#allocation0 + $0x202] ss:$8 sm:$0xf]   ;;  %v971_v55 = vsel %vm642_vm0, %v969_v50, %v967_v48  ;;  %v1134_v32 = vld [vmem:[#allocation0 + $0x1] ss:$8 sm:$0xf0]  }
  0x6e   :  { %v980_v53 = vld [vmem:[#allocation0 + $0x202] ss:$8 sm:$0xf0]   ;;  %v640_v33 = vld [vmem:[#allocation0] ss:$8 sm:$0xf]  }
  0x6f   :  { %v946_v52 = vld [vmem:[#allocation0 + $0x3c3] ss:$8 sm:$0xf]   ;;  %v982_v56 = vsel %vm642_vm0, %v980_v53, %v978_v51  ;;  %v989_v57 = vld [vmem:[#allocation0 + $0x302] ss:$8 sm:$0xf]  }
  0x70   :  { %v950_v54 = vsel %vm642_vm0, %v948_v47, %v946_v52  ;;  %962 = vrot.lane.b32.xlu0 %v961_v49, %s1623_s0  ;;  %v991_v58 = vld [vmem:[#allocation0 + $0x302] ss:$8 sm:$0xf0]   ;;  %v641_v34 = vld [vmem:[#allocation0] ss:$8 sm:$0xf0]   ;;  %v1136_v47 = vsel %vm642_vm0, %v1134_v32, %v1132_v29 }
  0x71   :  { %951 = vrot.lane.b32.xlu1 %v950_v54, %s1622_s10  ;;  %v1000_v59 = vld [vmem:[#allocation0 + $0x42] ss:$8 sm:$0xf]   ;;  %v993_v61 = vsel %vm642_vm0, %v991_v58, %v989_v57  ;;  %v710_v35 = vld [vmem:[#allocation0 + $0x200] ss:$8 sm:$0xf]   ;;  %v643_v36 = vsel %vm642_vm0, %v641_v34, %v640_v33 }
  0x72   :  { %v1002_v60 = vld [vmem:[#allocation0 + $0x42] ss:$8 sm:$0xf0]   ;;  %v712_v37 = vld [vmem:[#allocation0 + $0x200] ss:$8 sm:$0xf0]  }
  0x73   :  { %v1004_v62 = vsel %vm642_vm0, %v1002_v60, %v1000_v59  ;;  %v1011_v63 = vld [vmem:[#allocation0 + $0x142] ss:$8 sm:$0xf]   ;;  %v674_v38 = vld [vmem:[#allocation0 + $0x100] ss:$8 sm:$0xf]   ;;  %v714_v43 = vsel %vm642_vm0, %v712_v37, %v710_v35 }
  0x74   :  { %983 = vrot.lane.b32.xlu0 %v982_v56, %s1623_s0  ;;  %v1013_v0 = vld [vmem:[#allocation0 + $0x142] ss:$8 sm:$0xf0]   ;;  %v1142_v39 = vld [vmem:[#allocation0 + $0x101] ss:$8 sm:$0xf]  }
  0x75   :  { %972 = vrot.lane.b32.xlu1 %v971_v55, %s1623_s0  ;;  %v1022_v1 = vld [vmem:[#allocation0 + $0x242] ss:$8 sm:$0xf]   ;;  %v1015_v3 = vsel %vm642_vm0, %v1013_v0, %v1011_v63  ;;  %v1144_v40 = vld [vmem:[#allocation0 + $0x101] ss:$8 sm:$0xf0]  }
  0x76   :  { %v1024_v2 = vld [vmem:[#allocation0 + $0x242] ss:$8 sm:$0xf0]   ;;  %v1153_v41 = vld [vmem:[#allocation0 + $0x201] ss:$8 sm:$0xf]   ;;  %v1146_v0 = vsel %vm642_vm0, %v1144_v40, %v1142_v39 }
  0x77   :  { %v1026_v4 = vsel %vm642_vm0, %v1024_v2, %v1022_v1  ;;  %v1033_v5 = vld [vmem:[#allocation0 + $0x342] ss:$8 sm:$0xf]   ;;  %v1155_v42 = vld [vmem:[#allocation0 + $0x201] ss:$8 sm:$0xf0]  }
  0x78   :  { %1005 = vrot.lane.b32.xlu0 %v1004_v62, %s1623_s0  ;;  %v1035_v6 = vld [vmem:[#allocation0 + $0x342] ss:$8 sm:$0xf0]   ;;  %645 = vst.msk [vmem:[%s2388_s1] sm:$0xff] %vm644_vm1, %v643_v36   ;;  %1566 = vst.msk [vmem:[%s2388_s1 + $0x40] sm:$0xff] %vm644_vm1, %v714_v43   ;;  %v1157_v1 = vsel %vm642_vm0, %v1155_v42, %v1153_v41 }
  0x79   :  { %994 = vrot.lane.b32.xlu1 %v993_v61, %s1623_s0  ;;  %v1044_v7 = vld [vmem:[#allocation0 + $0x82] ss:$8 sm:$0xf]   ;;  %v1037_v9 = vsel %vm642_vm0, %v1035_v6, %v1033_v5  ;;  %v676_v44 = vld [vmem:[#allocation0 + $0x100] ss:$8 sm:$0xf0]  }
  0x7a   :  { %v1046_v8 = vld [vmem:[#allocation0 + $0x82] ss:$8 sm:$0xf0]   ;;  %v746_v45 = vld [vmem:[#allocation0 + $0x300] ss:$8 sm:$0xf]   ;;  %v678_v48 = vsel %vm642_vm0, %v676_v44, %v674_v38 }
  0x7b   :  { %v1048_v10 = vsel %vm642_vm0, %v1046_v8, %v1044_v7  ;;  %v1055_v11 = vld [vmem:[#allocation0 + $0x182] ss:$8 sm:$0xf]   ;;  %v748_v49 = vld [vmem:[#allocation0 + $0x300] ss:$8 sm:$0xf0]  }
  0x7c   :  { %1027 = vrot.lane.b32.xlu0 %v1026_v4, %s1623_s0  ;;  %v1057_v12 = vld [vmem:[#allocation0 + $0x182] ss:$8 sm:$0xf0]   ;;  %v647_v50 = vld [vmem:[#allocation0 + $0x40] ss:$8 sm:$0xf]   ;;  %v750_v51 = vsel %vm642_vm0, %v748_v49, %v746_v45 }
  0x7d   :  { %1016 = vrot.lane.b32.xlu1 %v1015_v3, %s1623_s0  ;;  %v1066_v13 = vld [vmem:[#allocation0 + $0x282] ss:$8 sm:$0xf]   ;;  %v1059_v15 = vsel %vm642_vm0, %v1057_v12, %v1055_v11  ;;  %1562 = vst.msk [vmem:[%s2388_s1 + $0x20] sm:$0xff] %vm644_vm1, %v678_v48   ;;  %1570 = vst.msk [vmem:[%s2388_s1 + $0x60] sm:$0xff] %vm644_vm1, %v750_v51  }
  0x7e   :  { %v1068_v14 = vld [vmem:[#allocation0 + $0x282] ss:$8 sm:$0xf0]   ;;  %v649_v52 = vld [vmem:[#allocation0 + $0x40] ss:$8 sm:$0xf0]  }
  0x7f   :  { %v1070_v16 = vsel %vm642_vm0, %v1068_v14, %v1066_v13  ;;  %v1077_v17 = vld [vmem:[#allocation0 + $0x382] ss:$8 sm:$0xf]   ;;  %v683_v53 = vld [vmem:[#allocation0 + $0x140] ss:$8 sm:$0xf]   ;;  %v651_v54 = vsel %vm642_vm0, %v649_v52, %v647_v50 }
  0x80   :  { %1049 = vrot.lane.b32.xlu0 %v1048_v10, %s1623_s0  ;;  %v1079_v18 = vld [vmem:[#allocation0 + $0x382] ss:$8 sm:$0xf0]   ;;  %v685_v55 = vld [vmem:[#allocation0 + $0x140] ss:$8 sm:$0xf0]  }
  0x81   :  { %1038 = vrot.lane.b32.xlu1 %v1037_v9, %s1623_s0  ;;  %v1088_v19 = vld [vmem:[#allocation0 + $0xc2] ss:$8 sm:$0xf]   ;;  %v1081_v21 = vsel %vm642_vm0, %v1079_v18, %v1077_v17  ;;  %v719_v56 = vld [vmem:[#allocation0 + $0x240] ss:$8 sm:$0xf]   ;;  %v687_v61 = vsel %vm642_vm0, %v685_v55, %v683_v53 }
  0x82   :  { %v1090_v20 = vld [vmem:[#allocation0 + $0xc2] ss:$8 sm:$0xf0]   ;;  %v1164_v57 = vld [vmem:[#allocation0 + $0x301] ss:$8 sm:$0xf]  }
  0x83   :  { %v1092_v22 = vsel %vm642_vm0, %v1090_v20, %v1088_v19  ;;  %v1099_v23 = vld [vmem:[#allocation0 + $0x1c2] ss:$8 sm:$0xf]   ;;  %v1166_v58 = vld [vmem:[#allocation0 + $0x301] ss:$8 sm:$0xf0]  }
  0x84   :  { %1071 = vrot.lane.b32.xlu0 %v1070_v16, %s1623_s0  ;;  %v1101_v24 = vld [vmem:[#allocation0 + $0x1c2] ss:$8 sm:$0xf0]   ;;  %v1175_v59 = vld [vmem:[#allocation0 + $0x41] ss:$8 sm:$0xf]   ;;  %v1168_v18 = vsel %vm642_vm0, %v1166_v58, %v1164_v57 }
  0x85   :  { %1060 = vrot.lane.b32.xlu1 %v1059_v15, %s1623_s0  ;;  %v1110_v25 = vld [vmem:[#allocation0 + $0x2c2] ss:$8 sm:$0xf]   ;;  %v1103_v30 = vsel %vm642_vm0, %v1101_v24, %v1099_v23  ;;  %v1177_v60 = vld [vmem:[#allocation0 + $0x41] ss:$8 sm:$0xf0]  }
  0x86   :  { %v1112_v26 = vld [vmem:[#allocation0 + $0x2c2] ss:$8 sm:$0xf0]   ;;  %1559 = vst.msk [vmem:[%s2388_s1 + $0x8] sm:$0xff] %vm644_vm1, %v651_v54   ;;  %1563 = vst.msk [vmem:[%s2388_s1 + $0x28] sm:$0xff] %vm644_vm1, %v687_v61   ;;  %v1179_v19 = vsel %vm642_vm0, %v1177_v60, %v1175_v59 }
  0x87   :  { %v1121_v27 = vld [vmem:[#allocation0 + $0x3c2] ss:$8 sm:$0xf]   ;;  %v1114_v31 = vsel %vm642_vm0, %v1112_v26, %v1110_v25  ;;  %v721_v62 = vld [vmem:[#allocation0 + $0x240] ss:$8 sm:$0xf0]   ;;  %v788_v59 = vpop.permute.xlu0 %787  }
  0x88   :  { %1093 = vrot.lane.b32.xlu0 %v1092_v22, %s1623_s0  ;;  %v1123_v28 = vld [vmem:[#allocation0 + $0x3c2] ss:$8 sm:$0xf0]   ;;  %v755_v63 = vld [vmem:[#allocation0 + $0x340] ss:$8 sm:$0xf]   ;;  %v723_v2 = vsel %vm642_vm0, %v721_v62, %v719_v56 }
  0x89   :  { %1082 = vrot.lane.b32.xlu1 %v1081_v21, %s1623_s0  ;;  %v1125_v46 = vsel %vm642_vm0, %v1123_v28, %v1121_v27  ;;  %v757_v3 = vld [vmem:[#allocation0 + $0x340] ss:$8 sm:$0xf0]   ;;  %1567 = vst.msk [vmem:[%s2388_s1 + $0x48] sm:$0xff] %vm644_vm1, %v723_v2  }
  0x8a   :  { %v656_v4 = vld [vmem:[#allocation0 + $0x80] ss:$8 sm:$0xf]   ;;  %v759_v5 = vsel %vm642_vm0, %v757_v3, %v755_v63  ;;  %v1186_v11 = vld [vmem:[#allocation0 + $0x141] ss:$8 sm:$0xf]  }
  0x8b   :  { %v658_v6 = vld [vmem:[#allocation0 + $0x80] ss:$8 sm:$0xf0]   ;;  %1571 = vst.msk [vmem:[%s2388_s1 + $0x68] sm:$0xff] %vm644_vm1, %v759_v5  }
  0x8c   :  { %1115 = vrot.lane.b32.xlu0 %v1114_v31, %s1623_s0  ;;  %v692_v7 = vld [vmem:[#allocation0 + $0x180] ss:$8 sm:$0xf]   ;;  %v660_v8 = vsel %vm642_vm0, %v658_v6, %v656_v4  ;;  %v1188_v12 = vld [vmem:[#allocation0 + $0x141] ss:$8 sm:$0xf0]  }
  0x8d   :  { %1104 = vrot.lane.b32.xlu1 %v1103_v30, %s1623_s0  ;;  %v694_v9 = vld [vmem:[#allocation0 + $0x180] ss:$8 sm:$0xf0]   ;;  %v1197_v13 = vld [vmem:[#allocation0 + $0x241] ss:$8 sm:$0xf]   ;;  %v1190_v33 = vsel %vm642_vm0, %v1188_v12, %v1186_v11 }
  0x8e   :  { %v728_v10 = vld [vmem:[#allocation0 + $0x280] ss:$8 sm:$0xf]   ;;  %v1199_v14 = vld [vmem:[#allocation0 + $0x241] ss:$8 sm:$0xf0]   ;;  %v696_v15 = vsel %vm642_vm0, %v694_v9, %v692_v7 }
  0x8f   :  { %1560 = vst.msk [vmem:[%s2388_s1 + $0x10] sm:$0xff] %vm644_vm1, %v660_v8   ;;  %v730_v16 = vld [vmem:[#allocation0 + $0x280] ss:$8 sm:$0xf0]   ;;  %1564 = vst.msk [vmem:[%s2388_s1 + $0x30] sm:$0xff] %vm644_vm1, %v696_v15   ;;  %v1201_v34 = vsel %vm642_vm0, %v1199_v14, %v1197_v13 }
  0x90   :  { %1137 = vrot.lane.b32.xlu0 %v1136_v47, %s1624_s16  ;;  %v764_v17 = vld [vmem:[#allocation0 + $0x380] ss:$8 sm:$0xf]   ;;  %v732_v20 = vsel %vm642_vm0, %v730_v16, %v728_v10  ;;  %v1208_v29 = vld [vmem:[#allocation0 + $0x341] ss:$8 sm:$0xf]   ;;  %v798_v2 = vpop.permute.xlu0 %797  }
  0x91   :  { %1126 = vrot.lane.b32.xlu1 %v1125_v46, %s1623_s0  ;;  %v766_v21 = vld [vmem:[#allocation0 + $0x380] ss:$8 sm:$0xf0]   ;;  %1568 = vst.msk [vmem:[%s2388_s1 + $0x50] sm:$0xff] %vm644_vm1, %v732_v20  }
  0x92   :  { %v665_v22 = vld [vmem:[#allocation0 + $0xc0] ss:$8 sm:$0xf]   ;;  %v768_v23 = vsel %vm642_vm0, %v766_v21, %v764_v17  ;;  %v1210_v35 = vld [vmem:[#allocation0 + $0x341] ss:$8 sm:$0xf0]  }
  0x93   :  { %v667_v24 = vld [vmem:[#allocation0 + $0xc0] ss:$8 sm:$0xf0]   ;;  %1572 = vst.msk [vmem:[%s2388_s1 + $0x70] sm:$0xff] %vm644_vm1, %v768_v23   ;;  %v1212_v41 = vsel %vm642_vm0, %v1210_v35, %v1208_v29 }
  0x94   :  { %1158 = vrot.lane.b32.xlu0 %v1157_v1, %s1624_s16  ;;  %v701_v25 = vld [vmem:[#allocation0 + $0x1c0] ss:$8 sm:$0xf]   ;;  %v669_v26 = vsel %vm642_vm0, %v667_v24, %v665_v22  ;;  %v1219_v38 = vld [vmem:[#allocation0 + $0x81] ss:$8 sm:$0xf]  }
  0x95   :  { %1147 = vrot.lane.b32.xlu1 %v1146_v0, %s1624_s16  ;;  %v703_v27 = vld [vmem:[#allocation0 + $0x1c0] ss:$8 sm:$0xf0]   ;;  %1561 = vst.msk [vmem:[%s2388_s1 + $0x18] sm:$0xff] %vm644_vm1, %v669_v26   ;;  %v809_v0 = vpop.permute.xlu1 %808  }
  0x96   :  { %v737_v28 = vld [vmem:[#allocation0 + $0x2c0] ss:$8 sm:$0xf]   ;;  %v705_v30 = vsel %vm642_vm0, %v703_v27, %v701_v25  ;;  %v1221_v39 = vld [vmem:[#allocation0 + $0x81] ss:$8 sm:$0xf0]  }
  0x97   :  { %v739_v31 = vld [vmem:[#allocation0 + $0x2c0] ss:$8 sm:$0xf0]   ;;  %1565 = vst.msk [vmem:[%s2388_s1 + $0x38] sm:$0xff] %vm644_vm1, %v705_v30   ;;  %v1223_v42 = vsel %vm642_vm0, %v1221_v39, %v1219_v38 }
  0x98   :  { %1180 = vrot.lane.b32.xlu0 %v1179_v19, %s1624_s16  ;;  %v773_v32 = vld [vmem:[#allocation0 + $0x3c0] ss:$8 sm:$0xf]   ;;  %v741_v36 = vsel %vm642_vm0, %v739_v31, %v737_v28  ;;  %v1230_v43 = vld [vmem:[#allocation0 + $0x181] ss:$8 sm:$0xf]  }
  0x99   :  { %1169 = vrot.lane.b32.xlu1 %v1168_v18, %s1624_s16  ;;  %v775_v37 = vld [vmem:[#allocation0 + $0x3c0] ss:$8 sm:$0xf0]   ;;  %1569 = vst.msk [vmem:[%s2388_s1 + $0x58] sm:$0xff] %vm644_vm1, %v741_v36   ;;  %v820_v3 = vpop.permute.xlu1 %819  }
  0x9a   :  { %v777_v40 = vsel %vm642_vm0, %v775_v37, %v773_v32  ;;  %v1232_v44 = vld [vmem:[#allocation0 + $0x181] ss:$8 sm:$0xf0]   ;;  %790 = vst.msk [vmem:[%s2388_s1] sm:$0xff] %vm789_vm2, %v788_v59   ;;  %1575 = vst.msk [vmem:[%s2388_s1 + $0x40] sm:$0xff] %vm789_vm2, %v809_v0  }
  0x9b   :  { %1573 = vst.msk [vmem:[%s2388_s1 + $0x78] sm:$0xff] %vm644_vm1, %v777_v40   ;;  %v1241_v45 = vld [vmem:[#allocation0 + $0x281] ss:$8 sm:$0xf]   ;;  %v1234_v47 = vsel %vm642_vm0, %v1232_v44, %v1230_v43 }
  0x9c   :  { %1202 = vrot.lane.b32.xlu0 %v1201_v34, %s1624_s16  ;;  %v1243_v46 = vld [vmem:[#allocation0 + $0x281] ss:$8 sm:$0xf0]   ;;  %1574 = vst.msk [vmem:[%s2388_s1 + $0x20] sm:$0xff] %vm789_vm2, %v798_v2   ;;  %1576 = vst.msk [vmem:[%s2388_s1 + $0x60] sm:$0xff] %vm789_vm2, %v820_v3  }
  0x9d   :  { %1191 = vrot.lane.b32.xlu1 %v1190_v33, %s1624_s16  ;;  %v1245_v48 = vsel %vm642_vm0, %v1243_v46, %v1241_v45  ;;  %v1252_v49 = vld [vmem:[#allocation0 + $0x381] ss:$8 sm:$0xf]  }
  0x9e   :  { %v1254_v50 = vld [vmem:[#allocation0 + $0x381] ss:$8 sm:$0xf0]  }
  0x9f   :  { %v1263_v51 = vld [vmem:[#allocation0 + $0xc1] ss:$8 sm:$0xf]   ;;  %v1256_v53 = vsel %vm642_vm0, %v1254_v50, %v1252_v49 }
  0xa0   :  { %1224 = vrot.lane.b32.xlu0 %v1223_v42, %s1624_s16  ;;  %v1265_v52 = vld [vmem:[#allocation0 + $0xc1] ss:$8 sm:$0xf0]   ;;  %v831_v4 = vpop.permute.xlu0 %830  }
  0xa1   :  { %1213 = vrot.lane.b32.xlu1 %v1212_v41, %s1624_s16  ;;  %v1267_v54 = vsel %vm642_vm0, %v1265_v52, %v1263_v51  ;;  %v1274_v55 = vld [vmem:[#allocation0 + $0x1c1] ss:$8 sm:$0xf]   ;;  %1577 = vst.msk [vmem:[%s2388_s1 + $0x8] sm:$0xff] %vm789_vm2, %v831_v4  }
  0xa2   :  { %v1276_v56 = vld [vmem:[#allocation0 + $0x1c1] ss:$8 sm:$0xf0]  }
  0xa3   :  { %v1285_v57 = vld [vmem:[#allocation0 + $0x2c1] ss:$8 sm:$0xf]   ;;  %v1278_v60 = vsel %vm642_vm0, %v1276_v56, %v1274_v55 }
  0xa4   :  { %1246 = vrot.lane.b32.xlu0 %v1245_v48, %s1624_s16  ;;  %v1287_v58 = vld [vmem:[#allocation0 + $0x2c1] ss:$8 sm:$0xf0]  }
  0xa5   :  { %1235 = vrot.lane.b32.xlu1 %v1234_v47, %s1624_s16  ;;  %v1289_v61 = vsel %vm642_vm0, %v1287_v58, %v1285_v57  ;;  %v1296_v62 = vld [vmem:[#allocation0 + $0x3c1] ss:$8 sm:$0xf]  }
  0xa6   :  { %v1298_v63 = vld [vmem:[#allocation0 + $0x3c1] ss:$8 sm:$0xf0]   ;;  %v842_v5 = vpop.permute.xlu1 %841  }
  0xa7   :  { %v1300_v1 = vsel %vm642_vm0, %v1298_v63, %v1296_v62  ;;  %1578 = vst.msk [vmem:[%s2388_s1 + $0x28] sm:$0xff] %vm789_vm2, %v842_v5  }
  0xa8   :  { %1268 = vrot.lane.b32.xlu0 %v1267_v54, %s1624_s16 }
  0xa9   :  { %1257 = vrot.lane.b32.xlu1 %v1256_v53, %s1624_s16 }
  0xab   :  { %v853_v6 = vpop.permute.xlu0 %852  }
  0xac   :  { %1290 = vrot.lane.b32.xlu0 %v1289_v61, %s1624_s16  ;;  %1579 = vst.msk [vmem:[%s2388_s1 + $0x48] sm:$0xff] %vm789_vm2, %v853_v6  }
  0xad   :  { %1279 = vrot.lane.b32.xlu1 %v1278_v60, %s1624_s16 }
  0xb1   :  { %1301 = vrot.lane.b32.xlu1 %v1300_v1, %s1624_s16  ;;  %v864_v7 = vpop.permute.xlu1 %863  }
  0xb2   :  { %1580 = vst.msk [vmem:[%s2388_s1 + $0x68] sm:$0xff] %vm789_vm2, %v864_v7  }
  0xba   :  { %v875_v8 = vpop.permute.xlu0 %874  }
  0xbb   :  { %1581 = vst.msk [vmem:[%s2388_s1 + $0x10] sm:$0xff] %vm789_vm2, %v875_v8  }
  0xc1   :  { %v886_v9 = vpop.permute.xlu1 %885  }
  0xc2   :  { %1582 = vst.msk [vmem:[%s2388_s1 + $0x30] sm:$0xff] %vm789_vm2, %v886_v9  }
  0xc5   :  { %v897_v10 = vpop.permute.xlu0 %896  }
  0xc6   :  { %1583 = vst.msk [vmem:[%s2388_s1 + $0x50] sm:$0xff] %vm789_vm2, %v897_v10  }
  0xcc   :  { %v908_v11 = vpop.permute.xlu1 %907  }
  0xcd   :  { %1584 = vst.msk [vmem:[%s2388_s1 + $0x70] sm:$0xff] %vm789_vm2, %v908_v11  }
  0xd5   :  { %v919_v12 = vpop.permute.xlu0 %918  }
  0xd6   :  { %1585 = vst.msk [vmem:[%s2388_s1 + $0x18] sm:$0xff] %vm789_vm2, %v919_v12  }
  0xdc   :  { %v930_v13 = vpop.permute.xlu1 %929  }
  0xdd   :  { %1586 = vst.msk [vmem:[%s2388_s1 + $0x38] sm:$0xff] %vm789_vm2, %v930_v13  }
  0xde   :  { %v941_v14 = vpop.permute.xlu0 %940  }
  0xdf   :  { %1587 = vst.msk [vmem:[%s2388_s1 + $0x58] sm:$0xff] %vm789_vm2, %v941_v14  }
  0xe2   :  { %v963_v16 = vpop.permute.xlu0 %962  }
  0xe3   :  { %v952_v15 = vpop.permute.xlu1 %951   ;;  %965 = vst.msk [vmem:[%s2388_s1] sm:$0xff] %vm964_vm3, %v963_v16  }
  0xe4   :  { %1588 = vst.msk [vmem:[%s2388_s1 + $0x78] sm:$0xff] %vm789_vm2, %v952_v15  }
  0xe6   :  { %v984_v18 = vpop.permute.xlu0 %983  }
  0xe7   :  { %v973_v17 = vpop.permute.xlu1 %972   ;;  %1590 = vst.msk [vmem:[%s2388_s1 + $0x40] sm:$0xff] %vm964_vm3, %v984_v18  }
  0xe8   :  { %1589 = vst.msk [vmem:[%s2388_s1 + $0x20] sm:$0xff] %vm964_vm3, %v973_v17  }
  0xea   :  { %v1006_v20 = vpop.permute.xlu0 %1005  }
  0xeb   :  { %v995_v19 = vpop.permute.xlu1 %994   ;;  %1592 = vst.msk [vmem:[%s2388_s1 + $0x8] sm:$0xff] %vm964_vm3, %v1006_v20  }
  0xec   :  { %1591 = vst.msk [vmem:[%s2388_s1 + $0x60] sm:$0xff] %vm964_vm3, %v995_v19  }
  0xee   :  { %v1028_v22 = vpop.permute.xlu0 %1027  }
  0xef   :  { %v1017_v21 = vpop.permute.xlu1 %1016   ;;  %1594 = vst.msk [vmem:[%s2388_s1 + $0x48] sm:$0xff] %vm964_vm3, %v1028_v22  }
  0xf0   :  { %1593 = vst.msk [vmem:[%s2388_s1 + $0x28] sm:$0xff] %vm964_vm3, %v1017_v21  }
  0xf2   :  { %v1050_v24 = vpop.permute.xlu0 %1049  }
  0xf3   :  { %v1039_v23 = vpop.permute.xlu1 %1038   ;;  %1596 = vst.msk [vmem:[%s2388_s1 + $0x10] sm:$0xff] %vm964_vm3, %v1050_v24  }
  0xf4   :  { %1595 = vst.msk [vmem:[%s2388_s1 + $0x68] sm:$0xff] %vm964_vm3, %v1039_v23  }
  0xf6   :  { %v1072_v26 = vpop.permute.xlu0 %1071  }
  0xf7   :  { %v1061_v25 = vpop.permute.xlu1 %1060   ;;  %1598 = vst.msk [vmem:[%s2388_s1 + $0x50] sm:$0xff] %vm964_vm3, %v1072_v26  }
  0xf8   :  { %1597 = vst.msk [vmem:[%s2388_s1 + $0x30] sm:$0xff] %vm964_vm3, %v1061_v25  }
  0xfa   :  { %v1094_v28 = vpop.permute.xlu0 %1093  }
  0xfb   :  { %v1083_v27 = vpop.permute.xlu1 %1082   ;;  %1600 = vst.msk [vmem:[%s2388_s1 + $0x18] sm:$0xff] %vm964_vm3, %v1094_v28  }
  0xfc   :  { %1599 = vst.msk [vmem:[%s2388_s1 + $0x70] sm:$0xff] %vm964_vm3, %v1083_v27  }
  0xfe   :  { %v1116_v30 = vpop.permute.xlu0 %1115  }
  0xff   :  { %v1105_v29 = vpop.permute.xlu1 %1104   ;;  %1602 = vst.msk [vmem:[%s2388_s1 + $0x58] sm:$0xff] %vm964_vm3, %v1116_v30  }
 0x100   :  { %1601 = vst.msk [vmem:[%s2388_s1 + $0x38] sm:$0xff] %vm964_vm3, %v1105_v29  }
 0x102   :  { %v1138_v32 = vpop.permute.xlu0 %1137  }
 0x103   :  { %v1127_v31 = vpop.permute.xlu1 %1126   ;;  %1140 = vst.msk [vmem:[%s2388_s1] sm:$0xff] %vm1139_vm4, %v1138_v32  }
 0x104   :  { %1603 = vst.msk [vmem:[%s2388_s1 + $0x78] sm:$0xff] %vm964_vm3, %v1127_v31  }
 0x106   :  { %v1159_v34 = vpop.permute.xlu0 %1158  }
 0x107   :  { %v1148_v33 = vpop.permute.xlu1 %1147   ;;  %1605 = vst.msk [vmem:[%s2388_s1 + $0x40] sm:$0xff] %vm1139_vm4, %v1159_v34  }
 0x108   :  { %1604 = vst.msk [vmem:[%s2388_s1 + $0x20] sm:$0xff] %vm1139_vm4, %v1148_v33  }
 0x10a   :  { %v1181_v36 = vpop.permute.xlu0 %1180  }
 0x10b   :  { %v1170_v35 = vpop.permute.xlu1 %1169   ;;  %1607 = vst.msk [vmem:[%s2388_s1 + $0x8] sm:$0xff] %vm1139_vm4, %v1181_v36  }
 0x10c   :  { %1606 = vst.msk [vmem:[%s2388_s1 + $0x60] sm:$0xff] %vm1139_vm4, %v1170_v35  }
 0x10e   :  { %v1203_v38 = vpop.permute.xlu0 %1202  }
 0x10f   :  { %v1192_v37 = vpop.permute.xlu1 %1191   ;;  %1609 = vst.msk [vmem:[%s2388_s1 + $0x48] sm:$0xff] %vm1139_vm4, %v1203_v38  }
 0x110   :  { %1608 = vst.msk [vmem:[%s2388_s1 + $0x28] sm:$0xff] %vm1139_vm4, %v1192_v37  }
 0x112   :  { %v1225_v40 = vpop.permute.xlu0 %1224  }
 0x113   :  { %v1214_v39 = vpop.permute.xlu1 %1213   ;;  %1611 = vst.msk [vmem:[%s2388_s1 + $0x10] sm:$0xff] %vm1139_vm4, %v1225_v40  }
 0x114   :  { %1610 = vst.msk [vmem:[%s2388_s1 + $0x68] sm:$0xff] %vm1139_vm4, %v1214_v39  }
 0x116   :  { %v1247_v42 = vpop.permute.xlu0 %1246  }
 0x117   :  { %v1236_v41 = vpop.permute.xlu1 %1235   ;;  %1613 = vst.msk [vmem:[%s2388_s1 + $0x50] sm:$0xff] %vm1139_vm4, %v1247_v42  }
 0x118   :  { %1612 = vst.msk [vmem:[%s2388_s1 + $0x30] sm:$0xff] %vm1139_vm4, %v1236_v41  }
 0x11a   :  { %v1269_v44 = vpop.permute.xlu0 %1268  }
 0x11b   :  { %v1258_v43 = vpop.permute.xlu1 %1257   ;;  %1615 = vst.msk [vmem:[%s2388_s1 + $0x18] sm:$0xff] %vm1139_vm4, %v1269_v44  }
 0x11c   :  { %1614 = vst.msk [vmem:[%s2388_s1 + $0x70] sm:$0xff] %vm1139_vm4, %v1258_v43  }
 0x11e   :  { %v1291_v46 = vpop.permute.xlu0 %1290  }
 0x11f   :  { %v1280_v45 = vpop.permute.xlu1 %1279   ;;  %1617 = vst.msk [vmem:[%s2388_s1 + $0x58] sm:$0xff] %vm1139_vm4, %v1291_v46  }
 0x120   :  { %1616 = vst.msk [vmem:[%s2388_s1 + $0x38] sm:$0xff] %vm1139_vm4, %v1280_v45  }
 0x123   :  { %v1302_v47 = vpop.permute.xlu1 %1301  }
 0x124   :  { %1618 = vst.msk [vmem:[%s2388_s1 + $0x78] sm:$0xff] %vm1139_vm4, %v1302_v47  }

// kernel: tile.78
= control target key start
LH: loop header
LB: loop body
LE: loop exit
PB: predicated region body
PF: predicated region fallthrough
CT: control target
= control target key end

     0   :  { %s22_s0 = inlined_call_operand.vmem [shape: f32[32], index: 0, kind: input, shape index: {}]   ;;  %s23_s1 = inlined_call_operand.vmem [shape: f32[4,32], index: 1, kind: output, shape index: {}]  }
   0x1   :  { %v4_v0 = vld [vmem:[%s22_s0] ss:$0 sm:$0xff] }
   0x2   :  { %5 = vst [vmem:[%s23_s1] sm:$0xf] %v4_v0 }

// kernel: tile.79
= control target key start
LH: loop header
LB: loop body
LE: loop exit
PB: predicated region body
PF: predicated region fallthrough
CT: control target
= control target key end

     0   :  { %vm7_vm0 = vcmask 261120   ;;  %s37_s8 = smov 32   ;;  %s38_s9 = smov 64   ;;  %vm13_vm1 = vcmask 1048320   ;;  %vm19_vm2 = vcmask 785920   ;;  %vm25_vm3 = vcmask 523520   ;;  %s55_s0 = inlined_call_operand.vmem [shape: f32[4,32], index: 0, kind: input, shape index: {}]   ;;  %s56_s1 = inlined_call_operand.vmem [shape: f32[1,128], index: 1, kind: output, shape index: {}]  }
   0x1   :  { %v4_v0 = vld [vmem:[%s55_s0] sm:$0xf]  ;;  %s36_s0 = smov 96  }
   0x2   :  { %5 = vst [vmem:[#allocation1] sm:$0xf] %v4_v0 }
   0x9   :  { %v10_v1 = vld [vmem:[#allocation1 + $0x3] sm:$0x1]   ;;  %v22_v2 = vld [vmem:[#allocation1 + $0x1] sm:$0x1]   ;;  %v6_v3 = vld [vmem:[#allocation1] sm:$0x1]  }
   0xa   :  { %11 = vrot.lane.b32.xlu0 %v10_v1, %s36_s0  ;;  %23 = vrot.lane.b32.xlu1 %v22_v2, %s37_s8  ;;  %v16_v4 = vld [vmem:[#allocation1 + $0x2] sm:$0x1]   ;;  %8 = vst.msk [vmem:[#allocation0] sm:$0x1] %vm7_vm0, %v6_v3  }
   0xe   :  { %17 = vrot.lane.b32.xlu0 %v16_v4, %s38_s9 }
  0x7c   :  { %v12_v5 = vpop.permute.xlu0 %11   ;;  %v24_v6 = vpop.permute.xlu1 %23  }
  0x7d   :  { %14 = vst.msk [vmem:[#allocation0] sm:$0x1] %vm13_vm1, %v12_v5  }
  0x80   :  { %v18_v7 = vpop.permute.xlu0 %17  }
  0x81   :  { %20 = vst.msk [vmem:[#allocation0] sm:$0x1] %vm19_vm2, %v18_v7  }
  0x82   :  { %26 = vst.msk [vmem:[#allocation0] sm:$0x1] %vm25_vm3, %v24_v6  }
  0x89   :  { %v30_v8 = vld [vmem:[#allocation0] sm:$0x1] }
  0x8a   :  { %32 = vst [vmem:[%s56_s1] sm:$0x1] %v30_v8 }

// kernel: vqvae_forward.27
= control target key start
LH: loop header
LB: loop body
LE: loop exit
PB: predicated region body
PF: predicated region fallthrough
CT: control target
= control target key end

     0   :  { %v845_v1 = vmov 0.0   ;;  %vm846_vm0 = vmmov 0   ;;  %vm177_vm1 = vcmask 261120   ;;  %v847_v25 = vmov 0.0|0.0   ;;  %s1026_s1 = inlined_call_operand.vmem [shape: bf16[288,128], index: 1, kind: input, shape index: {}]   ;;  %s1027_s0 = inlined_call_operand.vmem [shape: bf16[8,288], index: 0, kind: input, shape index: {}]   ;;  %s1028_s2 = inlined_call_operand.vmem [shape: f32[128,128], index: 2, kind: input, shape index: {}]   ;;  %s1029_s3 = inlined_call_operand.vmem [shape: f32[1,128], index: 3, kind: input, shape index: {}]   ;;  %s1030_s4 = inlined_call_operand.vmem [shape: f32[1,128], index: 4, kind: input, shape index: {}]   ;;  %s1031_s5 = inlined_call_operand.vmem [shape: bf16[8,128], index: 5, kind: output, shape index: {}]  }
   0x1   :  { %v822_v0 = vld [vmem:[%s1026_s1 + $0x40] sm:$0xff]   ;;  %682 = vmatprep.subr.bf16.mxu1 %v845_v1  ;;  %686 = vmatprep.mubr.msk.bf16.mxu1 %vm846_vm0, %v845_v1  ;;  %v824_v3 = vld [vmem:[%s1026_s1 + $0x48] sm:$0xff]   ;;  %v826_v5 = vld [vmem:[%s1026_s1 + $0x50] sm:$0xff]   ;;  %vm261_vm2 = vcmask 64512   ;;  %v848_v59 = vmov 1.0  }
   0x2   :  { %v823_v2 = vld [vmem:[%s1026_s1] sm:$0xff]   ;;  %619 = vmatprep.subr.bf16.mxu0 %v822_v0  ;;  %v825_v4 = vld [vmem:[%s1026_s1 + $0x8] sm:$0xff]   ;;  %v827_v6 = vld [vmem:[%s1026_s1 + $0x10] sm:$0xff]  }
   0x3   :  { %620 = vmatpush3.bf16.msra.mxu0 %v823_v2  ;;  %v828_v7 = vld [vmem:[%s1026_s1 + $0x58] sm:$0xff]   ;;  %v830_v9 = vld [vmem:[%s1026_s1 + $0x60] sm:$0xff]   ;;  %v832_v12 = vld [vmem:[%s1026_s1 + $0x68] sm:$0xff]  }
   0x4   :  { %621 = vmatprep.subr.bf16.mxu0 %v824_v3  ;;  %v829_v8 = vld [vmem:[%s1026_s1 + $0x18] sm:$0xff]   ;;  %v836_v10 = vld [vmem:[%s1026_s1 + $0x80] sm:$0xff]   ;;  %v839_v13 = vld [vmem:[%s1026_s1 + $0x88] sm:$0xff]  }
   0x5   :  { %v831_v11 = vld [vmem:[%s1026_s1 + $0x20] sm:$0xff]   ;;  %683 = vmatpush3.bf16.msra.mxu1 %v836_v10  ;;  %v833_v15 = vld [vmem:[%s1026_s1 + $0x28] sm:$0xff]   ;;  %v834_v18 = vld [vmem:[%s1026_s1 + $0x70] sm:$0xff]  }
   0x6   :  { %684 = vmatprep.subr.bf16.mxu1 %v845_v1  ;;  %v21_v14 = vld [vmem:[%s1027_s0] sm:$0xff]  ;;  %v842_v17 = vld [vmem:[%s1027_s0 + $0x8] ss:$0 sps:$4 sm:$0xff]   ;;  %v835_v19 = vld [vmem:[%s1026_s1 + $0x30] sm:$0xff]  }
   0x7   :  { %622 = vmatpush3.bf16.msra.mxu0 %v825_v4  ;;  %v596_v16 = vcombine.high %v21_v14, %v21_v14  ;;  %v837_v20 = vld [vmem:[%s1026_s1 + $0x78] sm:$0xff]   ;;  %v595_v22 = vcombine.low %v21_v14, %v21_v14  ;;  %v406_v23 = vld [vmem:[%s1028_s2] sm:$0xff]  ;;  %v407_v24 = vld [vmem:[%s1028_s2 + $0x8] sm:$0xff] }
   0x8   :  { %623 = vmatprep.subr.bf16.mxu0 %v826_v5  ;;  %v838_v21 = vld [vmem:[%s1026_s1 + $0x38] sm:$0xff]   ;;  %v771_v26 = vpack.c.bf16 %v407_v24, %v406_v23  ;;  %v408_v27 = vld [vmem:[%s1028_s2 + $0x10] sm:$0xff]  ;;  %v410_v30 = vld [vmem:[%s1028_s2 + $0x20] sm:$0xff] }
   0x9   :  { %685 = vmatpush3.bf16.msra.mxu1 %v839_v13  ;;  %213 = vmatprep.mubr.bf16.mxu0 %v596_v16  ;;  %v409_v28 = vld [vmem:[%s1028_s2 + $0x18] sm:$0xff]  ;;  %v411_v31 = vld [vmem:[%s1028_s2 + $0x28] sm:$0xff]  ;;  %v412_v33 = vld [vmem:[%s1028_s2 + $0x30] sm:$0xff] }
   0xa   :  { %690 = vmatprep.subr.mxu1 %v845_v1  ;;  %v774_v29 = vpack.c.bf16 %v409_v28, %v408_v27  ;;  %v777_v32 = vpack.c.bf16 %v411_v31, %v410_v30  ;;  %v413_v34 = vld [vmem:[%s1028_s2 + $0x38] sm:$0xff]  ;;  %v414_v36 = vld [vmem:[%s1028_s2 + $0x40] sm:$0xff]  ;;  %v415_v37 = vld [vmem:[%s1028_s2 + $0x48] sm:$0xff] }
   0xb   :  { %624 = vmatpush3.bf16.msra.mxu0 %v827_v6  ;;  %v780_v35 = vpack.c.bf16 %v413_v34, %v412_v33  ;;  %v783_v38 = vpack.c.bf16 %v415_v37, %v414_v36  ;;  %v416_v39 = vld [vmem:[%s1028_s2 + $0x50] sm:$0xff]  ;;  %v417_v40 = vld [vmem:[%s1028_s2 + $0x58] sm:$0xff]  ;;  %v418_v42 = vld [vmem:[%s1028_s2 + $0x60] sm:$0xff] }
   0xc   :  { %625 = vmatprep.subr.bf16.mxu0 %v828_v7  ;;  %687 = vmatmul.mubr.msk.bf16.vlgmr.msra.gmra.mrb[0].mxu1 %vm177_vm1, %v842_v17  ;;  %v786_v41 = vpack.c.bf16 %v417_v40, %v416_v39  ;;  %v419_v43 = vld [vmem:[%s1028_s2 + $0x68] sm:$0xff]  ;;  %v420_v45 = vld [vmem:[%s1028_s2 + $0x70] sm:$0xff]  ;;  %v421_v46 = vld [vmem:[%s1028_s2 + $0x78] sm:$0xff] }
   0xd   :  { %692 = vmatprep.mubr.msk.f32.mxu1 %vm846_vm0, %v845_v1  ;;  %v789_v44 = vpack.c.bf16 %v419_v43, %v418_v42  ;;  %v792_v47 = vpack.c.bf16 %v421_v46, %v420_v45 }
   0xf   :  { %626 = vmatpush3.bf16.msra.mxu0 %v829_v8 }
  0x10   :  { %627 = vmatprep.subr.bf16.mxu0 %v830_v9  ;;  %v575_v9 = vlaneseq }
  0x12   :  { %v576_v10 = vshrl.u32 %v575_v9, 7 }
  0x13   :  { %628 = vmatpush3.bf16.msra.mxu0 %v831_v11  ;;  %v567_v11 = vld [vmem:[%s1029_s3] sm:$0x1] }
  0x14   :  { %629 = vmatprep.subr.bf16.mxu0 %v832_v12  ;;  %v577_v12 = vsub.s32 0, %v576_v10 }
  0x17   :  { %630 = vmatpush3.bf16.msra.mxu0 %v833_v15  ;;  %v571_v15 = vld [vmem:[%s1030_s4] sm:$0x1] }
  0x18   :  { %631 = vmatprep.subr.bf16.mxu0 %v834_v18 }
  0x1b   :  { %632 = vmatpush3.bf16.msra.mxu0 %v835_v19 }
  0x1c   :  { %633 = vmatprep.subr.bf16.mxu0 %v837_v20 }
  0x1f   :  { %634 = vmatpush3.bf16.msra.mxu0 %v838_v21 }
  0x20   :  { %794 = vmatprep.subr.bf16.mxu0 %v847_v25 }
  0x22   :  { %214 = vmatmul.mubr.bf16.vlgmr.msra.gmra.mrb[0].mxu0 %v595_v22 }
  0x23   :  { %767 = vmatprep.mubr.msk.f32.mxu0 %vm846_vm0, %v845_v1  ;;  %796 = vmatpush3.bf16.msra.mxu0 %v771_v26 }
  0x24   :  { %797 = vmatprep.subr.bf16.mxu0 %v847_v25 }
  0x27   :  { %799 = vmatpush3.bf16.msra.mxu0 %v774_v29 }
  0x28   :  { %800 = vmatprep.subr.bf16.mxu0 %v847_v25 }
  0x2b   :  { %802 = vmatpush3.bf16.msra.mxu0 %v777_v32 }
  0x2c   :  { %803 = vmatprep.subr.bf16.mxu0 %v847_v25 }
  0x2f   :  { %805 = vmatpush3.bf16.msra.mxu0 %v780_v35 }
  0x30   :  { %806 = vmatprep.subr.bf16.mxu0 %v847_v25 }
  0x33   :  { %808 = vmatpush3.bf16.msra.mxu0 %v783_v38 }
  0x34   :  { %809 = vmatprep.subr.bf16.mxu0 %v847_v25 }
  0x37   :  { %811 = vmatpush3.bf16.msra.mxu0 %v786_v41 }
  0x38   :  { %812 = vmatprep.subr.bf16.mxu0 %v847_v25 }
  0x3b   :  { %814 = vmatpush3.bf16.msra.mxu0 %v789_v44 }
  0x3c   :  { %815 = vmatprep.subr.bf16.mxu0 %v847_v25 }
  0x3f   :  { %817 = vmatpush3.bf16.msra.mxu0 %v792_v47 }
  0xdf   :  { %v255_v48 = vpop.f32.mrb[0].mxu1 }
  0xe0   :  { %v688_v49 = vpop.f32.mrb[1].mxu1 }
  0xe1   :  { %v258_v50 = vpop.f32.mrb[2].mxu1 }
  0xe2   :  { %v689_v51 = vpop.f32.mrb[3].mxu1 }
  0xf5   :  { %v635_v52 = vpop.f32.mrb[0].mxu0 }
  0xf6   :  { %v636_v53 = vpop.f32.mrb[1].mxu0 }
  0xf7   :  { %v637_v54 = vadd.f32 %v636_v53, %v635_v52  ;;  %v638_v55 = vpop.f32.mrb[2].mxu0 }
  0xf8   :  { %v639_v56 = vpop.f32.mrb[3].mxu0 }
  0xf9   :  { %v256_v57 = vadd.f32 %v637_v54, %v255_v48 }
  0xfb   :  { %v335_v58 = vmul.f32 %v256_v57, %v256_v57  ;;  %691 = vmatpush3.msra.mxu1 %v256_v57 }
  0xfc   :  { %693 = vmatmul.mubr.msk.f32.vlgmr.msra.gmra.mrb[4].mxu1 %vm261_vm2, %v848_v59  ;;  %695 = vmatprep.subr.mxu1 %v845_v1 }
  0xfd   :  { %696 = vmatpush3.msra.mxu1 %v335_v58  ;;  %697 = vmatprep.mubr.msk.f32.mxu1 %vm846_vm0, %v845_v1 }
  0xfe   :  { %770 = vmatprep.subr.bf16.mxu1 %v847_v25 }
 0x100   :  { %698 = vmatmul.mubr.msk.f32.vlgmr.msra.gmra.mrb[6].mxu1 %vm261_vm2, %v848_v59 }
 0x101   :  { %772 = vmatpush3.bf16.msra.mxu1 %v771_v26  ;;  %732 = vmatprep.mubr.msk.f32.mxu1 %vm846_vm0, %v845_v1 }
 0x102   :  { %773 = vmatprep.subr.bf16.mxu1 %v847_v25 }
 0x105   :  { %775 = vmatpush3.bf16.msra.mxu1 %v774_v29 }
 0x106   :  { %776 = vmatprep.subr.bf16.mxu1 %v847_v25 }
 0x109   :  { %778 = vmatpush3.bf16.msra.mxu1 %v777_v32 }
 0x10a   :  { %779 = vmatprep.subr.bf16.mxu1 %v847_v25 }
 0x10d   :  { %781 = vmatpush3.bf16.msra.mxu1 %v780_v35 }
 0x10e   :  { %782 = vmatprep.subr.bf16.mxu1 %v847_v25 }
 0x111   :  { %784 = vmatpush3.bf16.msra.mxu1 %v783_v38 }
 0x112   :  { %785 = vmatprep.subr.bf16.mxu1 %v847_v25 }
 0x115   :  { %787 = vmatpush3.bf16.msra.mxu1 %v786_v41 }
 0x116   :  { %788 = vmatprep.subr.bf16.mxu1 %v847_v25 }
 0x119   :  { %790 = vmatpush3.bf16.msra.mxu1 %v789_v44 }
 0x11a   :  { %791 = vmatprep.subr.bf16.mxu1 %v847_v25 }
 0x11d   :  { %793 = vmatpush3.bf16.msra.mxu1 %v792_v47 }
 0x1cf   :  { %v331_v60 = vpop.f32.mrb[4].mxu1 }
 0x1d0   :  { %v694_v61 = vpop.f32.mrb[5].mxu1  ;;  %733 = vmatmul.mubr.f32.vlgmr.msra.gmra.mrb[8].mxu1 %v331_v60 }
 0x1d3   :  { %v402_v62 = vpop.f32.mrb[6].mxu1 }
 0x1d4   :  { %768 = vmatmul.mubr.f32.vlgmr.msra.gmra.mrb[4].mxu0 %v402_v62  ;;  %v699_v63 = vpop.f32.mrb[7].mxu1 }
 0x2a3   :  { %v488_v0 = vpop.f32.mrb[8].mxu1 }
 0x2a4   :  { %v563_v1 = vmul.f32 0.03125, %v488_v0  ;;  %v734_v2 = vpop.f32.mrb[9].mxu1 }
 0x2a6   :  { %v565_v4 = vmul.f32 %v563_v1, %v563_v1 }
 0x2a7   :  { %v558_v3 = vpop.f32.mrb[4].mxu0 }
 0x2a8   :  { %v564_v5 = vmul.f32 0.03125, %v558_v3  ;;  %v769_v6 = vpop.f32.mrb[5].mxu0 }
 0x2aa   :  { %v566_v7 = vsub.f32 %v564_v5, %v565_v4 }
 0x2ac   :  { %v568_v8 = vadd.f32 1e-05, %v566_v7 }
 0x2ae   :  { %843 = vrsqrt.f32 %v568_v8 }
 0x2b8   :  { %v844_v13 = vpop.eup %843 }
 0x2b9   :  { %v570_v14 = vmul.f32 %v844_v13, %v567_v11 }
 0x2bb   :  { %v572_v16 = vmul.f32 %v570_v14, %v563_v1  ;;  %v578_v17 = vrot.slane %v570_v14, %v577_v12 }
 0x2bd   :  { %v573_v18 = vsub.f32 %v571_v15, %v572_v16  ;;  %v580_v19 = vmul.f32 %v578_v17, %v256_v57 }
 0x2bf   :  { %v585_v20 = vrot.slane %v573_v18, %v577_v12 }
 0x2c1   :  { %v587_v21 = vadd.f32 %v585_v20, %v580_v19 }
 0x2c3   :  { %v588_v22 = vmax.f32 %v587_v21, 0.0 }
 0x2c5   :  { %v589_v23 = vpack.c.bf16 %v588_v22, %v588_v22 }
 0x2c7   :  { %590 = vst [vmem:[%s1031_s5] sm:$0xf] %v589_v23 }

// kernel: vqvae_forward.28
= control target key start
LH: loop header
LB: loop body
LE: loop exit
PB: predicated region body
PF: predicated region fallthrough
CT: control target
= control target key end

     0   :  { %vm203_vm0 = vcmask 261120   ;;  %v986_v24 = vmov 0.0|0.0   ;;  %vm987_vm1 = vmmov 0   ;;  %v988_v25 = vmov 0.0   ;;  %s1228_s1 = inlined_call_operand.vmem [shape: bf16[288,128], index: 1, kind: input, shape index: {}]   ;;  %s1229_s0 = inlined_call_operand.vmem [shape: bf16[32,288], index: 0, kind: input, shape index: {}]   ;;  %s1230_s2 = inlined_call_operand.vmem [shape: f32[128,128], index: 2, kind: input, shape index: {}]   ;;  %s1231_s3 = inlined_call_operand.vmem [shape: f32[1,128], index: 3, kind: input, shape index: {}]   ;;  %s1232_s4 = inlined_call_operand.vmem [shape: f32[1,128], index: 4, kind: input, shape index: {}]   ;;  %s1233_s5 = inlined_call_operand.vmem [shape: bf16[32,128], index: 5, kind: output, shape index: {}]  }
   0x1   :  { %v958_v0 = vld [vmem:[%s1228_s1 + $0x40] sm:$0xff]   ;;  %v960_v2 = vld [vmem:[%s1228_s1 + $0x48] sm:$0xff]   ;;  %v962_v4 = vld [vmem:[%s1228_s1 + $0x50] sm:$0xff]  }
   0x2   :  { %v959_v1 = vld [vmem:[%s1228_s1] sm:$0xff]   ;;  %718 = vmatprep.subr.bf16.mxu0 %v958_v0  ;;  %v961_v3 = vld [vmem:[%s1228_s1 + $0x8] sm:$0xff]   ;;  %v963_v5 = vld [vmem:[%s1228_s1 + $0x10] sm:$0xff]  }
   0x3   :  { %719 = vmatpush3.bf16.msra.mxu0 %v959_v1  ;;  %v964_v6 = vld [vmem:[%s1228_s1 + $0x58] sm:$0xff]   ;;  %v966_v8 = vld [vmem:[%s1228_s1 + $0x60] sm:$0xff]   ;;  %v968_v11 = vld [vmem:[%s1228_s1 + $0x68] sm:$0xff]  }
   0x4   :  { %720 = vmatprep.subr.bf16.mxu0 %v960_v2  ;;  %v965_v7 = vld [vmem:[%s1228_s1 + $0x18] sm:$0xff]   ;;  %v972_v9 = vld [vmem:[%s1228_s1 + $0x80] sm:$0xff]   ;;  %v969_v12 = vld [vmem:[%s1228_s1 + $0x28] sm:$0xff]  }
   0x5   :  { %v967_v10 = vld [vmem:[%s1228_s1 + $0x20] sm:$0xff]   ;;  %794 = vmatprep.subr.bf16.mxu1 %v972_v9  ;;  %v975_v13 = vld [vmem:[%s1228_s1 + $0x88] sm:$0xff]   ;;  %v970_v14 = vld [vmem:[%s1228_s1 + $0x70] sm:$0xff]  }
   0x6   :  { %795 = vmatpush3.bf16.msra.mxu1 %v972_v9  ;;  %v978_v15 = vld [vmem:[%s1229_s0 + $0x4] ss:$12 sps:$4 sm:$0xff]   ;;  %v979_v16 = vld [vmem:[%s1229_s0 + $0x8] ss:$12 sps:$4 sm:$0xff]   ;;  %v980_v17 = vld [vmem:[%s1229_s0 + $0x20] ss:$12 sps:$4 sm:$0xff]  }
   0x7   :  { %721 = vmatpush3.bf16.msra.mxu0 %v961_v3  ;;  %796 = vmatprep.subr.bf16.mxu1 %v975_v13  ;;  %v971_v18 = vld [vmem:[%s1228_s1 + $0x30] sm:$0xff]   ;;  %v973_v19 = vld [vmem:[%s1228_s1 + $0x78] sm:$0xff]   ;;  %v976_v21 = vld [vmem:[%s1229_s0] ss:$12 sps:$4 sm:$0xff]  }
   0x8   :  { %722 = vmatprep.subr.bf16.mxu0 %v962_v4  ;;  %242 = vmatprep.mubr.bf16.mxu0 %v978_v15  ;;  %v974_v20 = vld [vmem:[%s1228_s1 + $0x38] sm:$0xff]   ;;  %v455_v26 = vld [vmem:[%s1230_s2] sm:$0xff]  ;;  %v456_v27 = vld [vmem:[%s1230_s2 + $0x8] sm:$0xff] }
   0x9   :  { %798 = vmatprep.mubr.msk.bf16.mxu1 %vm203_vm0, %v979_v16  ;;  %v981_v22 = vld [vmem:[%s1229_s0 + $0x1c] ss:$12 sps:$4 sm:$0xff]   ;;  %v983_v23 = vld [vmem:[%s1229_s0 + $0x18] ss:$12 sps:$4 sm:$0xff]   ;;  %v1106_v28 = vpack.c.bf16 %v456_v27, %v455_v26  ;;  %v457_v29 = vld [vmem:[%s1230_s2 + $0x10] sm:$0xff] }
   0xa   :  { %797 = vmatpush3.bf16.msra.mxu1 %v975_v13  ;;  %v458_v30 = vld [vmem:[%s1230_s2 + $0x18] sm:$0xff]  ;;  %v459_v32 = vld [vmem:[%s1230_s2 + $0x20] sm:$0xff]  ;;  %v460_v33 = vld [vmem:[%s1230_s2 + $0x28] sm:$0xff] }
   0xb   :  { %723 = vmatpush3.bf16.msra.mxu0 %v963_v5  ;;  %894 = vmatprep.subr.bf16.mxu1 %v986_v24  ;;  %v1116_v31 = vpack.c.bf16 %v458_v30, %v457_v29  ;;  %v1126_v34 = vpack.c.bf16 %v460_v33, %v459_v32  ;;  %v461_v35 = vld [vmem:[%s1230_s2 + $0x30] sm:$0xff]  ;;  %v462_v36 = vld [vmem:[%s1230_s2 + $0x38] sm:$0xff]  ;;  %v463_v38 = vld [vmem:[%s1230_s2 + $0x40] sm:$0xff]  ;;  %v624_v29 = vlaneseq }
   0xc   :  { %724 = vmatprep.subr.bf16.mxu0 %v964_v6  ;;  %v1136_v37 = vpack.c.bf16 %v462_v36, %v461_v35  ;;  %v464_v39 = vld [vmem:[%s1230_s2 + $0x48] sm:$0xff]  ;;  %v465_v41 = vld [vmem:[%s1230_s2 + $0x50] sm:$0xff]  ;;  %v466_v42 = vld [vmem:[%s1230_s2 + $0x58] sm:$0xff] }
   0xd   :  { %799 = vmatmul.mubr.msk.bf16.vlgmr.msra.gmra.mrb[0].mxu1 %vm203_vm0, %v980_v17  ;;  %v1146_v40 = vpack.c.bf16 %v464_v39, %v463_v38  ;;  %v922_v43 = vpack.c.bf16 %v466_v42, %v465_v41  ;;  %v467_v44 = vld [vmem:[%s1230_s2 + $0x60] sm:$0xff]  ;;  %v468_v45 = vld [vmem:[%s1230_s2 + $0x68] sm:$0xff]  ;;  %v469_v47 = vld [vmem:[%s1230_s2 + $0x70] sm:$0xff]  ;;  %v625_v30 = vshrl.u32 %v624_v29, 7 }
   0xe   :  { %810 = vmatprep.mubr.msk.f32.mxu1 %vm987_vm1, %v988_v25  ;;  %v925_v46 = vpack.c.bf16 %v468_v45, %v467_v44  ;;  %v470_v48 = vld [vmem:[%s1230_s2 + $0x78] sm:$0xff] }
   0xf   :  { %725 = vmatpush3.bf16.msra.mxu0 %v965_v7  ;;  %v928_v49 = vpack.c.bf16 %v470_v48, %v469_v47 }
  0x10   :  { %726 = vmatprep.subr.bf16.mxu0 %v966_v8 }
  0x13   :  { %727 = vmatpush3.bf16.msra.mxu0 %v967_v10 }
  0x14   :  { %728 = vmatprep.subr.bf16.mxu0 %v968_v11 }
  0x17   :  { %729 = vmatpush3.bf16.msra.mxu0 %v969_v12  ;;  %v989_v12 = vmov 1.0  }
  0x18   :  { %730 = vmatprep.subr.bf16.mxu0 %v970_v14 }
  0x1b   :  { %731 = vmatpush3.bf16.msra.mxu0 %v971_v18 }
  0x1c   :  { %732 = vmatprep.subr.bf16.mxu0 %v973_v19 }
  0x1f   :  { %733 = vmatpush3.bf16.msra.mxu0 %v974_v20 }
  0x20   :  { %930 = vmatprep.subr.bf16.mxu0 %v986_v24 }
  0x22   :  { %243 = vmatmul.mubr.bf16.vlgmr.msra.gmra.mrb[0].mxu0 %v976_v21 }
  0x23   :  { %250 = vmatprep.mubr.bf16.mxu0 %v981_v22  ;;  %932 = vmatpush3.bf16.msra.mxu0 %v1106_v28 }
  0x24   :  { %933 = vmatprep.subr.bf16.mxu0 %v986_v24 }
  0x27   :  { %935 = vmatpush3.bf16.msra.mxu0 %v1116_v31 }
  0x28   :  { %936 = vmatprep.subr.bf16.mxu0 %v986_v24 }
  0x2a   :  { %251 = vmatmul.mubr.bf16.gmra.mrb[4].mxu0 %v983_v23 }
  0x2b   :  { %891 = vmatprep.mubr.msk.f32.mxu0 %vm987_vm1, %v988_v25  ;;  %938 = vmatpush3.bf16.msra.mxu0 %v1126_v34 }
  0x2c   :  { %939 = vmatprep.subr.bf16.mxu0 %v986_v24 }
  0x2f   :  { %941 = vmatpush3.bf16.msra.mxu0 %v1136_v37 }
  0x30   :  { %942 = vmatprep.subr.bf16.mxu0 %v986_v24 }
  0x33   :  { %944 = vmatpush3.bf16.msra.mxu0 %v1146_v40 }
  0x34   :  { %945 = vmatprep.subr.bf16.mxu0 %v986_v24 }
  0x37   :  { %947 = vmatpush3.bf16.msra.mxu0 %v922_v43 }
  0x38   :  { %948 = vmatprep.subr.bf16.mxu0 %v986_v24 }
  0x3b   :  { %950 = vmatpush3.bf16.msra.mxu0 %v925_v46 }
  0x3c   :  { %951 = vmatprep.subr.bf16.mxu0 %v986_v24 }
  0x3f   :  { %953 = vmatpush3.bf16.msra.mxu0 %v928_v49 }
  0xe0   :  { %v800_v50 = vpop.f32.mrb[0].mxu1 }
  0xe1   :  { %v293_v51 = vpop.f32.mrb[1].mxu1 }
  0xe2   :  { %v801_v52 = vpop.f32.mrb[2].mxu1 }
  0xe3   :  { %v296_v53 = vpop.f32.mrb[3].mxu1 }
  0xf5   :  { %v734_v54 = vpop.f32.mrb[0].mxu0 }
  0xf6   :  { %v735_v55 = vpop.f32.mrb[1].mxu0 }
  0xf7   :  { %v736_v56 = vadd.f32 %v735_v55, %v734_v54  ;;  %v737_v57 = vpop.f32.mrb[2].mxu0 }
  0xf8   :  { %v738_v58 = vpop.f32.mrb[3].mxu0 }
  0xf9   :  { %v739_v59 = vadd.f32 %v738_v58, %v737_v57  ;;  %v1170_v60 = vadd.f32 %v736_v56, %v293_v51 }
  0xfb   :  { %v1172_v61 = vadd.f32 %v739_v59, %v296_v53  ;;  %v381_v9 = vmul.f32 %v1170_v60, %v1170_v60 }
  0xfd   :  { %v895_v62 = vpack.c.bf16 %v1172_v61, %v1170_v60  ;;  %v740_v63 = vpop.f32.mrb[4].mxu0  ;;  %v382_v7 = vmul.f32 %v1172_v61, %v1172_v61 }
  0xfe   :  { %v741_v0 = vpop.f32.mrb[5].mxu0 }
  0xff   :  { %v742_v1 = vadd.f32 %v741_v0, %v740_v63  ;;  %v743_v2 = vpop.f32.mrb[6].mxu0  ;;  %896 = vmatpush3.bf16.msra.mxu1 %v895_v62  ;;  %v901_v10 = vpack.c.bf16 %v382_v7, %v381_v9 }
 0x100   :  { %v744_v3 = vpop.f32.mrb[7].mxu0  ;;  %897 = vmatprep.subr.bf16.mxu1 %v986_v24 }
 0x101   :  { %v1177_v4 = vadd.f32 %v800_v50, %v742_v1  ;;  %v745_v5 = vadd.f32 %v744_v3, %v743_v2 }
 0x103   :  { %v1179_v6 = vadd.f32 %v801_v52, %v745_v5  ;;  %v383_v13 = vmul.f32 %v1177_v4, %v1177_v4 }
 0x105   :  { %v898_v8 = vpack.c.bf16 %v1179_v6, %v1177_v4  ;;  %v384_v11 = vmul.f32 %v1179_v6, %v1179_v6 }
 0x107   :  { %899 = vmatpush3.bf16.msra.mxu1 %v898_v8  ;;  %v904_v14 = vpack.c.bf16 %v384_v11, %v383_v13 }
 0x108   :  { %900 = vmatprep.subr.bf16.mxu1 %v986_v24 }
 0x10a   :  { %811 = vmatmul.mubr.msk.f32.vlgmr.msra.gmra.mrb[4].mxu1 %vm203_vm0, %v989_v12 }
 0x10b   :  { %902 = vmatpush3.bf16.msra.mxu1 %v901_v10  ;;  %821 = vmatprep.mubr.msk.f32.mxu1 %vm987_vm1, %v988_v25 }
 0x10c   :  { %903 = vmatprep.subr.bf16.mxu1 %v986_v24 }
 0x10f   :  { %905 = vmatpush3.bf16.msra.mxu1 %v904_v14 }
 0x110   :  { %906 = vmatprep.subr.bf16.mxu1 %v986_v24 }
 0x112   :  { %822 = vmatmul.mubr.msk.f32.vlgmr.msra.gmra.mrb[6].mxu1 %vm203_vm0, %v989_v12 }
 0x113   :  { %908 = vmatpush3.bf16.msra.mxu1 %v1106_v28  ;;  %856 = vmatprep.mubr.msk.f32.mxu1 %vm987_vm1, %v988_v25 }
 0x114   :  { %909 = vmatprep.subr.bf16.mxu1 %v986_v24 }
 0x117   :  { %911 = vmatpush3.bf16.msra.mxu1 %v1116_v31  ;;  %v626_v31 = vsub.s32 0, %v625_v30 }
 0x118   :  { %912 = vmatprep.subr.bf16.mxu1 %v986_v24 }
 0x11b   :  { %914 = vmatpush3.bf16.msra.mxu1 %v1126_v34  ;;  %v620_v34 = vld [vmem:[%s1232_s4] sm:$0x1] }
 0x11c   :  { %915 = vmatprep.subr.bf16.mxu1 %v986_v24 }
 0x11f   :  { %917 = vmatpush3.bf16.msra.mxu1 %v1136_v37 }
 0x120   :  { %918 = vmatprep.subr.bf16.mxu1 %v986_v24 }
 0x123   :  { %920 = vmatpush3.bf16.msra.mxu1 %v1146_v40 }
 0x124   :  { %921 = vmatprep.subr.bf16.mxu1 %v986_v24 }
 0x127   :  { %923 = vmatpush3.bf16.msra.mxu1 %v922_v43 }
 0x128   :  { %924 = vmatprep.subr.bf16.mxu1 %v986_v24 }
 0x12b   :  { %926 = vmatpush3.bf16.msra.mxu1 %v925_v46 }
 0x12c   :  { %927 = vmatprep.subr.bf16.mxu1 %v986_v24  ;;  %v616_v24 = vld [vmem:[%s1231_s3] sm:$0x1] }
 0x12f   :  { %929 = vmatpush3.bf16.msra.mxu1 %v928_v49 }
 0x1dd   :  { %v377_v15 = vpop.f32.mrb[4].mxu1 }
 0x1de   :  { %v812_v16 = vpop.f32.mrb[5].mxu1  ;;  %857 = vmatmul.mubr.f32.vlgmr.msra.gmra.mrb[8].mxu1 %v377_v15 }
 0x1e5   :  { %v451_v17 = vpop.f32.mrb[6].mxu1 }
 0x1e6   :  { %v823_v18 = vpop.f32.mrb[7].mxu1  ;;  %892 = vmatmul.mubr.f32.vlgmr.msra.gmra.mrb[8].mxu0 %v451_v17 }
 0x2b1   :  { %v537_v19 = vpop.f32.mrb[8].mxu1 }
 0x2b2   :  { %v858_v20 = vpop.f32.mrb[9].mxu1  ;;  %v612_v21 = vmul.f32 0.0078125, %v537_v19 }
 0x2b4   :  { %v614_v23 = vmul.f32 %v612_v21, %v612_v21 }
 0x2b9   :  { %v607_v22 = vpop.f32.mrb[8].mxu0 }
 0x2ba   :  { %v613_v25 = vmul.f32 0.0078125, %v607_v22  ;;  %v893_v26 = vpop.f32.mrb[9].mxu0 }
 0x2bc   :  { %v615_v27 = vsub.f32 %v613_v25, %v614_v23 }
 0x2be   :  { %v617_v28 = vadd.f32 1e-05, %v615_v27 }
 0x2c0   :  { %984 = vrsqrt.f32 %v617_v28 }
 0x2ca   :  { %v985_v32 = vpop.eup %984 }
 0x2cb   :  { %v619_v33 = vmul.f32 %v985_v32, %v616_v24 }
 0x2cd   :  { %v621_v35 = vmul.f32 %v619_v33, %v612_v21  ;;  %v627_v36 = vrot.slane %v619_v33, %v626_v31 }
 0x2cf   :  { %v622_v37 = vsub.f32 %v620_v34, %v621_v35  ;;  %v629_v38 = vmul.f32 %v627_v36, %v1170_v60  ;;  %v630_v39 = vmul.f32 %v627_v36, %v1172_v61  ;;  %v631_v40 = vmul.f32 %v627_v36, %v1177_v4 }
 0x2d0   :  { %v632_v41 = vmul.f32 %v627_v36, %v1179_v6 }
 0x2d1   :  { %v637_v42 = vrot.slane %v622_v37, %v626_v31 }
 0x2d3   :  { %v639_v43 = vadd.f32 %v637_v42, %v629_v38  ;;  %v640_v44 = vadd.f32 %v637_v42, %v630_v39  ;;  %v641_v45 = vadd.f32 %v637_v42, %v631_v40  ;;  %v642_v46 = vadd.f32 %v637_v42, %v632_v41 }
 0x2d5   :  { %v643_v47 = vmax.f32 %v639_v43, 0.0  ;;  %v644_v48 = vmax.f32 %v640_v44, 0.0  ;;  %v645_v49 = vmax.f32 %v641_v45, 0.0  ;;  %v646_v50 = vmax.f32 %v642_v46, 0.0 }
 0x2d7   :  { %v710_v51 = vpack.c.bf16 %v644_v48, %v643_v47  ;;  %v715_v52 = vpack.c.bf16 %v646_v50, %v645_v49 }
 0x2d9   :  { %711 = vst [vmem:[%s1233_s5] sm:$0xff] %v710_v51   ;;  %717 = vst [vmem:[%s1233_s5 + $0x8] sm:$0xff] %v715_v52  }

// kernel: tile.98
= control target key start
LH: loop header
LB: loop body
LE: loop exit
PB: predicated region body
PF: predicated region fallthrough
CT: control target
= control target key end

     0   :  { %s22_s0 = inlined_call_operand.vmem [shape: f32[4], index: 0, kind: input, shape index: {}]   ;;  %s23_s1 = inlined_call_operand.vmem [shape: f32[4,4], index: 1, kind: output, shape index: {}]  }
   0x1   :  { %v4_v0 = vld [vmem:[%s22_s0] ss:$0 sm:$0xff] }
   0x2   :  { %5 = vst [vmem:[%s23_s1] sm:$0xf] %v4_v0 }

// kernel: tile.99
= control target key start
LH: loop header
LB: loop body
LE: loop exit
PB: predicated region body
PF: predicated region fallthrough
CT: control target
= control target key end

     0   :  { %vm7_vm0 = vcmask 31744   ;;  %s37_s8 = smov 4   ;;  %s38_s9 = smov 8   ;;  %vm13_vm1 = vcmask 130144   ;;  %vm19_vm2 = vcmask 97344   ;;  %vm25_vm3 = vcmask 64544   ;;  %s55_s0 = inlined_call_operand.vmem [shape: f32[4,4], index: 0, kind: input, shape index: {}]   ;;  %s56_s1 = inlined_call_operand.vmem [shape: f32[1,16], index: 1, kind: output, shape index: {}]  }
   0x1   :  { %v4_v0 = vld [vmem:[%s55_s0] sm:$0xf]  ;;  %s36_s0 = smov 12  }
   0x2   :  { %5 = vst [vmem:[#allocation1] sm:$0xf] %v4_v0 }
   0x9   :  { %v10_v1 = vld [vmem:[#allocation1 + $0x3] sm:$0x1]   ;;  %v22_v2 = vld [vmem:[#allocation1 + $0x1] sm:$0x1]   ;;  %v6_v3 = vld [vmem:[#allocation1] sm:$0x1]  }
   0xa   :  { %11 = vrot.lane.b32.xlu0 %v10_v1, %s36_s0  ;;  %23 = vrot.lane.b32.xlu1 %v22_v2, %s37_s8  ;;  %v16_v4 = vld [vmem:[#allocation1 + $0x2] sm:$0x1]   ;;  %8 = vst.msk [vmem:[#allocation0] sm:$0x1] %vm7_vm0, %v6_v3  }
   0xe   :  { %17 = vrot.lane.b32.xlu0 %v16_v4, %s38_s9 }
  0x7c   :  { %v12_v5 = vpop.permute.xlu0 %11   ;;  %v24_v6 = vpop.permute.xlu1 %23  }
  0x7d   :  { %14 = vst.msk [vmem:[#allocation0] sm:$0x1] %vm13_vm1, %v12_v5  }
  0x80   :  { %v18_v7 = vpop.permute.xlu0 %17  }
  0x81   :  { %20 = vst.msk [vmem:[#allocation0] sm:$0x1] %vm19_vm2, %v18_v7  }
  0x82   :  { %26 = vst.msk [vmem:[#allocation0] sm:$0x1] %vm25_vm3, %v24_v6  }
  0x89   :  { %v30_v8 = vld [vmem:[#allocation0] sm:$0x1] }
  0x8a   :  { %32 = vst [vmem:[%s56_s1] sm:$0x1] %v30_v8 }

// kernel: vqvae_forward.29
= control target key start
LH: loop header
LB: loop body
LE: loop exit
PB: predicated region body
PF: predicated region fallthrough
CT: control target
= control target key end

     0   :  { %vm318_vm0 = vcmask 261120   ;;  %vm537_vm1 = vcmask 130048   ;;  %s1020_s1 = inlined_call_operand.vmem [shape: bf16[288,16], index: 1, kind: input, shape index: {}]   ;;  %s1021_s0 = inlined_call_operand.vmem [shape: bf16[128,288], index: 0, kind: input, shape index: {}]   ;;  %s1022_s2 = inlined_call_operand.vmem [shape: f32[1,16], index: 2, kind: input, shape index: {}]   ;;  %s1023_s3 = inlined_call_operand.vmem [shape: f32[128,16], index: 3, kind: output, shape index: {}]  }
   0x1   :  { %v719_v0 = vld [vmem:[%s1020_s1 + $0x40] sm:$0xff]   ;;  %v721_v2 = vld [vmem:[%s1020_s1 + $0x48] sm:$0xff]   ;;  %v723_v4 = vld [vmem:[%s1020_s1 + $0x50] sm:$0xff]  }
   0x2   :  { %v720_v1 = vld [vmem:[%s1020_s1] sm:$0xff]   ;;  %609 = vmatprep.subr.bf16.mxu0 %v719_v0  ;;  %703 = vmatprep.subr.bf16.mxu1 %v719_v0  ;;  %v722_v3 = vld [vmem:[%s1020_s1 + $0x8] sm:$0xff]   ;;  %v724_v5 = vld [vmem:[%s1020_s1 + $0x10] sm:$0xff]  }
   0x3   :  { %610 = vmatpush3.bf16.msra.mxu0 %v720_v1  ;;  %711 = vmatpush3.bf16.msra.mxu1 %v720_v1  ;;  %v725_v6 = vld [vmem:[%s1020_s1 + $0x58] sm:$0xff]   ;;  %v727_v8 = vld [vmem:[%s1020_s1 + $0x60] sm:$0xff]   ;;  %v729_v10 = vld [vmem:[%s1020_s1 + $0x68] sm:$0xff]  }
   0x4   :  { %611 = vmatprep.subr.bf16.mxu0 %v721_v2  ;;  %704 = vmatprep.subr.bf16.mxu1 %v721_v2  ;;  %v726_v7 = vld [vmem:[%s1020_s1 + $0x18] sm:$0xff]   ;;  %v728_v9 = vld [vmem:[%s1020_s1 + $0x20] sm:$0xff]   ;;  %v730_v13 = vld [vmem:[%s1020_s1 + $0x28] sm:$0xff]  }
   0x5   :  { %v737_v11 = vld [vmem:[%s1021_s0 + $0x4] ss:$12 sps:$4 sm:$0xff]   ;;  %v740_v12 = vld [vmem:[%s1021_s0 + $0x94] ss:$12 sps:$4 sm:$0xff]   ;;  %v733_v16 = vld [vmem:[%s1020_s1 + $0x78] sm:$0xff]  }
   0x6   :  { %v731_v14 = vld [vmem:[%s1020_s1 + $0x70] sm:$0xff]   ;;  %375 = vmatprep.mubr.bf16.mxu0 %v737_v11  ;;  %423 = vmatprep.mubr.bf16.mxu1 %v740_v12  ;;  %v734_v17 = vld [vmem:[%s1020_s1 + $0x38] sm:$0xff]   ;;  %v735_v18 = vld [vmem:[%s1021_s0] ss:$12 sps:$4 sm:$0xff]  }
   0x7   :  { %612 = vmatpush3.bf16.msra.mxu0 %v722_v3  ;;  %712 = vmatpush3.bf16.msra.mxu1 %v722_v3  ;;  %v732_v15 = vld [vmem:[%s1020_s1 + $0x30] sm:$0xff]   ;;  %v741_v19 = vld [vmem:[%s1020_s1 + $0x80] sm:$0xff]   ;;  %v742_v21 = vld [vmem:[%s1021_s0 + $0x1c] ss:$12 sps:$4 sm:$0xff]  }
   0x8   :  { %613 = vmatprep.subr.bf16.mxu0 %v723_v4  ;;  %705 = vmatprep.subr.bf16.mxu1 %v723_v4  ;;  %v738_v20 = vld [vmem:[%s1021_s0 + $0x90] ss:$12 sps:$4 sm:$0xff]   ;;  %v744_v22 = vld [vmem:[%s1021_s0 + $0xac] ss:$12 sps:$4 sm:$0xff]   ;;  %v747_v25 = vld [vmem:[%s1021_s0 + $0xa8] ss:$12 sps:$4 sm:$0xff]  }
   0x9   :  { %v748_v23 = vld [vmem:[%s1020_s1 + $0x88] sm:$0xff]   ;;  %v746_v24 = vld [vmem:[%s1021_s0 + $0x18] ss:$12 sps:$4 sm:$0xff]   ;;  %v749_v26 = vld [vmem:[%s1021_s0 + $0x34] ss:$12 sps:$4 sm:$0xff]  }
   0xa   :  { %v751_v27 = vld [vmem:[%s1021_s0 + $0x8] ss:$12 sps:$4 sm:$0xff]   ;;  %v752_v28 = vld [vmem:[%s1021_s0 + $0x30] ss:$12 sps:$4 sm:$0xff]   ;;  %v753_v29 = vld [vmem:[%s1021_s0 + $0x20] ss:$12 sps:$4 sm:$0xff]  }
   0xb   :  { %614 = vmatpush3.bf16.msra.mxu0 %v724_v5  ;;  %713 = vmatpush3.bf16.msra.mxu1 %v724_v5  ;;  %v754_v30 = vld [vmem:[%s1021_s0 + $0x4c] ss:$12 sps:$4 sm:$0xff]   ;;  %v757_v32 = vld [vmem:[%s1021_s0 + $0x48] ss:$12 sps:$4 sm:$0xff]   ;;  %v758_v33 = vld [vmem:[%s1021_s0 + $0x50] ss:$12 sps:$4 sm:$0xff]  }
   0xc   :  { %615 = vmatprep.subr.bf16.mxu0 %v725_v6  ;;  %706 = vmatprep.subr.bf16.mxu1 %v725_v6  ;;  %v756_v31 = vld [vmem:[%s1021_s0 + $0x38] ss:$12 sps:$4 sm:$0xff]   ;;  %v761_v35 = vld [vmem:[%s1021_s0 + $0x68] ss:$12 sps:$4 sm:$0xff]   ;;  %v762_v36 = vld [vmem:[%s1021_s0 + $0x60] ss:$12 sps:$4 sm:$0xff]  }
   0xd   :  { %v759_v34 = vld [vmem:[%s1021_s0 + $0x64] ss:$12 sps:$4 sm:$0xff]   ;;  %v763_v37 = vld [vmem:[%s1021_s0 + $0x80] ss:$12 sps:$4 sm:$0xff]   ;;  %v764_v38 = vld [vmem:[%s1021_s0 + $0x7c] ss:$12 sps:$4 sm:$0xff]  }
   0xe   :  { %v766_v39 = vld [vmem:[%s1021_s0 + $0x98] ss:$12 sps:$4 sm:$0xff]   ;;  %v768_v41 = vld [vmem:[%s1021_s0 + $0xb0] ss:$12 sps:$4 sm:$0xff]   ;;  %v934_v2 = vld [vmem:[%s1022_s2] ss:$0 sm:$0xff] }
   0xf   :  { %616 = vmatpush3.bf16.msra.mxu0 %v726_v7  ;;  %714 = vmatpush3.bf16.msra.mxu1 %v726_v7  ;;  %v767_v40 = vld [vmem:[%s1021_s0 + $0x78] ss:$12 sps:$4 sm:$0xff]  }
  0x10   :  { %617 = vmatprep.subr.bf16.mxu0 %v727_v8  ;;  %707 = vmatprep.subr.bf16.mxu1 %v727_v8 }
  0x13   :  { %618 = vmatpush3.bf16.msra.mxu0 %v728_v9  ;;  %715 = vmatpush3.bf16.msra.mxu1 %v728_v9 }
  0x14   :  { %619 = vmatprep.subr.bf16.mxu0 %v729_v10  ;;  %708 = vmatprep.subr.bf16.mxu1 %v729_v10 }
  0x17   :  { %620 = vmatpush3.bf16.msra.mxu0 %v730_v13  ;;  %716 = vmatpush3.bf16.msra.mxu1 %v730_v13 }
  0x18   :  { %621 = vmatprep.subr.bf16.mxu0 %v731_v14  ;;  %709 = vmatprep.subr.bf16.mxu1 %v731_v14 }
  0x1b   :  { %622 = vmatpush3.bf16.msra.mxu0 %v732_v15  ;;  %717 = vmatpush3.bf16.msra.mxu1 %v732_v15 }
  0x1c   :  { %623 = vmatprep.subr.bf16.mxu0 %v733_v16  ;;  %710 = vmatprep.subr.bf16.mxu1 %v733_v16 }
  0x1f   :  { %624 = vmatpush3.bf16.msra.mxu0 %v734_v17  ;;  %718 = vmatpush3.bf16.msra.mxu1 %v734_v17 }
  0x20   :  { %683 = vmatprep.subr.bf16.mxu1 %v741_v19 }
  0x22   :  { %376 = vmatmul.mubr.bf16.vlgmr.msra.gmra.mrb[0].mxu0 %v735_v18  ;;  %424 = vmatmul.mubr.bf16.vlgmr.msra.gmra.mrb[0].mxu1 %v738_v20 }
  0x23   :  { %684 = vmatpush3.bf16.msra.mxu1 %v741_v19  ;;  %383 = vmatprep.mubr.bf16.mxu0 %v742_v21 }
  0x24   :  { %431 = vmatprep.mubr.bf16.mxu1 %v744_v22  ;;  %685 = vmatprep.subr.bf16.mxu1 %v748_v23 }
  0x27   :  { %686 = vmatpush3.bf16.msra.mxu1 %v748_v23 }
  0x2a   :  { %384 = vmatmul.mubr.bf16.gmra.mrb[4].mxu0 %v746_v24  ;;  %432 = vmatmul.mubr.bf16.gmra.mrb[4].mxu1 %v747_v25 }
  0x2b   :  { %391 = vmatprep.mubr.bf16.mxu0 %v749_v26  ;;  %687 = vmatprep.mubr.msk.bf16.mxu1 %vm318_vm0, %v751_v27 }
  0x32   :  { %392 = vmatmul.mubr.bf16.gmra.mrb[8].mxu0 %v752_v28  ;;  %688 = vmatmul.mubr.msk.bf16.vlgmr.msra.gmra.mrb[8].mxu1 %vm318_vm0, %v753_v29 }
  0x33   :  { %399 = vmatprep.mubr.bf16.mxu0 %v754_v30  ;;  %691 = vmatprep.mubr.msk.bf16.mxu1 %vm318_vm0, %v756_v31 }
  0x3a   :  { %400 = vmatmul.mubr.bf16.gmra.mrb[12].mxu0 %v757_v32  ;;  %692 = vmatmul.mubr.msk.bf16.gmra.mrb[12].mxu1 %vm318_vm0, %v758_v33 }
  0x3b   :  { %407 = vmatprep.mubr.bf16.mxu0 %v759_v34  ;;  %695 = vmatprep.mubr.msk.bf16.mxu1 %vm318_vm0, %v761_v35 }
  0x42   :  { %408 = vmatmul.mubr.bf16.gmra.mrb[16].mxu0 %v762_v36  ;;  %696 = vmatmul.mubr.msk.bf16.gmra.mrb[16].mxu1 %vm318_vm0, %v763_v37 }
  0x43   :  { %415 = vmatprep.mubr.bf16.mxu0 %v764_v38  ;;  %699 = vmatprep.mubr.msk.bf16.mxu1 %vm318_vm0, %v766_v39 }
  0x4a   :  { %416 = vmatmul.mubr.bf16.gmra.mrb[20].mxu0 %v767_v40  ;;  %700 = vmatmul.mubr.msk.bf16.gmra.mrb[20].mxu1 %vm318_vm0, %v768_v41 }
  0xf5   :  { %v625_v42 = vpop.f32.mrb[0].mxu0  ;;  %v661_v43 = vpop.f32.mrb[0].mxu1 }
  0xf6   :  { %v626_v44 = vpop.f32.mrb[1].mxu0  ;;  %v662_v45 = vpop.f32.mrb[1].mxu1 }
  0xf7   :  { %v627_v46 = vadd.f32 %v626_v44, %v625_v42  ;;  %v628_v47 = vpop.f32.mrb[2].mxu0  ;;  %v923_v48 = vadd.f32 %v662_v45, %v661_v43  ;;  %v664_v49 = vpop.f32.mrb[2].mxu1 }
  0xf8   :  { %v629_v50 = vpop.f32.mrb[3].mxu0  ;;  %v665_v51 = vpop.f32.mrb[3].mxu1 }
  0xf9   :  { %v630_v52 = vadd.f32 %v629_v50, %v628_v47  ;;  %v925_v53 = vadd.f32 %v665_v51, %v664_v49  ;;  %v378_v6 = vadd.f32 %v627_v46, %v934_v2 }
  0xfb   :  { %v381_v15 = vadd.f32 %v630_v52, %v934_v2 }
  0xfd   :  { %v631_v54 = vpop.f32.mrb[4].mxu0  ;;  %v667_v55 = vpop.f32.mrb[4].mxu1 }
  0xfe   :  { %v632_v56 = vpop.f32.mrb[5].mxu0  ;;  %v668_v57 = vpop.f32.mrb[5].mxu1 }
  0xff   :  { %v633_v58 = vadd.f32 %v632_v56, %v631_v54  ;;  %v634_v59 = vpop.f32.mrb[6].mxu0  ;;  %v927_v60 = vadd.f32 %v668_v57, %v667_v55  ;;  %v670_v61 = vpop.f32.mrb[6].mxu1 }
 0x100   :  { %v635_v62 = vpop.f32.mrb[7].mxu0  ;;  %v671_v63 = vpop.f32.mrb[7].mxu1 }
 0x101   :  { %v636_v0 = vadd.f32 %v635_v62, %v634_v59  ;;  %v929_v1 = vadd.f32 %v671_v63, %v670_v61  ;;  %v386_v3 = vadd.f32 %v633_v58, %v934_v2  ;;  %v434_v54 = vadd.f32 %v927_v60, %v934_v2 }
 0x102   :  { %v426_v58 = vadd.f32 %v923_v48, %v934_v2 }
 0x103   :  { %v389_v10 = vadd.f32 %v636_v0, %v934_v2  ;;  %v437_v63 = vadd.f32 %v929_v1, %v934_v2 }
 0x105   :  { %v637_v4 = vpop.f32.mrb[8].mxu0  ;;  %v689_v5 = vpop.f32.mrb[8].mxu1 }
 0x106   :  { %v483_v7 = vadd.f32 %v689_v5, %v386_v3  ;;  %v638_v8 = vpop.f32.mrb[9].mxu0  ;;  %v474_v9 = vpop.f32.mrb[9].mxu1  ;;  %v429_v5 = vadd.f32 %v925_v53, %v934_v2 }
 0x107   :  { %v639_v11 = vadd.f32 %v638_v8, %v637_v4  ;;  %v475_v12 = vadd.f32 %v474_v9, %v378_v6  ;;  %v640_v13 = vpop.f32.mrb[10].mxu0  ;;  %v690_v14 = vpop.f32.mrb[10].mxu1 }
 0x108   :  { %540 = vst.msk [vmem:[%s1023_s3 + $0x10] sm:$0xff] %vm537_vm1, %v483_v7  ;;  %v486_v16 = vadd.f32 %v690_v14, %v389_v10  ;;  %v641_v17 = vpop.f32.mrb[11].mxu0  ;;  %v477_v18 = vpop.f32.mrb[11].mxu1 }
 0x109   :  { %538 = vst.msk [vmem:[%s1023_s3] sm:$0xff] %vm537_vm1, %v475_v12  ;;  %v642_v19 = vadd.f32 %v641_v17, %v640_v13  ;;  %v478_v20 = vadd.f32 %v477_v18, %v381_v15  ;;  %v394_v23 = vadd.f32 %v639_v11, %v934_v2 }
 0x10a   :  { %541 = vst.msk [vmem:[%s1023_s3 + $0x18] sm:$0xff] %vm537_vm1, %v486_v16 }
 0x10b   :  { %539 = vst.msk [vmem:[%s1023_s3 + $0x8] sm:$0xff] %vm537_vm1, %v478_v20  ;;  %v397_v30 = vadd.f32 %v642_v19, %v934_v2 }
 0x10d   :  { %v643_v21 = vpop.f32.mrb[12].mxu0  ;;  %v693_v22 = vpop.f32.mrb[12].mxu1 }
 0x10e   :  { %v644_v24 = vpop.f32.mrb[13].mxu0  ;;  %v490_v25 = vpop.f32.mrb[13].mxu1 }
 0x10f   :  { %v645_v26 = vadd.f32 %v644_v24, %v643_v21  ;;  %v491_v27 = vadd.f32 %v490_v25, %v394_v23  ;;  %v646_v28 = vpop.f32.mrb[14].mxu0  ;;  %v694_v29 = vpop.f32.mrb[14].mxu1 }
 0x110   :  { %v647_v31 = vpop.f32.mrb[15].mxu0  ;;  %v493_v32 = vpop.f32.mrb[15].mxu1 }
 0x111   :  { %v402_v33 = vadd.f32 %v645_v26, %v934_v2  ;;  %542 = vst.msk [vmem:[%s1023_s3 + $0x20] sm:$0xff] %vm537_vm1, %v491_v27  ;;  %v648_v34 = vadd.f32 %v647_v31, %v646_v28  ;;  %v494_v35 = vadd.f32 %v493_v32, %v397_v30 }
 0x113   :  { %v499_v36 = vadd.f32 %v693_v22, %v402_v33  ;;  %v405_v37 = vadd.f32 %v648_v34, %v934_v2  ;;  %543 = vst.msk [vmem:[%s1023_s3 + $0x28] sm:$0xff] %vm537_vm1, %v494_v35 }
 0x115   :  { %544 = vst.msk [vmem:[%s1023_s3 + $0x30] sm:$0xff] %vm537_vm1, %v499_v36  ;;  %v502_v38 = vadd.f32 %v694_v29, %v405_v37  ;;  %v649_v39 = vpop.f32.mrb[16].mxu0  ;;  %v697_v40 = vpop.f32.mrb[16].mxu1 }
 0x116   :  { %v650_v41 = vpop.f32.mrb[17].mxu0  ;;  %v506_v42 = vpop.f32.mrb[17].mxu1 }
 0x117   :  { %545 = vst.msk [vmem:[%s1023_s3 + $0x38] sm:$0xff] %vm537_vm1, %v502_v38  ;;  %v651_v43 = vadd.f32 %v650_v41, %v649_v39  ;;  %v652_v44 = vpop.f32.mrb[18].mxu0  ;;  %v698_v45 = vpop.f32.mrb[18].mxu1 }
 0x118   :  { %v653_v46 = vpop.f32.mrb[19].mxu0  ;;  %v509_v47 = vpop.f32.mrb[19].mxu1 }
 0x119   :  { %v410_v49 = vadd.f32 %v651_v43, %v934_v2  ;;  %v654_v50 = vadd.f32 %v653_v46, %v652_v44 }
 0x11b   :  { %v507_v51 = vadd.f32 %v506_v42, %v410_v49  ;;  %v413_v52 = vadd.f32 %v654_v50, %v934_v2 }
 0x11d   :  { %546 = vst.msk [vmem:[%s1023_s3 + $0x40] sm:$0xff] %vm537_vm1, %v507_v51  ;;  %v510_v55 = vadd.f32 %v509_v47, %v413_v52  ;;  %v655_v56 = vpop.f32.mrb[20].mxu0  ;;  %v701_v57 = vpop.f32.mrb[20].mxu1 }
 0x11e   :  { %v531_v59 = vadd.f32 %v701_v57, %v434_v54  ;;  %v656_v61 = vpop.f32.mrb[21].mxu0  ;;  %v522_v62 = vpop.f32.mrb[21].mxu1 }
 0x11f   :  { %547 = vst.msk [vmem:[%s1023_s3 + $0x48] sm:$0xff] %vm537_vm1, %v510_v55  ;;  %v657_v60 = vadd.f32 %v656_v61, %v655_v56  ;;  %v523_v0 = vadd.f32 %v522_v62, %v426_v58  ;;  %v658_v3 = vpop.f32.mrb[22].mxu0  ;;  %v702_v4 = vpop.f32.mrb[22].mxu1 }
 0x120   :  { %552 = vst.msk [vmem:[%s1023_s3 + $0x70] sm:$0xff] %vm537_vm1, %v531_v59  ;;  %v534_v48 = vadd.f32 %v702_v4, %v437_v63  ;;  %v659_v6 = vpop.f32.mrb[23].mxu0  ;;  %v525_v1 = vpop.f32.mrb[23].mxu1 }
 0x121   :  { %v418_v7 = vadd.f32 %v657_v60, %v934_v2  ;;  %550 = vst.msk [vmem:[%s1023_s3 + $0x60] sm:$0xff] %vm537_vm1, %v523_v0  ;;  %v660_v8 = vadd.f32 %v659_v6, %v658_v3  ;;  %v526_v9 = vadd.f32 %v525_v1, %v429_v5 }
 0x122   :  { %553 = vst.msk [vmem:[%s1023_s3 + $0x78] sm:$0xff] %vm537_vm1, %v534_v48 }
 0x123   :  { %v515_v53 = vadd.f32 %v697_v40, %v418_v7  ;;  %v421_v10 = vadd.f32 %v660_v8, %v934_v2  ;;  %551 = vst.msk [vmem:[%s1023_s3 + $0x68] sm:$0xff] %vm537_vm1, %v526_v9 }
 0x125   :  { %548 = vst.msk [vmem:[%s1023_s3 + $0x50] sm:$0xff] %vm537_vm1, %v515_v53  ;;  %v518_v11 = vadd.f32 %v698_v45, %v421_v10 }
 0x127   :  { %549 = vst.msk [vmem:[%s1023_s3 + $0x58] sm:$0xff] %vm537_vm1, %v518_v11 }

</bundles_post_ra>
